<compile_context>
chip_gen: v6e
topology: v6e:2x2x1
jax: 0.10.0
libtpu: 0.0.40
codegen_flags: <defaults>
</compile_context>

<pallas_src>
import math
from functools import partial

import jax
import jax.numpy as jnp
import numpy as np
from jax.experimental import pallas as pl
from jax.experimental.pallas import tpu as pltpu


# ---------------- fused kernel: fc1 -> dwconv3x3 -> GELU -> fc2 ----------------
def _fused_mlp_kernel(x_top_ref, x_mid_ref, x_bot_ref,
                      w1_ref, b1_ref, cw_ref, cb_ref, w2_ref, b2_ref,
                      o_ref, hp_ref, *, H, W, S):
    # x_top_ref: (1, 1, W, Cin)  row above the strip (clamped at the top edge)
    # x_mid_ref: (1, S, W, Cin)  the strip itself
    # x_bot_ref: (1, 1, W, Cin)  row below the strip (clamped at the bottom edge)
    # w1_ref: (Cin, Chid) bf16   b1_ref: (1, Chid) f32
    # cw_ref: (9, Chid)  f32 (row-major 3x3 depthwise taps)   cb_ref: (1, Chid) f32
    # w2_ref: (Chid, Cout) bf16  b2_ref: (1, Cout) f32
    # o_ref : (1, S*W, Cout) f32
    # hp_ref: VMEM scratch (S+2, W+2, Chid) f32 — zero-padded fc1 activations
    i = pl.program_id(1)
    n_strips = pl.num_programs(1)
    Cin = x_mid_ref.shape[-1]
    C = hp_ref.shape[-1]

    w1 = w1_ref[...]          # resident weights, loaded once per grid step
    b1 = b1_ref[...]

    def fc1(x2d):             # (rows, Cin) f32 -> (rows, Chid) f32 (bf16 MXU, f32 acc)
        return jnp.dot(x2d.astype(jnp.bfloat16), w1,
                       preferred_element_type=jnp.float32) + b1

    # Zero the padded buffer: provides the conv's zero padding at every border.
    hp_ref[...] = jnp.zeros(hp_ref.shape, jnp.float32)

    # fc1 on the strip itself.
    xm = x_mid_ref[0].reshape(S * W, Cin)
    hp_ref[1:S + 1, 1:W + 1, :] = fc1(xm).reshape(S, W, C)

    # fc1 on the halo rows (skipped at the image top/bottom -> rows stay zero).
    @pl.when(i > 0)
    def _():
        hp_ref[0, 1:W + 1, :] = fc1(x_top_ref[0, 0])

    @pl.when(i < n_strips - 1)
    def _():
        hp_ref[S + 1, 1:W + 1, :] = fc1(x_bot_ref[0, 0])

    # Depthwise 3x3 conv (pad=1) + bias + exact (erf) GELU — f32 on VPU/EUP.
    acc = jnp.zeros((S, W, C), jnp.float32)
    for di in range(3):
        for dj in range(3):
            acc = acc + cw_ref[di * 3 + dj] * hp_ref[di:di + S, dj:dj + W, :]
    acc = acc + cb_ref[0]
    acc = 0.5 * acc * (1.0 + jax.lax.erf(acc * jnp.float32(1.0 / math.sqrt(2.0))))

    # fc2 (bf16 MXU, f32 accumulation) and store.
    h2 = acc.reshape(S * W, C).astype(jnp.bfloat16)
    o_ref[0] = jnp.dot(h2, w2_ref[...],
                       preferred_element_type=jnp.float32) + b2_ref[...]


def _pick_strip(H):
    for s in (8, 4, 2, 1):
        if H % s == 0:
            return s
    return 1


# ---------------- wrapper ----------------
@partial(jax.jit, static_argnums=(2, 3))
def mlp_forward(x, params, H, W):
    w1, b1, cw, cb, w2, b2 = params
    B, N, Cin = x.shape
    Chid = w1.shape[1]
    Cout = w2.shape[1]
    assert N == H * W

    S = _pick_strip(H)
    x_img = x.reshape(B, H, W, Cin)           # metadata-only reshape (tokens -> NHWC)
    w1b = w1.astype(jnp.bfloat16)
    w2b = w2.astype(jnp.bfloat16)
    cw9 = cw.reshape(9, Chid)

    kernel = partial(_fused_mlp_kernel, H=H, W=W, S=S)

    out = pl.pallas_call(
        kernel,
        out_shape=jax.ShapeDtypeStruct((B, N, Cout), jnp.float32),
        grid_spec=pltpu.PrefetchScalarGridSpec(
            num_scalar_prefetch=0,
            grid=(B, H // S),
            in_specs=[
                # 1-row halo above (clamped at the top edge; masked in-kernel)
                pl.BlockSpec((1, 1, W, Cin),
                             lambda b, i: (b, jnp.maximum(i * S - 1, 0), 0, 0)),
                # the row strip itself
                pl.BlockSpec((1, S, W, Cin), lambda b, i: (b, i, 0, 0)),
                # 1-row halo below (clamped at the bottom edge; masked in-kernel)
                pl.BlockSpec((1, 1, W, Cin),
                             lambda b, i: (b, jnp.minimum(i * S + S, H - 1), 0, 0)),
                # resident weights / biases (constant index_map -> fetched once)
                pl.BlockSpec((Cin, Chid), lambda b, i: (0, 0)),
                pl.BlockSpec((1, Chid), lambda b, i: (0, 0)),
                pl.BlockSpec((9, Chid), lambda b, i: (0, 0)),
                pl.BlockSpec((1, Chid), lambda b, i: (0, 0)),
                pl.BlockSpec((Chid, Cout), lambda b, i: (0, 0)),
                pl.BlockSpec((1, Cout), lambda b, i: (0, 0)),
            ],
            out_specs=pl.BlockSpec((1, S * W, Cout), lambda b, i: (b, i, 0)),
            scratch_shapes=[pltpu.VMEM((S + 2, W + 2, Chid), jnp.float32)],
        ),
        compiler_params=pltpu.CompilerParams(
            dimension_semantics=("parallel", "parallel"),
            vmem_limit_bytes=32 * 1024 * 1024,
        ),
    )(x_img, x_img, x_img,
      w1b, b1.reshape(1, -1), cw9, cb.reshape(1, -1), w2b, b2.reshape(1, -1))
    return out


# ---------------- pure-JAX reference (validation only; same bf16 matmul path) ----------------
def mlp_reference(x, params, H, W):
    w1, b1, cw, cb, w2, b2 = params
    B, N, Cin = x.shape
    Chid = w1.shape[1]
    Cout = w2.shape[1]
    h = jnp.dot(x.astype(jnp.bfloat16).reshape(B * N, Cin),
                w1.astype(jnp.bfloat16),
                preferred_element_type=jnp.float32) + b1
    h_img = h.reshape(B, H, W, Chid)
    conv = jax.lax.conv_general_dilated(
        h_img, cw.reshape(3, 3, 1, Chid),
        window_strides=(1, 1), padding="SAME",
        dimension_numbers=("NHWC", "HWIO", "NHWC"),
        feature_group_count=Chid) + cb
    g = 0.5 * conv * (1.0 + jax.lax.erf(conv / jnp.sqrt(2.0)))
    out = jnp.dot(g.reshape(B * N, Chid).astype(jnp.bfloat16),
                  w2.astype(jnp.bfloat16),
                  preferred_element_type=jnp.float32) + b2
    return out.reshape(B, N, Cout)


if __name__ == "__main__":
    # Small but lane-dense demo shapes: B=2, H=W=16 (N=256 tokens),
    # in=128, hidden=256, out=128 (all multiples of 128).
    B, H, W = 2, 16, 16
    N = H * W
    Cin, Chid, Cout = 128, 256, 128

    key = jax.random.PRNGKey(0)
    k1, k2, k3, k4 = jax.random.split(key, 4)

    # Deterministic synthetic params (trunc_normal approximated by normal*0.02 — init only)
    w1 = (jax.random.normal(k1, (Cin, Chid)) * 0.02).astype(jnp.float32)
    b1 = jnp.zeros((Chid,), jnp.float32)
    cw = (jax.random.normal(k2, (3, 3, Chid)) * math.sqrt(2.0 / 9.0)).astype(jnp.float32)
    cb = jnp.zeros((Chid,), jnp.float32)
    w2 = (jax.random.normal(k3, (Chid, Cout)) * 0.02).astype(jnp.float32)
    b2 = jnp.zeros((Cout,), jnp.float32)
    params = (w1, b1, cw, cb, w2, b2)

    x = jax.random.normal(k4, (B, N, Cin), jnp.float32)

    out = jax.block_until_ready(mlp_forward(x, params, H, W))
    ref = jax.block_until_ready(mlp_reference(x, params, H, W))

    assert out.shape == (B, N, Cout)
    np.testing.assert_allclose(np.asarray(out), np.asarray(ref), rtol=1e-2, atol=1e-3)
    print("KERNEL_OK")
</pallas_src>

<mosaic_0001>
module attributes {stable_mosaic.version = 11 : i64} {
  func.func @_fused_mlp_kernel(%arg0: i32, %arg1: i32, %arg2: memref<1x1x16x128xf32, #tpu.memory_space<vmem>>, %arg3: memref<1x8x16x128xf32, #tpu.memory_space<vmem>>, %arg4: memref<1x1x16x128xf32, #tpu.memory_space<vmem>>, %arg5: memref<128x256xbf16, #tpu.memory_space<vmem>>, %arg6: memref<1x256xf32, #tpu.memory_space<vmem>>, %arg7: memref<9x256xf32, #tpu.memory_space<vmem>>, %arg8: memref<1x256xf32, #tpu.memory_space<vmem>>, %arg9: memref<256x128xbf16, #tpu.memory_space<vmem>>, %arg10: memref<1x128xf32, #tpu.memory_space<vmem>>, %arg11: memref<1x128x128xf32, #tpu.memory_space<vmem>>, %arg12: memref<10x18x256xf32, #tpu.memory_space<vmem>>) attributes {dimension_semantics = [#tpu.dimension_semantics<parallel>, #tpu.dimension_semantics<parallel>], iteration_bounds = array<i64: 2, 2>, scalar_prefetch = 0 : i64, scratch_operands = 1 : i64, tpu.core_type = #tpu.core_type<tc>, window_params = [{transform_indices = @transform_0, window_bounds = array<i64: 1, 1, 16, 128>}, {transform_indices = @transform_1, window_bounds = array<i64: 1, 8, 16, 128>}, {transform_indices = @transform_2, window_bounds = array<i64: 1, 1, 16, 128>}, {pipeline_mode = #tpu.pipeline_mode<synchronous>, transform_indices = @transform_3, window_bounds = array<i64: 128, 256>}, {pipeline_mode = #tpu.pipeline_mode<synchronous>, transform_indices = @transform_4, window_bounds = array<i64: 1, 256>}, {pipeline_mode = #tpu.pipeline_mode<synchronous>, transform_indices = @transform_5, window_bounds = array<i64: 9, 256>}, {pipeline_mode = #tpu.pipeline_mode<synchronous>, transform_indices = @transform_6, window_bounds = array<i64: 1, 256>}, {pipeline_mode = #tpu.pipeline_mode<synchronous>, transform_indices = @transform_7, window_bounds = array<i64: 256, 128>}, {pipeline_mode = #tpu.pipeline_mode<synchronous>, transform_indices = @transform_8, window_bounds = array<i64: 1, 128>}, {transform_indices = @transform_9, window_bounds = array<i64: 1, 128, 128>}]} {
    %c0 = arith.constant 0 : index
    %c0_0 = arith.constant 0 : index
    %0 = vector.load %arg5[%c0, %c0_0] : memref<128x256xbf16, #tpu.memory_space<vmem>>, vector<128x256xbf16>
    %c0_1 = arith.constant 0 : index
    %c0_2 = arith.constant 0 : index
    %1 = vector.load %arg6[%c0_1, %c0_2] : memref<1x256xf32, #tpu.memory_space<vmem>>, vector<1x256xf32>
    %cst = arith.constant 0.000000e+00 : f32
    %2 = vector.broadcast %cst : f32 to vector<10x18x256xf32>
    %c0_3 = arith.constant 0 : index
    %c0_4 = arith.constant 0 : index
    %c0_5 = arith.constant 0 : index
    %3 = vector.load %arg12[%c0_3, %c0_4, %c0_5] : memref<10x18x256xf32, #tpu.memory_space<vmem>>, vector<10x18x256xf32>
    tpu.vector_store %arg12[%c0_3, %c0_4, %c0_5], %2 {strides = array<i32>} : memref<10x18x256xf32, #tpu.memory_space<vmem>>, vector<10x18x256xf32>,
    %c0_6 = arith.constant 0 : index
    %c0_7 = arith.constant 0 : index
    %c0_8 = arith.constant 0 : index
    %c0_9 = arith.constant 0 : index
    %4 = vector.load %arg3[%c0_6, %c0_7, %c0_8, %c0_9] : memref<1x8x16x128xf32, #tpu.memory_space<vmem>>, vector<1x8x16x128xf32>
    %5 = vector.shape_cast %4 : vector<1x8x16x128xf32> to vector<8x16x128xf32>
    %6 = vector.shape_cast %5 : vector<8x16x128xf32> to vector<128x128xf32>
    %7 = arith.truncf %6 : vector<128x128xf32> to vector<128x128xbf16>
    %cst_10 = arith.constant dense<0.000000e+00> : vector<128x256xf32>
    %8 = tpu.matmul %7, %0, %cst_10 {dimension_numbers = #tpu.dot_dimension_numbers<[1], [0], [0], [1], [0, 0, 1, 1], [], []>} : vector<128x128xbf16>, vector<128x256xbf16>, vector<128x256xf32> -> vector<128x256xf32>
    %9 = vector.broadcast %1 : vector<1x256xf32> to vector<128x256xf32>
    %10 = arith.addf %8, %9 : vector<128x256xf32>
    %11 = vector.shape_cast %10 : vector<128x256xf32> to vector<8x16x256xf32>
    %c1 = arith.constant 1 : index
    %c1_11 = arith.constant 1 : index
    %c0_12 = arith.constant 0 : index
    %12 = vector.load %arg12[%c1, %c1_11, %c0_12] : memref<10x18x256xf32, #tpu.memory_space<vmem>>, vector<8x16x256xf32>
    tpu.vector_store %arg12[%c1, %c1_11, %c0_12], %11 {strides = array<i32>} : memref<10x18x256xf32, #tpu.memory_space<vmem>>, vector<8x16x256xf32>,
    %c0_i32 = arith.constant 0 : i32
    %13 = arith.cmpi sgt, %arg1, %c0_i32 : i32
    %14 = arith.extui %13 : i1 to i32
    %c0_i32_13 = arith.constant 0 : i32
    %15 = arith.cmpi ne, %14, %c0_i32_13 : i32
    scf.if %15 {
      %c0_67 = arith.constant 0 : index
      %c0_68 = arith.constant 0 : index
      %c0_69 = arith.constant 0 : index
      %c0_70 = arith.constant 0 : index
      %106 = vector.load %arg2[%c0_67, %c0_68, %c0_69, %c0_70] : memref<1x1x16x128xf32, #tpu.memory_space<vmem>>, vector<1x1x16x128xf32>
      %107 = vector.shape_cast %106 : vector<1x1x16x128xf32> to vector<16x128xf32>
      %108 = arith.truncf %107 : vector<16x128xf32> to vector<16x128xbf16>
      %cst_71 = arith.constant dense<0.000000e+00> : vector<16x256xf32>
      %109 = tpu.matmul %108, %0, %cst_71 {dimension_numbers = #tpu.dot_dimension_numbers<[1], [0], [0], [1], [0, 0, 1, 1], [], []>} : vector<16x128xbf16>, vector<128x256xbf16>, vector<16x256xf32> -> vector<16x256xf32>
      %110 = vector.broadcast %1 : vector<1x256xf32> to vector<16x256xf32>
      %111 = arith.addf %109, %110 : vector<16x256xf32>
      %c0_72 = arith.constant 0 : index
      %c1_73 = arith.constant 1 : index
      %c0_74 = arith.constant 0 : index
      %112 = vector.load %arg12[%c0_72, %c1_73, %c0_74] : memref<10x18x256xf32, #tpu.memory_space<vmem>>, vector<1x16x256xf32>
      %113 = vector.shape_cast %112 : vector<1x16x256xf32> to vector<16x256xf32>
      %114 = vector.shape_cast %111 : vector<16x256xf32> to vector<1x16x256xf32>
      tpu.vector_store %arg12[%c0_72, %c1_73, %c0_74], %114 {strides = array<i32>} : memref<10x18x256xf32, #tpu.memory_space<vmem>>, vector<1x16x256xf32>,
    } else {
    }
    %c1_i32 = arith.constant 1 : i32
    %16 = arith.cmpi slt, %arg1, %c1_i32 : i32
    %17 = arith.extui %16 : i1 to i32
    %c0_i32_14 = arith.constant 0 : i32
    %18 = arith.cmpi ne, %17, %c0_i32_14 : i32
    scf.if %18 {
      %c0_67 = arith.constant 0 : index
      %c0_68 = arith.constant 0 : index
      %c0_69 = arith.constant 0 : index
      %c0_70 = arith.constant 0 : index
      %106 = vector.load %arg4[%c0_67, %c0_68, %c0_69, %c0_70] : memref<1x1x16x128xf32, #tpu.memory_space<vmem>>, vector<1x1x16x128xf32>
      %107 = vector.shape_cast %106 : vector<1x1x16x128xf32> to vector<16x128xf32>
      %108 = arith.truncf %107 : vector<16x128xf32> to vector<16x128xbf16>
      %cst_71 = arith.constant dense<0.000000e+00> : vector<16x256xf32>
      %109 = tpu.matmul %108, %0, %cst_71 {dimension_numbers = #tpu.dot_dimension_numbers<[1], [0], [0], [1], [0, 0, 1, 1], [], []>} : vector<16x128xbf16>, vector<128x256xbf16>, vector<16x256xf32> -> vector<16x256xf32>
      %110 = vector.broadcast %1 : vector<1x256xf32> to vector<16x256xf32>
      %111 = arith.addf %109, %110 : vector<16x256xf32>
      %c9 = arith.constant 9 : index
      %c1_72 = arith.constant 1 : index
      %c0_73 = arith.constant 0 : index
      %112 = vector.load %arg12[%c9, %c1_72, %c0_73] : memref<10x18x256xf32, #tpu.memory_space<vmem>>, vector<1x16x256xf32>
      %113 = vector.shape_cast %112 : vector<1x16x256xf32> to vector<16x256xf32>
      %114 = vector.shape_cast %111 : vector<16x256xf32> to vector<1x16x256xf32>
      tpu.vector_store %arg12[%c9, %c1_72, %c0_73], %114 {strides = array<i32>} : memref<10x18x256xf32, #tpu.memory_space<vmem>>, vector<1x16x256xf32>,
    } else {
    }
    %cst_15 = arith.constant 0.000000e+00 : f32
    %19 = vector.broadcast %cst_15 : f32 to vector<8x16x256xf32>
    %c0_16 = arith.constant 0 : index
    %c0_17 = arith.constant 0 : index
    %20 = vector.load %arg7[%c0_16, %c0_17] : memref<9x256xf32, #tpu.memory_space<vmem>>, vector<1x256xf32>
    %21 = vector.shape_cast %20 : vector<1x256xf32> to vector<256xf32>
    %c0_18 = arith.constant 0 : index
    %c0_19 = arith.constant 0 : index
    %c0_20 = arith.constant 0 : index
    %22 = vector.load %arg12[%c0_18, %c0_19, %c0_20] : memref<10x18x256xf32, #tpu.memory_space<vmem>>, vector<8x16x256xf32>
    %23 = vector.shape_cast %21 : vector<256xf32> to vector<1x1x256xf32>
    %24 = vector.broadcast %23 : vector<1x1x256xf32> to vector<8x16x256xf32>
    %25 = arith.mulf %24, %22 : vector<8x16x256xf32>
    %26 = arith.addf %19, %25 : vector<8x16x256xf32>
    %c1_21 = arith.constant 1 : index
    %c0_22 = arith.constant 0 : index
    %27 = vector.load %arg7[%c1_21, %c0_22] : memref<9x256xf32, #tpu.memory_space<vmem>>, vector<1x256xf32>
    %28 = vector.shape_cast %27 : vector<1x256xf32> to vector<256xf32>
    %c0_23 = arith.constant 0 : index
    %c1_24 = arith.constant 1 : index
    %c0_25 = arith.constant 0 : index
    %29 = vector.load %arg12[%c0_23, %c1_24, %c0_25] : memref<10x18x256xf32, #tpu.memory_space<vmem>>, vector<8x16x256xf32>
    %30 = vector.shape_cast %28 : vector<256xf32> to vector<1x1x256xf32>
    %31 = vector.broadcast %30 : vector<1x1x256xf32> to vector<8x16x256xf32>
    %32 = arith.mulf %31, %29 : vector<8x16x256xf32>
    %33 = arith.addf %26, %32 : vector<8x16x256xf32>
    %c2 = arith.constant 2 : index
    %c0_26 = arith.constant 0 : index
    %34 = vector.load %arg7[%c2, %c0_26] : memref<9x256xf32, #tpu.memory_space<vmem>>, vector<1x256xf32>
    %35 = vector.shape_cast %34 : vector<1x256xf32> to vector<256xf32>
    %c0_27 = arith.constant 0 : index
    %c2_28 = arith.constant 2 : index
    %c0_29 = arith.constant 0 : index
    %36 = vector.load %arg12[%c0_27, %c2_28, %c0_29] : memref<10x18x256xf32, #tpu.memory_space<vmem>>, vector<8x16x256xf32>
    %37 = vector.shape_cast %35 : vector<256xf32> to vector<1x1x256xf32>
    %38 = vector.broadcast %37 : vector<1x1x256xf32> to vector<8x16x256xf32>
    %39 = arith.mulf %38, %36 : vector<8x16x256xf32>
    %40 = arith.addf %33, %39 : vector<8x16x256xf32>
    %c3 = arith.constant 3 : index
    %c0_30 = arith.constant 0 : index
    %41 = vector.load %arg7[%c3, %c0_30] : memref<9x256xf32, #tpu.memory_space<vmem>>, vector<1x256xf32>
    %42 = vector.shape_cast %41 : vector<1x256xf32> to vector<256xf32>
    %c1_31 = arith.constant 1 : index
    %c0_32 = arith.constant 0 : index
    %c0_33 = arith.constant 0 : index
    %43 = vector.load %arg12[%c1_31, %c0_32, %c0_33] : memref<10x18x256xf32, #tpu.memory_space<vmem>>, vector<8x16x256xf32>
    %44 = vector.shape_cast %42 : vector<256xf32> to vector<1x1x256xf32>
    %45 = vector.broadcast %44 : vector<1x1x256xf32> to vector<8x16x256xf32>
    %46 = arith.mulf %45, %43 : vector<8x16x256xf32>
    %47 = arith.addf %40, %46 : vector<8x16x256xf32>
    %c4 = arith.constant 4 : index
    %c0_34 = arith.constant 0 : index
    %48 = vector.load %arg7[%c4, %c0_34] : memref<9x256xf32, #tpu.memory_space<vmem>>, vector<1x256xf32>
    %49 = vector.shape_cast %48 : vector<1x256xf32> to vector<256xf32>
    %c1_35 = arith.constant 1 : index
    %c1_36 = arith.constant 1 : index
    %c0_37 = arith.constant 0 : index
    %50 = vector.load %arg12[%c1_35, %c1_36, %c0_37] : memref<10x18x256xf32, #tpu.memory_space<vmem>>, vector<8x16x256xf32>
    %51 = vector.shape_cast %49 : vector<256xf32> to vector<1x1x256xf32>
    %52 = vector.broadcast %51 : vector<1x1x256xf32> to vector<8x16x256xf32>
    %53 = arith.mulf %52, %50 : vector<8x16x256xf32>
    %54 = arith.addf %47, %53 : vector<8x16x256xf32>
    %c5 = arith.constant 5 : index
    %c0_38 = arith.constant 0 : index
    %55 = vector.load %arg7[%c5, %c0_38] : memref<9x256xf32, #tpu.memory_space<vmem>>, vector<1x256xf32>
    %56 = vector.shape_cast %55 : vector<1x256xf32> to vector<256xf32>
    %c1_39 = arith.constant 1 : index
    %c2_40 = arith.constant 2 : index
    %c0_41 = arith.constant 0 : index
    %57 = vector.load %arg12[%c1_39, %c2_40, %c0_41] : memref<10x18x256xf32, #tpu.memory_space<vmem>>, vector<8x16x256xf32>
    %58 = vector.shape_cast %56 : vector<256xf32> to vector<1x1x256xf32>
    %59 = vector.broadcast %58 : vector<1x1x256xf32> to vector<8x16x256xf32>
    %60 = arith.mulf %59, %57 : vector<8x16x256xf32>
    %61 = arith.addf %54, %60 : vector<8x16x256xf32>
    %c6 = arith.constant 6 : index
    %c0_42 = arith.constant 0 : index
    %62 = vector.load %arg7[%c6, %c0_42] : memref<9x256xf32, #tpu.memory_space<vmem>>, vector<1x256xf32>
    %63 = vector.shape_cast %62 : vector<1x256xf32> to vector<256xf32>
    %c2_43 = arith.constant 2 : index
    %c0_44 = arith.constant 0 : index
    %c0_45 = arith.constant 0 : index
    %64 = vector.load %arg12[%c2_43, %c0_44, %c0_45] : memref<10x18x256xf32, #tpu.memory_space<vmem>>, vector<8x16x256xf32>
    %65 = vector.shape_cast %63 : vector<256xf32> to vector<1x1x256xf32>
    %66 = vector.broadcast %65 : vector<1x1x256xf32> to vector<8x16x256xf32>
    %67 = arith.mulf %66, %64 : vector<8x16x256xf32>
    %68 = arith.addf %61, %67 : vector<8x16x256xf32>
    %c7 = arith.constant 7 : index
    %c0_46 = arith.constant 0 : index
    %69 = vector.load %arg7[%c7, %c0_46] : memref<9x256xf32, #tpu.memory_space<vmem>>, vector<1x256xf32>
    %70 = vector.shape_cast %69 : vector<1x256xf32> to vector<256xf32>
    %c2_47 = arith.constant 2 : index
    %c1_48 = arith.constant 1 : index
    %c0_49 = arith.constant 0 : index
    %71 = vector.load %arg12[%c2_47, %c1_48, %c0_49] : memref<10x18x256xf32, #tpu.memory_space<vmem>>, vector<8x16x256xf32>
    %72 = vector.shape_cast %70 : vector<256xf32> to vector<1x1x256xf32>
    %73 = vector.broadcast %72 : vector<1x1x256xf32> to vector<8x16x256xf32>
    %74 = arith.mulf %73, %71 : vector<8x16x256xf32>
    %75 = arith.addf %68, %74 : vector<8x16x256xf32>
    %c8 = arith.constant 8 : index
    %c0_50 = arith.constant 0 : index
    %76 = vector.load %arg7[%c8, %c0_50] : memref<9x256xf32, #tpu.memory_space<vmem>>, vector<1x256xf32>
    %77 = vector.shape_cast %76 : vector<1x256xf32> to vector<256xf32>
    %c2_51 = arith.constant 2 : index
    %c2_52 = arith.constant 2 : index
    %c0_53 = arith.constant 0 : index
    %78 = vector.load %arg12[%c2_51, %c2_52, %c0_53] : memref<10x18x256xf32, #tpu.memory_space<vmem>>, vector<8x16x256xf32>
    %79 = vector.shape_cast %77 : vector<256xf32> to vector<1x1x256xf32>
    %80 = vector.broadcast %79 : vector<1x1x256xf32> to vector<8x16x256xf32>
    %81 = arith.mulf %80, %78 : vector<8x16x256xf32>
    %82 = arith.addf %75, %81 : vector<8x16x256xf32>
    %c0_54 = arith.constant 0 : index
    %c0_55 = arith.constant 0 : index
    %83 = vector.load %arg8[%c0_54, %c0_55] : memref<1x256xf32, #tpu.memory_space<vmem>>, vector<1x256xf32>
    %84 = vector.shape_cast %83 : vector<1x256xf32> to vector<256xf32>
    %85 = vector.shape_cast %84 : vector<256xf32> to vector<1x1x256xf32>
    %86 = vector.broadcast %85 : vector<1x1x256xf32> to vector<8x16x256xf32>
    %87 = arith.addf %82, %86 : vector<8x16x256xf32>
    %cst_56 = arith.constant 5.000000e-01 : f32
    %88 = vector.broadcast %cst_56 : f32 to vector<8x16x256xf32>
    %89 = arith.mulf %88, %87 : vector<8x16x256xf32>
    %cst_57 = arith.constant 0.707106769 : f32
    %90 = vector.broadcast %cst_57 : f32 to vector<8x16x256xf32>
    %91 = arith.mulf %87, %90 : vector<8x16x256xf32>
    %92 = math.erf %91 : vector<8x16x256xf32>
    %cst_58 = arith.constant 1.000000e+00 : f32
    %93 = vector.broadcast %cst_58 : f32 to vector<8x16x256xf32>
    %94 = arith.addf %93, %92 : vector<8x16x256xf32>
    %95 = arith.mulf %89, %94 : vector<8x16x256xf32>
    %96 = vector.shape_cast %95 : vector<8x16x256xf32> to vector<128x256xf32>
    %97 = arith.truncf %96 : vector<128x256xf32> to vector<128x256xbf16>
    %c0_59 = arith.constant 0 : index
    %c0_60 = arith.constant 0 : index
    %98 = vector.load %arg9[%c0_59, %c0_60] : memref<256x128xbf16, #tpu.memory_space<vmem>>, vector<256x128xbf16>
    %cst_61 = arith.constant dense<0.000000e+00> : vector<128x128xf32>
    %99 = tpu.matmul %97, %98, %cst_61 {dimension_numbers = #tpu.dot_dimension_numbers<[1], [0], [0], [1], [0, 0, 1, 1], [], []>} : vector<128x256xbf16>, vector<256x128xbf16>, vector<128x128xf32> -> vector<128x128xf32>
    %c0_62 = arith.constant 0 : index
    %c0_63 = arith.constant 0 : index
    %100 = vector.load %arg10[%c0_62, %c0_63] : memref<1x128xf32, #tpu.memory_space<vmem>>, vector<1x128xf32>
    %101 = vector.broadcast %100 : vector<1x128xf32> to vector<128x128xf32>
    %102 = arith.addf %99, %101 : vector<128x128xf32>
    %c0_64 = arith.constant 0 : index
    %c0_65 = arith.constant 0 : index
    %c0_66 = arith.constant 0 : index
    %103 = vector.load %arg11[%c0_64, %c0_65, %c0_66] : memref<1x128x128xf32, #tpu.memory_space<vmem>>, vector<1x128x128xf32>
    %104 = vector.shape_cast %103 : vector<1x128x128xf32> to vector<128x128xf32>
    %105 = vector.shape_cast %102 : vector<128x128xf32> to vector<1x128x128xf32>
    tpu.vector_store %arg11[%c0_64, %c0_65, %c0_66], %105 {strides = array<i32>} : memref<1x128x128xf32, #tpu.memory_space<vmem>>, vector<1x128x128xf32>,
    return
  }
  func.func @transform_0(%arg0: i32, %arg1: i32) -> (i32, i32, i32, i32) {
    %c8_i32 = arith.constant 8 : i32
    %0 = arith.muli %arg1, %c8_i32 : i32
    %c1_i32 = arith.constant 1 : i32
    %1 = arith.subi %0, %c1_i32 : i32
    %c0_i32 = arith.constant 0 : i32
    %2 = arith.maxsi %1, %c0_i32 : i32
    %c0_i32_0 = arith.constant 0 : i32
    %c0_i32_1 = arith.constant 0 : i32
    %c0_i32_2 = arith.constant 0 : i32
    return %arg0, %2, %c0_i32_0, %c0_i32_1 : i32, i32, i32, i32
  }
  func.func @transform_1(%arg0: i32, %arg1: i32) -> (i32, i32, i32, i32) {
    %c0_i32 = arith.constant 0 : i32
    %c0_i32_0 = arith.constant 0 : i32
    %c0_i32_1 = arith.constant 0 : i32
    return %arg0, %arg1, %c0_i32, %c0_i32_0 : i32, i32, i32, i32
  }
  func.func @transform_2(%arg0: i32, %arg1: i32) -> (i32, i32, i32, i32) {
    %c8_i32 = arith.constant 8 : i32
    %0 = arith.muli %arg1, %c8_i32 : i32
    %c8_i32_0 = arith.constant 8 : i32
    %1 = arith.addi %0, %c8_i32_0 : i32
    %c15_i32 = arith.constant 15 : i32
    %2 = arith.minsi %1, %c15_i32 : i32
    %c0_i32 = arith.constant 0 : i32
    %c0_i32_1 = arith.constant 0 : i32
    %c0_i32_2 = arith.constant 0 : i32
    return %arg0, %2, %c0_i32, %c0_i32_1 : i32, i32, i32, i32
  }
  func.func @transform_3(%arg0: i32, %arg1: i32) -> (i32, i32) {
    %c0_i32 = arith.constant 0 : i32
    %c0_i32_0 = arith.constant 0 : i32
    %c0_i32_1 = arith.constant 0 : i32
    return %c0_i32, %c0_i32_0 : i32, i32
  }
  func.func @transform_4(%arg0: i32, %arg1: i32) -> (i32, i32) {
    %c0_i32 = arith.constant 0 : i32
    %c0_i32_0 = arith.constant 0 : i32
    %c0_i32_1 = arith.constant 0 : i32
    return %c0_i32, %c0_i32_0 : i32, i32
  }
  func.func @transform_5(%arg0: i32, %arg1: i32) -> (i32, i32) {
    %c0_i32 = arith.constant 0 : i32
    %c0_i32_0 = arith.constant 0 : i32
    %c0_i32_1 = arith.constant 0 : i32
    return %c0_i32, %c0_i32_0 : i32, i32
  }
  func.func @transform_6(%arg0: i32, %arg1: i32) -> (i32, i32) {
    %c0_i32 = arith.constant 0 : i32
    %c0_i32_0 = arith.constant 0 : i32
    %c0_i32_1 = arith.constant 0 : i32
    return %c0_i32, %c0_i32_0 : i32, i32
  }
  func.func @transform_7(%arg0: i32, %arg1: i32) -> (i32, i32) {
    %c0_i32 = arith.constant 0 : i32
    %c0_i32_0 = arith.constant 0 : i32
    %c0_i32_1 = arith.constant 0 : i32
    return %c0_i32, %c0_i32_0 : i32, i32
  }
  func.func @transform_8(%arg0: i32, %arg1: i32) -> (i32, i32) {
    %c0_i32 = arith.constant 0 : i32
    %c0_i32_0 = arith.constant 0 : i32
    %c0_i32_1 = arith.constant 0 : i32
    return %c0_i32, %c0_i32_0 : i32, i32
  }
  func.func @transform_9(%arg0: i32, %arg1: i32) -> (i32, i32, i32) {
    %c0_i32 = arith.constant 0 : i32
    %c0_i32_0 = arith.constant 0 : i32
    return %arg0, %arg1, %c0_i32 : i32, i32, i32
  }
}

</mosaic_0001>

<bundles_post_ra>
// kernel: mlp_forward.1
= control target key start
LH: loop header
LB: loop body
LE: loop exit
PB: predicated region body
PF: predicated region fallthrough
CT: control target
= control target key end

     0   :  { %14 = vsyncpa [#allocation4], 0  ;;  %s5790_s0 = inlined_call_operand.vmem [shape: f32[2,16,16,128], index: 0, kind: input, shape index: {}, may-alias: {0,1,2}]   ;;  %s5791_s1 = inlined_call_operand.vmem [shape: f32[2,16,16,128], index: 1, kind: input, shape index: {}, may-alias: {0,1,2}]   ;;  %s5792_s2 = inlined_call_operand.vmem [shape: f32[2,16,16,128], index: 2, kind: input, shape index: {}, may-alias: {0,1,2}]   ;;  %s5793_s3 = inlined_call_operand.vmem [shape: bf16[128,256], index: 3, kind: input, shape index: {}]   ;;  %s5794_s4 = inlined_call_operand.vmem [shape: f32[1,256], index: 4, kind: input, shape index: {}]   ;;  %s5795_s5 = inlined_call_operand.vmem [shape: f32[9,256], index: 5, kind: input, shape index: {}]   ;;  %s5796_s6 = inlined_call_operand.vmem [shape: f32[1,256], index: 6, kind: input, shape index: {}]   ;;  %s5797_s7 = inlined_call_operand.vmem [shape: bf16[256,128], index: 7, kind: input, shape index: {}]   ;;  %s5798_s8 = inlined_call_operand.vmem [shape: f32[1,128], index: 8, kind: input, shape index: {}]   ;;  %s5799_s9 = inlined_call_operand.hbm [shape: f32[2,256,128], index: 9, kind: output, shape index: {}]  }
   0x1   :  { %16 = vsyncpa [#allocation4 + $0x1], 0  ;;  %s4280_s30 = smov 0   ;;  %s4282_s10 = smov 0  }
   0x2   :  { %s4284_s11 = smov 0   ;;  %s4286_s12 = smov 0  }
   0x3   :  { %s4288_s13 = smov 0   ;;  %s4290_s14 = smov 0  }
   0x4   :  { %s4292_s15 = smov 0   ;;  %s4294_s16 = smov 0  }
   0x5 LB: > { %5807 = sst [smem:[#allocation6_spill]] %s4201_s11  ;;  %s3768_s17 = sadd.s32 4294967295, %s4221_s16   ;;  %s4221_s16 = sphi %s4294_s16, %s22_s16   ;;  %s4217_s15 = sphi %s4292_s15, %s5823_s15   ;;  %s4213_s14 = sphi %s4290_s14, %s5822_s14   ;;  %s4209_s13 = sphi %s4288_s13, %s5821_s13   ;;  %s4205_s12 = sphi %s4286_s12, %s5820_s12   ;;  %s4201_s11 = sphi %s4284_s11, %s5819_s11   ;;  %s4197_s10 = sphi %s4282_s10, %s5825_s10   ;;  %s4193_s30 = sphi %s4280_s30, %s5824_s30  }
   0x6   : > { %5808 = sst [smem:[#allocation7_spill]] %s4213_s14  ;;  %s3769_s18 = sadd.s32 4294967294, %s4221_s16  }
   0x7   : > { %5809 = sst [smem:[#allocation8_spill]] %s4217_s15  ;;  %s31_s19 = sadd.s32 1, %s4213_s14 }
   0x8   : > { %p32_p0 = scmp.ge.s32.totalorder %s31_s19, 2  ;;  %s34_s20 = sadd.s32 1, %s4217_s15 }
   0x9   : > { %p279_p1 = scmp.ne.s32.totalorder %s4201_s11, %s4197_s10  ;;  %p280_p2 = scmp.eq.s32.totalorder %s3768_s17, 3 }
   0xa   : > { %s5827_s19 = smov (%p32_p0, %s31_s19), 0  ;;  %s5829_s20 = smov (!%p32_p0, %s34_s20), %s4217_s15 }
   0xb   : > { %5810 = sst [smem:[#allocation9_spill]] %s5827_s19  ;;  %s265_s21 = ssub.s32 %s4213_s14, %s5827_s19 }
   0xc   : > { %p4331_p3 = por %p280_p2, %p279_p1  ;;  %p36_p4 = scmp.ge.s32.totalorder %s5829_s20, 2 }
   0xd   : > { %p285_p5 = scmp.ne.s32.totalorder %s4197_s10, %s4193_s30  ;;  %p286_p6 = scmp.eq.s32.totalorder %s3769_s18, 3 }
   0xe   : > { %p3778_p7 = scmp.ge.s32.totalorder %s4221_s16, 1  ;;  %s5831_s20 = smov (%p36_p4, %s5829_s20), 0 }
   0xf   : > { %5812 = sst [smem:[#allocation10_spill]] %s5831_s20  ;;  %p4340_p8 = por %p286_p6, %p285_p5 }
  0x10   : > { %p376_p9 = scmp.lt.s32.totalorder %s4221_s16, 5  ;;  %s264_s24 = ssub.s32 %s4217_s15, %s5831_s20 }
  0x11   : > { %s269_s25 = sadd.s32 1, %s4201_s11  ;;  %s266_s26 = sor.u32 %s265_s21, %s264_s24 }
  0x12   : > { %p377_p10 = pnand %p3778_p7, %p376_p9  ;;  %p267_p11 = scmp.eq.s32.totalorder %s266_s26, 0 }
  0x13   : > { %s5802_s28 = sand.u32 (!%p377_p10), 1, %s4197_s10   ;;  %p447_p13 = scmp.lt.s32.totalorder (!%p377_p10), %s4209_s13, 1 }
  0x14   : > { %s4349_s27 = scalar_select %p267_p11, %s4201_s11, %s269_s25  }
  0x15   : > { %380 = sbr.rel (%p377_p10) target bundleno = 1356 (0x54c), region = 56  ;;  %s4359_s18 = sshll.u32 (!%p377_p10), %s5802_s28, 7 }
  0x16   : > { %5814 = sst [smem:[#allocation11_spill]] %s4349_s27  ;;  %s4376_s25 = sshll.u32 (!%p377_p10), %s4205_s12, 3 }
  0x17   : > { %s3781_s26 = sadd.s32 (!%p377_p10), 4294967295, %s4376_s25  ;;  %p463_p1 = scmp.lt.s32.totalorder (!%p377_p10), %s4376_s25, 15 }
  0x18   : > { %p445_p12 = scmp.gt.s32.totalorder (!%p377_p10), %s3781_s26, 0  ;;  %p3782_p0 = scmp.lt.s32.totalorder (!%p377_p10), %s3781_s26, 15 }
  0x19   : > { %s5805_s17 = sadd.s32 (!%p377_p10), 8, %s4376_s25  ;;  %p3817_p4 = scmp.le.s32.totalorder (!%p377_p10), %s4205_s12, 0 }
  0x1a   : > { %v4355_v0 = vld [vmem:[%s5793_s3 + $0x74] ss:$8 sps:$4 sm:$0xff]   ;;  %v4364_v1 = vld [vmem:[%s5793_s3 + $0x70] ss:$8 sps:$4 sm:$0xff]   ;;  %v4223_v2 = vmov 0   ;;  %s5833_s26 = smov (!%p445_p12, %s3781_s26), 0  ;;  %v592_v42 = vlaneseq }
  0x1b   : > { %714 = vmatprep.mubr.bf16.mxu0 %v4223_v2  ;;  %754 = vmatprep.mubr.bf16.mxu1 %v4223_v2  ;;  %v4373_v3 = vld [vmem:[%s5793_s3 + $0x64] ss:$8 sps:$4 sm:$0xff]   ;;  %v4383_v4 = vld [vmem:[%s5793_s3 + $0x60] ss:$8 sps:$4 sm:$0xff]   ;;  %v4391_v5 = vld [vmem:[%s5793_s3 + $0x54] ss:$8 sps:$4 sm:$0xff]  }
  0x1c   : > { %682 = vmatprep.subr.bf16.mxu0 %v4355_v0  ;;  %3916 = vmatprep.subr.bf16.mxu1 %v4355_v0  ;;  %v4399_v6 = vld [vmem:[%s5793_s3 + $0x50] ss:$8 sps:$4 sm:$0xff]   ;;  %s4402_s19 = scalar_select %p447_p13, %s4209_s13, 1  ;;  %v4409_v7 = vld [vmem:[%s5793_s3 + $0x44] ss:$8 sps:$4 sm:$0xff]   ;;  %v4224_v8 = vmov 0.0  }
  0x1d   : > { %683 = vmatpush1.bf16.msra.mxu0 %v4364_v1  ;;  %3924 = vmatpush1.bf16.msra.mxu1 %v4364_v1  ;;  %s5835_s26 = smov (!%p3782_p0, %s5833_s26), 15  ;;  %507 = vst [vmem:[#allocation2 + $0xb0] sm:$0xff] %v4224_v8  ;;  %508 = vst [vmem:[#allocation2 + $0x1b0] sm:$0xff] %v4224_v8  ;;  %v4424_v9 = vld [vmem:[%s5793_s3 + $0x40] ss:$8 sps:$4 sm:$0xff]   ;;  %p4429_p2 = scmp.lt.s32.totalorder %s5805_s17, 15 }
  0x1e   : > { %684 = vmatprep.subr.bf16.mxu0 %v4373_v3  ;;  %3917 = vmatprep.subr.bf16.mxu1 %v4373_v3  ;;  %509 = vst [vmem:[#allocation2 + $0xd8] sm:$0xff] %v4224_v8  ;;  %510 = vst [vmem:[#allocation2 + $0x18] sm:$0xff] %v4224_v8  ;;  %s3787_s21 = sshll.u32 %s5835_s26, 1  ;;  %s4417_s24 = sshll.u32 %s4402_s19, 5  ;;  %v4438_v10 = vld [vmem:[%s5793_s3 + $0x34] ss:$8 sps:$4 sm:$0xff]  }
  0x1f   : > { %511 = vst [vmem:[#allocation2 + $0x50] sm:$0x3] %v4224_v8  ;;  %512 = vst [vmem:[#allocation2 + $0x168] sm:$0x3] %v4224_v8  ;;  %s453_s28 = sadd.s32 %s4417_s24, %s3787_s21  ;;  %v4453_v11 = vld [vmem:[%s5793_s3 + $0x30] ss:$8 sps:$4 sm:$0xff]  }
  0x20   : > { %513 = vst [vmem:[#allocation2 + $0x130] sm:$0xff] %v4224_v8  ;;  %561 = vst [vmem:[#allocation2 + $0x1c8] sm:$0xff] %v4224_v8  ;;  %s3789_s20 = sshll.u32 %s453_s28, 3  ;;  %s5816_s26 = sadd.s32 8, %s4376_s25  ;;  %v4464_v12 = vld [vmem:[%s5793_s3 + $0x24] ss:$8 sps:$4 sm:$0xff]  }
  0x21   : > { %685 = vmatpush1.bf16.msra.mxu0 %v4383_v4  ;;  %3925 = vmatpush1.bf16.msra.mxu1 %v4383_v4  ;;  %562 = vst [vmem:[#allocation2 + $0x90] sm:$0xff] %v4224_v8  ;;  %563 = vst [vmem:[#allocation2 + $0x160] sm:$0xff] %v4224_v8  ;;  %s4443_s21 = scalar_lea.vmem %s5790_s0, %s3789_s20  ;;  %s5837_s26 = smov (!%p4429_p2, %s5816_s26), 15  ;;  %v4472_v13 = vld [vmem:[%s5793_s3 + $0x20] ss:$8 sps:$4 sm:$0xff]   ;;  %v593_v43 = vshrl.u32 %v592_v42, 7 }
  0x22   : > { %686 = vmatprep.subr.bf16.mxu0 %v4391_v5  ;;  %3918 = vmatprep.subr.bf16.mxu1 %v4391_v5  ;;  %564 = vst [vmem:[#allocation2 + $0x30] sm:$0xff] %v4224_v8  ;;  %565 = vst [vmem:[#allocation2 + $0x78] sm:$0x3] %v4224_v8  ;;  %s464_s17 = scalar_select %p463_p1, %s4376_s25, 15  ;;  %v4479_v14 = vld [vmem:[%s5793_s3 + $0x14] ss:$8 sps:$4 sm:$0xff]  }
  0x23   : > { %566 = vst [vmem:[#allocation2 + $0x1c0] sm:$0x3] %v4224_v8  ;;  %514 = vst [vmem:[#allocation2 + $0x48] sm:$0xff] %v4224_v8  ;;  %s5839_s26 = smov (!%p4429_p2, %s5837_s26), 15  ;;  %v4488_v15 = vld [vmem:[%s5793_s3 + $0x10] ss:$8 sps:$4 sm:$0xff]  }
  0x24   : > { %517 = vst [vmem:[#allocation2 + $0x118] sm:$0x3] %v4224_v8  ;;  %518 = vst [vmem:[#allocation2 + $0x98] sm:$0x3] %v4224_v8  ;;  %s3791_s19 = sshll.u32 %s464_s17, 1  ;;  %s3798_s17 = sshll.u32 %s5839_s26, 1 }
  0x25   : > { %519 = vst [vmem:[#allocation2 + $0x120] sm:$0xff] %v4224_v8  ;;  %520 = vst [vmem:[#allocation2 + $0x150] sm:$0xff] %v4224_v8  ;;  %687 = vmatpush1.bf16.msra.mxu0 %v4399_v6  ;;  %3926 = vmatpush1.bf16.msra.mxu1 %v4399_v6  ;;  %s467_s20 = sadd.s32 %s3791_s19, %s4417_s24  ;;  %s481_s15 = sadd.s32 %s3798_s17, %s4417_s24  ;;  %v4501_v16 = vld [vmem:[%s5793_s3 + $0x4] ss:$8 sps:$4 sm:$0xff]   ;;  %v4511_v17 = vld [vmem:[%s5793_s3] ss:$8 sps:$4 sm:$0xff]  }
  0x26   : > { %523 = vst [vmem:[#allocation2 + $0xe0] sm:$0x3] %v4224_v8  ;;  %524 = vst [vmem:[#allocation2 + $0x188] sm:$0x3] %v4224_v8  ;;  %688 = vmatprep.subr.bf16.mxu0 %v4409_v7  ;;  %3919 = vmatprep.subr.bf16.mxu1 %v4409_v7  ;;  %s3793_s25 = sshll.u32 %s467_s20, 3  ;;  %s3800_s14 = sshll.u32 %s481_s15, 3 }
  0x27   : > { %525 = vst [vmem:[#allocation2 + $0x138] sm:$0xff] %v4224_v8  ;;  %526 = vst [vmem:[#allocation2 + $0x140] sm:$0xff] %v4224_v8  ;;  %s4493_s27 = scalar_lea.vmem %s5791_s1, %s3793_s25  ;;  %s4506_s25 = scalar_lea.vmem %s5792_s2, %s3800_s14  ;;  %v4541_v44 = vsub.s32 0, %v593_v43  ;;  %v506_v45 = vld [vmem:[%s5794_s4] sm:$0x3]  ;;  %v4546_v46 = vsub.s32 1, %v593_v43 }
  0x28   : > { %529 = vst [vmem:[#allocation2 + $0x1b8] sm:$0x3] %v4224_v8  ;;  %530 = vst [vmem:[#allocation2 + $0x28] sm:$0x3] %v4224_v8  ;;  %v567_v18 = vld [vmem:[%s4493_s27] sm:$0xff]  ;;  %v568_v19 = vld [vmem:[%s4493_s27 + $0x8] sm:$0xff] }
  0x29   : > { %531 = vst [vmem:[#allocation2 + $0xf0] sm:$0xff] %v4224_v8  ;;  %532 = vst [vmem:[#allocation2 + $0x158] sm:$0xff] %v4224_v8  ;;  %689 = vmatpush1.bf16.msra.mxu0 %v4424_v9  ;;  %3927 = vmatpush1.bf16.msra.mxu1 %v4424_v9  ;;  %v575_v20 = vld [vmem:[%s4493_s27 + $0x40] sm:$0xff]  ;;  %v576_v21 = vld [vmem:[%s4493_s27 + $0x48] sm:$0xff]  ;;  %v583_v22 = vpack.c.bf16 %v568_v19, %v567_v18  ;;  %v4549_v47 = vrot.slane %v506_v45, %v4541_v44  ;;  %vm827_vm0 = vcmask 1040384  }
  0x2a   : > { %535 = vst [vmem:[#allocation2 + $0x8] sm:$0x3] %v4224_v8  ;;  %536 = vst [vmem:[#allocation2 + $0x170] sm:$0x3] %v4224_v8  ;;  %690 = vmatprep.subr.bf16.mxu0 %v4438_v10  ;;  %3920 = vmatprep.subr.bf16.mxu1 %v4438_v10  ;;  %v587_v23 = vpack.c.bf16 %v576_v21, %v575_v20  ;;  %v569_v24 = vld [vmem:[%s4493_s27 + $0x10] sm:$0xff]  ;;  %v570_v25 = vld [vmem:[%s4493_s27 + $0x18] sm:$0xff]  ;;  %v4552_v48 = vrot.slane %v506_v45, %v4546_v46 }
  0x2b   : > { %537 = vst [vmem:[#allocation2 + $0xc0] sm:$0xff] %v4224_v8  ;;  %538 = vst [vmem:[#allocation2 + $0xa0] sm:$0xff] %v4224_v8  ;;  %v577_v26 = vld [vmem:[%s4493_s27 + $0x50] sm:$0xff]  ;;  %v578_v27 = vld [vmem:[%s4493_s27 + $0x58] sm:$0xff]  ;;  %v584_v28 = vpack.c.bf16 %v570_v25, %v569_v24 }
  0x2c   : > { %541 = vst [vmem:[#allocation2 + $0x100] sm:$0x3] %v4224_v8  ;;  %542 = vst [vmem:[#allocation2 + $0xf8] sm:$0x3] %v4224_v8  ;;  %v588_v29 = vpack.c.bf16 %v578_v27, %v577_v26  ;;  %v571_v30 = vld [vmem:[%s4493_s27 + $0x20] sm:$0xff]  ;;  %v572_v31 = vld [vmem:[%s4493_s27 + $0x28] sm:$0xff] }
  0x2d   : > { %543 = vst [vmem:[#allocation2 + $0x40] sm:$0xff] %v4224_v8  ;;  %544 = vst [vmem:[#allocation2 + $0xa8] sm:$0xff] %v4224_v8  ;;  %691 = vmatpush1.bf16.msra.mxu0 %v4453_v11  ;;  %3928 = vmatpush1.bf16.msra.mxu1 %v4453_v11  ;;  %v579_v32 = vld [vmem:[%s4493_s27 + $0x60] sm:$0xff]  ;;  %v580_v33 = vld [vmem:[%s4493_s27 + $0x68] sm:$0xff]  ;;  %v585_v34 = vpack.c.bf16 %v572_v31, %v571_v30 }
  0x2e   : > { %547 = vst [vmem:[#allocation2 + $0xb8] sm:$0x3] %v4224_v8  ;;  %548 = vst [vmem:[#allocation2] sm:$0x3] %v4224_v8  ;;  %692 = vmatprep.subr.bf16.mxu0 %v4464_v12  ;;  %3921 = vmatprep.subr.bf16.mxu1 %v4464_v12  ;;  %v589_v35 = vpack.c.bf16 %v580_v33, %v579_v32  ;;  %v573_v36 = vld [vmem:[%s4493_s27 + $0x30] sm:$0xff]  ;;  %v574_v37 = vld [vmem:[%s4493_s27 + $0x38] sm:$0xff] }
  0x2f   : > { %549 = vst [vmem:[#allocation2 + $0x38] sm:$0xff] %v4224_v8  ;;  %550 = vst [vmem:[#allocation2 + $0x20] sm:$0xff] %v4224_v8  ;;  %v581_v38 = vld [vmem:[%s4493_s27 + $0x70] sm:$0xff]  ;;  %v582_v39 = vld [vmem:[%s4493_s27 + $0x78] sm:$0xff]  ;;  %v586_v40 = vpack.c.bf16 %v574_v37, %v573_v36  ;;  %s4603_s27 = scalar_lea.vmem [#allocation3], %s4359_s18 }
  0x30   : > { %553 = vst [vmem:[#allocation2 + $0x88] sm:$0x3] %v4224_v8  ;;  %554 = vst [vmem:[#allocation2 + $0xd0] sm:$0x3] %v4224_v8  ;;  %v590_v41 = vpack.c.bf16 %v582_v39, %v581_v38 }
  0x31   : > { %555 = vst [vmem:[#allocation2 + $0x68] sm:$0xff] %v4224_v8  ;;  %556 = vst [vmem:[#allocation2 + $0xc8] sm:$0xff] %v4224_v8  ;;  %693 = vmatpush1.bf16.msra.mxu0 %v4472_v13  ;;  %3929 = vmatpush1.bf16.msra.mxu1 %v4472_v13 }
  0x32   : > { %559 = vst [vmem:[#allocation2 + $0x178] sm:$0x3] %v4224_v8  ;;  %560 = vst [vmem:[#allocation2 + $0x70] sm:$0x3] %v4224_v8  ;;  %694 = vmatprep.subr.bf16.mxu0 %v4479_v14  ;;  %3922 = vmatprep.subr.bf16.mxu1 %v4479_v14 }
  0x35   : > { %695 = vmatpush1.bf16.msra.mxu0 %v4488_v15  ;;  %3930 = vmatpush1.bf16.msra.mxu1 %v4488_v15 }
  0x36   : > { %696 = vmatprep.subr.bf16.mxu0 %v4501_v16  ;;  %3923 = vmatprep.subr.bf16.mxu1 %v4501_v16 }
  0x39   : > { %697 = vmatpush1.bf16.msra.mxu0 %v4511_v17  ;;  %3931 = vmatpush1.bf16.msra.mxu1 %v4511_v17 }
  0x3c   : > { %715 = vmatmul.mubr.bf16.vlgmr.msra.gmra.mxu0 %v583_v22  ;;  %755 = vmatmul.mubr.bf16.vlgmr.msra.gmra.mxu1 %v587_v23 }
  0x3d   : > { %724 = vmatprep.mubr.bf16.mxu0 %v4223_v2  ;;  %764 = vmatprep.mubr.bf16.mxu1 %v4223_v2 }
  0x44   : > { %725 = vmatmul.mubr.bf16.gmra.mxu0 %v584_v28  ;;  %765 = vmatmul.mubr.bf16.gmra.mxu1 %v588_v29 }
  0x45   : > { %734 = vmatprep.mubr.bf16.mxu0 %v4223_v2  ;;  %774 = vmatprep.mubr.bf16.mxu1 %v4223_v2 }
  0x4c   : > { %735 = vmatmul.mubr.bf16.gmra.mxu0 %v585_v34  ;;  %775 = vmatmul.mubr.bf16.gmra.mxu1 %v589_v35 }
  0x4d   : > { %744 = vmatprep.mubr.bf16.mxu0 %v4223_v2  ;;  %784 = vmatprep.mubr.bf16.mxu1 %v4223_v2 }
  0x54   : > { %745 = vmatmul.mubr.bf16.gmra.mxu0 %v586_v40  ;;  %785 = vmatmul.mubr.bf16.gmra.mxu1 %v590_v41 }
  0xfc   : > { %v716_v49 = vpop.f32.mrf.mxu0  ;;  %v756_v50 = vpop.f32.mrf.mxu1 }
  0xfd   : > { %v717_v51 = vadd.f32 %v716_v49, %v4549_v47  ;;  %v757_v52 = vadd.f32 %v756_v50, %v4549_v47 }
  0xfe   : > { %v718_v53 = vpop.f32.mrf.mxu0  ;;  %v758_v54 = vpop.f32.mrf.mxu1 }
  0xff   : > { %v828_v55 = vrot.slane %v717_v51, 7  ;;  %v852_v56 = vrot.slane %v757_v52, 7  ;;  %v719_v57 = vadd.f32 %v718_v53, %v4552_v48  ;;  %v759_v58 = vadd.f32 %v758_v54, %v4552_v48 }
 0x100   : > { %v720_v59 = vpop.f32.mrf.mxu0  ;;  %v760_v60 = vpop.f32.mrf.mxu1 }
 0x101   : > { %925 = vst [vmem:[#allocation2 + $0x130] sm:$0xfe] %v828_v55  ;;  %949 = vst [vmem:[#allocation2 + $0xc0] sm:$0xfe] %v852_v56  ;;  %v829_v61 = vrot.slane %v719_v57, 7  ;;  %v853_v62 = vrot.slane %v759_v58, 7  ;;  %v721_v63 = vadd.f32 %v720_v59, %v4549_v47  ;;  %v761_v2 = vadd.f32 %v760_v60, %v4549_v47 }
 0x102   : > { %v722_v8 = vpop.f32.mrf.mxu0  ;;  %v762_v18 = vpop.f32.mrf.mxu1 }
 0x103   : > { %926 = vst [vmem:[#allocation2 + $0x48] sm:$0xfe] %v829_v61  ;;  %950 = vst [vmem:[#allocation2 + $0xa0] sm:$0xfe] %v853_v62  ;;  %v830_v19 = vrot.slane %v721_v63, 7  ;;  %v854_v20 = vrot.slane %v761_v2, 7  ;;  %v723_v21 = vadd.f32 %v722_v8, %v4552_v48  ;;  %v763_v22 = vadd.f32 %v762_v18, %v4552_v48 }
 0x104   : > { %v726_v23 = vpop.f32.mrf.mxu0  ;;  %v766_v24 = vpop.f32.mrf.mxu1 }
 0x105   : > { %v831_v25 = vsel %vm827_vm0, %v828_v55, %v830_v19  ;;  %929 = vst [vmem:[#allocation2 + $0x118] sm:$0x1] %v830_v19  ;;  %v855_v26 = vsel %vm827_vm0, %v852_v56, %v854_v20  ;;  %953 = vst [vmem:[#allocation2 + $0x100] sm:$0x1] %v854_v20  ;;  %v832_v27 = vrot.slane %v723_v21, 7  ;;  %v856_v28 = vrot.slane %v763_v22, 7 }
 0x106   : > { %927 = vst [vmem:[#allocation2 + $0x180] sm:$0xff] %v831_v25  ;;  %951 = vst [vmem:[#allocation2 + $0x148] sm:$0xff] %v855_v26  ;;  %v727_v29 = vadd.f32 %v726_v23, %v4549_v47  ;;  %v767_v30 = vadd.f32 %v766_v24, %v4549_v47  ;;  %v728_v31 = vpop.f32.mrf.mxu0  ;;  %v768_v32 = vpop.f32.mrf.mxu1 }
 0x107   : > { %v833_v33 = vsel %vm827_vm0, %v829_v61, %v832_v27  ;;  %930 = vst [vmem:[#allocation2 + $0x98] sm:$0x1] %v832_v27  ;;  %v857_v34 = vsel %vm827_vm0, %v853_v62, %v856_v28  ;;  %954 = vst [vmem:[#allocation2 + $0xf8] sm:$0x1] %v856_v28  ;;  %v729_v35 = vadd.f32 %v728_v31, %v4552_v48 }
 0x108   : > { %v769_v36 = vadd.f32 %v768_v32, %v4552_v48  ;;  %928 = vst [vmem:[#allocation2 + $0x110] sm:$0xff] %v833_v33  ;;  %952 = vst [vmem:[#allocation2 + $0x1d0] sm:$0xff] %v857_v34  ;;  %v834_v37 = vrot.slane %v727_v29, 7  ;;  %v858_v38 = vrot.slane %v767_v30, 7  ;;  %v730_v39 = vpop.f32.mrf.mxu0  ;;  %v770_v40 = vpop.f32.mrf.mxu1 }
 0x109   : > { %v835_v41 = vrot.slane %v729_v35, 7  ;;  %v731_v43 = vadd.f32 %v730_v39, %v4549_v47  ;;  %v771_v45 = vadd.f32 %v770_v40, %v4549_v47 }
 0x10a   : > { %v859_v42 = vrot.slane %v769_v36, 7  ;;  %931 = vst [vmem:[#allocation2 + $0x120] sm:$0xfe] %v834_v37  ;;  %955 = vst [vmem:[#allocation2 + $0x40] sm:$0xfe] %v858_v38  ;;  %v732_v49 = vpop.f32.mrf.mxu0  ;;  %v772_v50 = vpop.f32.mrf.mxu1 }
 0x10b   : > { %932 = vst [vmem:[#allocation2 + $0x150] sm:$0xfe] %v835_v41  ;;  %v836_v51 = vrot.slane %v731_v43, 7  ;;  %v860_v52 = vrot.slane %v771_v45, 7  ;;  %v733_v53 = vadd.f32 %v732_v49, %v4552_v48  ;;  %v773_v54 = vadd.f32 %v772_v50, %v4552_v48 }
 0x10c   : > { %956 = vst [vmem:[#allocation2 + $0xa8] sm:$0xfe] %v859_v42  ;;  %v736_v55 = vpop.f32.mrf.mxu0  ;;  %v776_v56 = vpop.f32.mrf.mxu1 }
 0x10d   : > { %v837_v57 = vsel %vm827_vm0, %v834_v37, %v836_v51  ;;  %935 = vst [vmem:[#allocation2 + $0xe0] sm:$0x1] %v836_v51  ;;  %v861_v58 = vsel %vm827_vm0, %v858_v38, %v860_v52  ;;  %959 = vst [vmem:[#allocation2 + $0xb8] sm:$0x1] %v860_v52  ;;  %v838_v59 = vrot.slane %v733_v53, 7  ;;  %v862_v60 = vrot.slane %v773_v54, 7 }
 0x10e   : > { %933 = vst [vmem:[#allocation2 + $0x108] sm:$0xff] %v837_v57  ;;  %957 = vst [vmem:[#allocation2 + $0x190] sm:$0xff] %v861_v58  ;;  %v737_v61 = vadd.f32 %v736_v55, %v4549_v47  ;;  %v777_v62 = vadd.f32 %v776_v56, %v4549_v47  ;;  %v738_v63 = vpop.f32.mrf.mxu0  ;;  %v778_v2 = vpop.f32.mrf.mxu1 }
 0x10f   : > { %v839_v8 = vsel %vm827_vm0, %v835_v41, %v838_v59  ;;  %936 = vst [vmem:[#allocation2 + $0x188] sm:$0x1] %v838_v59  ;;  %v863_v18 = vsel %vm827_vm0, %v859_v42, %v862_v60  ;;  %960 = vst [vmem:[#allocation2] sm:$0x1] %v862_v60  ;;  %v739_v19 = vadd.f32 %v738_v63, %v4552_v48 }
 0x110   : > { %v779_v20 = vadd.f32 %v778_v2, %v4552_v48  ;;  %934 = vst [vmem:[#allocation2 + $0x60] sm:$0xff] %v839_v8  ;;  %958 = vst [vmem:[#allocation2 + $0x1a0] sm:$0xff] %v863_v18  ;;  %v840_v21 = vrot.slane %v737_v61, 7  ;;  %v864_v22 = vrot.slane %v777_v62, 7  ;;  %v740_v23 = vpop.f32.mrf.mxu0  ;;  %v780_v24 = vpop.f32.mrf.mxu1 }
 0x111   : > { %v841_v25 = vrot.slane %v739_v19, 7  ;;  %v741_v27 = vadd.f32 %v740_v23, %v4549_v47  ;;  %v781_v28 = vadd.f32 %v780_v24, %v4549_v47 }
 0x112   : > { %v865_v26 = vrot.slane %v779_v20, 7  ;;  %937 = vst [vmem:[#allocation2 + $0x138] sm:$0xfe] %v840_v21  ;;  %961 = vst [vmem:[#allocation2 + $0x38] sm:$0xfe] %v864_v22  ;;  %v742_v29 = vpop.f32.mrf.mxu0  ;;  %v782_v30 = vpop.f32.mrf.mxu1 }
 0x113   : > { %938 = vst [vmem:[#allocation2 + $0x140] sm:$0xfe] %v841_v25  ;;  %v842_v31 = vrot.slane %v741_v27, 7  ;;  %v866_v32 = vrot.slane %v781_v28, 7  ;;  %v743_v33 = vadd.f32 %v742_v29, %v4552_v48  ;;  %v783_v34 = vadd.f32 %v782_v30, %v4552_v48 }
 0x114   : > { %962 = vst [vmem:[#allocation2 + $0x20] sm:$0xfe] %v865_v26  ;;  %v746_v35 = vpop.f32.mrf.mxu0  ;;  %v786_v36 = vpop.f32.mrf.mxu1 }
 0x115   : > { %v843_v37 = vsel %vm827_vm0, %v840_v21, %v842_v31  ;;  %941 = vst [vmem:[#allocation2 + $0x1b8] sm:$0x1] %v842_v31  ;;  %v867_v38 = vsel %vm827_vm0, %v864_v22, %v866_v32  ;;  %965 = vst [vmem:[#allocation2 + $0x88] sm:$0x1] %v866_v32  ;;  %v844_v39 = vrot.slane %v743_v33, 7  ;;  %v868_v40 = vrot.slane %v783_v34, 7 }
 0x116   : > { %939 = vst [vmem:[#allocation2 + $0x80] sm:$0xff] %v843_v37  ;;  %963 = vst [vmem:[#allocation2 + $0x10] sm:$0xff] %v867_v38  ;;  %v747_v41 = vadd.f32 %v746_v35, %v4549_v47  ;;  %v787_v42 = vadd.f32 %v786_v36, %v4549_v47  ;;  %v748_v43 = vpop.f32.mrf.mxu0  ;;  %v788_v45 = vpop.f32.mrf.mxu1 }
 0x117   : > { %v845_v49 = vsel %vm827_vm0, %v841_v25, %v844_v39  ;;  %942 = vst [vmem:[#allocation2 + $0x28] sm:$0x1] %v844_v39  ;;  %v869_v50 = vsel %vm827_vm0, %v865_v26, %v868_v40  ;;  %966 = vst [vmem:[#allocation2 + $0xd0] sm:$0x1] %v868_v40  ;;  %v749_v51 = vadd.f32 %v748_v43, %v4552_v48 }
 0x118   : > { %v789_v52 = vadd.f32 %v788_v45, %v4552_v48  ;;  %940 = vst [vmem:[#allocation2 + $0x1a8] sm:$0xff] %v845_v49  ;;  %964 = vst [vmem:[#allocation2 + $0x58] sm:$0xff] %v869_v50  ;;  %v846_v53 = vrot.slane %v747_v41, 7  ;;  %v870_v54 = vrot.slane %v787_v42, 7  ;;  %v750_v55 = vpop.f32.mrf.mxu0  ;;  %v790_v56 = vpop.f32.mrf.mxu1 }
 0x119   : > { %v847_v57 = vrot.slane %v749_v51, 7  ;;  %v751_v59 = vadd.f32 %v750_v55, %v4549_v47  ;;  %v791_v60 = vadd.f32 %v790_v56, %v4549_v47 }
 0x11a   : > { %v871_v58 = vrot.slane %v789_v52, 7  ;;  %943 = vst [vmem:[#allocation2 + $0xf0] sm:$0xfe] %v846_v53  ;;  %967 = vst [vmem:[#allocation2 + $0x68] sm:$0xfe] %v870_v54  ;;  %v752_v61 = vpop.f32.mrf.mxu0  ;;  %v792_v62 = vpop.f32.mrf.mxu1 }
 0x11b   : > { %944 = vst [vmem:[#allocation2 + $0x158] sm:$0xfe] %v847_v57  ;;  %v848_v63 = vrot.slane %v751_v59, 7  ;;  %v872_v2 = vrot.slane %v791_v60, 7  ;;  %v753_v8 = vadd.f32 %v752_v61, %v4552_v48  ;;  %v793_v18 = vadd.f32 %v792_v62, %v4552_v48 }
 0x11c   : > { %968 = vst [vmem:[#allocation2 + $0xc8] sm:$0xfe] %v871_v58  ;;  %976 = sbr.rel (%p3817_p4) target bundleno = 526 (0x20e), region = 60 }
 0x11d   : > { %v849_v19 = vsel %vm827_vm0, %v846_v53, %v848_v63  ;;  %947 = vst [vmem:[#allocation2 + $0x8] sm:$0x1] %v848_v63  ;;  %v873_v20 = vsel %vm827_vm0, %v870_v54, %v872_v2  ;;  %971 = vst [vmem:[#allocation2 + $0x178] sm:$0x1] %v872_v2  ;;  %v850_v21 = vrot.slane %v753_v8, 7  ;;  %v874_v22 = vrot.slane %v793_v18, 7 }
 0x11e   : > { %945 = vst [vmem:[#allocation2 + $0x128] sm:$0xff] %v849_v19  ;;  %969 = vst [vmem:[#allocation2 + $0x198] sm:$0xff] %v873_v20 }
 0x11f   : > { %v851_v23 = vsel %vm827_vm0, %v847_v57, %v850_v21  ;;  %948 = vst [vmem:[#allocation2 + $0x170] sm:$0x1] %v850_v21  ;;  %v875_v24 = vsel %vm827_vm0, %v871_v58, %v874_v22  ;;  %972 = vst [vmem:[#allocation2 + $0x70] sm:$0x1] %v874_v22 }
 0x120   : > { %946 = vst [vmem:[#allocation2 + $0x1d8] sm:$0xff] %v851_v23  ;;  %970 = vst [vmem:[#allocation2 + $0xe8] sm:$0xff] %v875_v24 }
 0x121   : > { %980 = vmatprep.subr.bf16.mxu0 %v4355_v0  ;;  %v4225_v25 = vmov 0   ;;  %v977_v26 = vld [vmem:[%s4443_s21] sm:$0xff]  ;;  %v978_v27 = vld [vmem:[%s4443_s21 + $0x8] sm:$0xff] }
 0x122   : > { %981 = vmatpush1.bf16.msra.mxu0 %v4364_v1  ;;  %1012 = vmatprep.mubr.bf16.mxu0 %v4225_v25  ;;  %v979_v28 = vpack.c.bf16 %v978_v27, %v977_v26 }
 0x123   : > { %982 = vmatprep.subr.bf16.mxu0 %v4373_v3 }
 0x126   : > { %983 = vmatpush1.bf16.msra.mxu0 %v4383_v4 }
 0x127   : > { %984 = vmatprep.subr.bf16.mxu0 %v4391_v5 }
 0x12a   : > { %985 = vmatpush1.bf16.msra.mxu0 %v4399_v6 }
 0x12b   : > { %986 = vmatprep.subr.bf16.mxu0 %v4409_v7 }
 0x12e   : > { %987 = vmatpush1.bf16.msra.mxu0 %v4424_v9 }
 0x12f   : > { %988 = vmatprep.subr.bf16.mxu0 %v4438_v10 }
 0x132   : > { %989 = vmatpush1.bf16.msra.mxu0 %v4453_v11 }
 0x133   : > { %990 = vmatprep.subr.bf16.mxu0 %v4464_v12 }
 0x136   : > { %991 = vmatpush1.bf16.msra.mxu0 %v4472_v13 }
 0x137   : > { %992 = vmatprep.subr.bf16.mxu0 %v4479_v14 }
 0x13a   : > { %993 = vmatpush1.bf16.msra.mxu0 %v4488_v15 }
 0x13b   : > { %994 = vmatprep.subr.bf16.mxu0 %v4501_v16 }
 0x13e   : > { %995 = vmatpush1.bf16.msra.mxu0 %v4511_v17 }
 0x141   : > { %1013 = vmatmul.mubr.bf16.vlgmr.msra.gmra.mxu0 %v979_v28 }
 0x201   : > { %v1014_v29 = vpop.f32.mrf.mxu0 }
 0x202   : > { %v1015_v30 = vadd.f32 %v1014_v29, %v4549_v47 }
 0x203   : > { %v1016_v31 = vpop.f32.mrf.mxu0 }
 0x204   : > { %v1027_v32 = vrot.slane %v1015_v30, 7  ;;  %v1017_v33 = vadd.f32 %v1016_v31, %v4552_v48 }
 0x205   : > { %v1018_v34 = vpop.f32.mrf.mxu0 }
 0x206   : > { %1039 = vst [vmem:[#allocation2 + $0xb0] sm:$0xfe] %v1027_v32  ;;  %v1028_v35 = vrot.slane %v1017_v33, 7  ;;  %v1019_v36 = vadd.f32 %v1018_v34, %v4549_v47 }
 0x207   : > { %v1020_v37 = vpop.f32.mrf.mxu0 }
 0x208   : > { %1040 = vst [vmem:[#allocation2 + $0x1b0] sm:$0xfe] %v1028_v35  ;;  %v1029_v38 = vrot.slane %v1019_v36, 7  ;;  %v1021_v39 = vadd.f32 %v1020_v37, %v4552_v48 }
 0x20a   : > { %v1030_v40 = vsel %vm827_vm0, %v1027_v32, %v1029_v38  ;;  %1043 = vst [vmem:[#allocation2 + $0x50] sm:$0x1] %v1029_v38  ;;  %v1031_v41 = vrot.slane %v1021_v39, 7 }
 0x20b   : > { %1041 = vst [vmem:[#allocation2 + $0xd8] sm:$0xff] %v1030_v40 }
 0x20c   : > { %v1032_v42 = vsel %vm827_vm0, %v1028_v35, %v1031_v41  ;;  %1044 = vst [vmem:[#allocation2 + $0x168] sm:$0x1] %v1031_v41 }
 0x20d   : > { %1042 = vst [vmem:[#allocation2 + $0x18] sm:$0xff] %v1032_v42 }
 0x20e PF: > { %p3818_p5 = scmp.ge.s32.totalorder %s4205_s12, 1 }
 0x210   : > { %1048 = sbr.rel (%p3818_p5) target bundleno = 770 (0x302), region = 64 }
 0x215   : > { %1052 = vmatprep.subr.bf16.mxu0 %v4355_v0  ;;  %v4226_v43 = vmov 0   ;;  %v1049_v0 = vld [vmem:[%s4506_s25] sm:$0xff] }
 0x216   : > { %1053 = vmatpush1.bf16.msra.mxu0 %v4364_v1  ;;  %1084 = vmatprep.mubr.bf16.mxu0 %v4226_v43  ;;  %v1050_v1 = vld [vmem:[%s4506_s25 + $0x8] sm:$0xff] }
 0x217   : > { %1054 = vmatprep.subr.bf16.mxu0 %v4373_v3  ;;  %v1051_v3 = vpack.c.bf16 %v1050_v1, %v1049_v0 }
 0x21a   : > { %1055 = vmatpush1.bf16.msra.mxu0 %v4383_v4 }
 0x21b   : > { %1056 = vmatprep.subr.bf16.mxu0 %v4391_v5 }
 0x21e   : > { %1057 = vmatpush1.bf16.msra.mxu0 %v4399_v6 }
 0x21f   : > { %1058 = vmatprep.subr.bf16.mxu0 %v4409_v7 }
 0x222   : > { %1059 = vmatpush1.bf16.msra.mxu0 %v4424_v9 }
 0x223   : > { %1060 = vmatprep.subr.bf16.mxu0 %v4438_v10 }
 0x226   : > { %1061 = vmatpush1.bf16.msra.mxu0 %v4453_v11 }
 0x227   : > { %1062 = vmatprep.subr.bf16.mxu0 %v4464_v12 }
 0x22a   : > { %1063 = vmatpush1.bf16.msra.mxu0 %v4472_v13 }
 0x22b   : > { %1064 = vmatprep.subr.bf16.mxu0 %v4479_v14 }
 0x22e   : > { %1065 = vmatpush1.bf16.msra.mxu0 %v4488_v15 }
 0x22f   : > { %1066 = vmatprep.subr.bf16.mxu0 %v4501_v16 }
 0x232   : > { %1067 = vmatpush1.bf16.msra.mxu0 %v4511_v17 }
 0x235   : > { %1085 = vmatmul.mubr.bf16.vlgmr.msra.gmra.mxu0 %v1051_v3 }
 0x2f5   : > { %v1086_v4 = vpop.f32.mrf.mxu0 }
 0x2f6   : > { %v1087_v5 = vadd.f32 %v1086_v4, %v4549_v47 }
 0x2f7   : > { %v1088_v6 = vpop.f32.mrf.mxu0 }
 0x2f8   : > { %v1099_v7 = vrot.slane %v1087_v5, 7  ;;  %v1089_v9 = vadd.f32 %v1088_v6, %v4552_v48 }
 0x2f9   : > { %v1090_v10 = vpop.f32.mrf.mxu0 }
 0x2fa   : > { %1112 = vst [vmem:[#allocation2 + $0x1c8] sm:$0xfe] %v1099_v7  ;;  %v1100_v11 = vrot.slane %v1089_v9, 7  ;;  %v1091_v12 = vadd.f32 %v1090_v10, %v4549_v47 }
 0x2fb   : > { %v1092_v13 = vpop.f32.mrf.mxu0 }
 0x2fc   : > { %1113 = vst [vmem:[#allocation2 + $0x90] sm:$0xfe] %v1100_v11  ;;  %v1101_v14 = vrot.slane %v1091_v12, 7  ;;  %v1093_v15 = vadd.f32 %v1092_v13, %v4552_v48 }
 0x2fe   : > { %v1102_v16 = vsel %vm827_vm0, %v1099_v7, %v1101_v14  ;;  %1116 = vst [vmem:[#allocation2 + $0x78] sm:$0x1] %v1101_v14  ;;  %v1103_v17 = vrot.slane %v1093_v15, 7 }
 0x2ff   : > { %1114 = vst [vmem:[#allocation2 + $0x160] sm:$0xff] %v1102_v16 }
 0x300   : > { %v1104_v45 = vsel %vm827_vm0, %v1100_v11, %v1103_v17  ;;  %1117 = vst [vmem:[#allocation2 + $0x1c0] sm:$0x1] %v1103_v17 }
 0x301   : > { %1115 = vst [vmem:[#allocation2 + $0x30] sm:$0xff] %v1104_v45 }
 0x302 PF: > { %v4049_v49 = vld [vmem:[%s5797_s7 + $0x78] sm:$0xff]   ;;  %v4051_v48 = vld [vmem:[%s5797_s7 + $0x70] sm:$0xff]   ;;  %v4053_v51 = vld [vmem:[%s5797_s7 + $0x68] sm:$0xff]   ;;  %vm1367_vm1 = vcmask 1046528   ;;  %vm1653_vm2 = vcmask 1045504   ;;  %s3845_s15 = sshll.u32 %s4205_s12, 4 }
 0x303   : > { %v4050_v47 = vld [vmem:[%s5797_s7 + $0x38] sm:$0xff]   ;;  %3852 = vmatprep.subr.bf16.mxu0 %v4049_v49  ;;  %3932 = vmatprep.subr.bf16.mxu1 %v4049_v49  ;;  %v4052_v50 = vld [vmem:[%s5797_s7 + $0x30] sm:$0xff]   ;;  %v4054_v52 = vld [vmem:[%s5797_s7 + $0x28] sm:$0xff]   ;;  %s3846_s26 = sshll.u32 %s4209_s13, 5  ;;  %s3641_s28 = sshll.u32 %s4603_s27, 4  ;;  %s5733_s28 = int_to_ptr.vmem [resolvable:$true] %s3641_s28 }
 0x304   : > { %3853 = vmatpush3.bf16.msra.mxu0 %v4050_v47  ;;  %3940 = vmatpush3.bf16.msra.mxu1 %v4050_v47  ;;  %v4055_v53 = vld [vmem:[%s5797_s7 + $0x60] sm:$0xff]   ;;  %v4057_v55 = vld [vmem:[%s5797_s7 + $0x58] sm:$0xff]   ;;  %v4059_v57 = vld [vmem:[%s5797_s7 + $0x50] sm:$0xff]   ;;  %s3638_s29 = sadd.s32 %s3846_s26, %s3845_s15  ;;  %s5817_s13 = sand.u32 1, %s4197_s10  }
 0x305   : > { %3854 = vmatprep.subr.bf16.mxu0 %v4051_v48  ;;  %3933 = vmatprep.subr.bf16.mxu1 %v4051_v48  ;;  %v4056_v54 = vld [vmem:[%s5797_s7 + $0x20] sm:$0xff]   ;;  %v4058_v56 = vld [vmem:[%s5797_s7 + $0x18] sm:$0xff]   ;;  %v1120_v59 = vld [vmem:[#allocation2 + $0x1b0] sm:$0xff]  ;;  %s3847_s14 = sshll.u32 %s3638_s29, 7  ;;  %s5739_s20 = scalar_lea.sflag [#allocation4], %s5817_s13 }
 0x306   : > { %v1118_v58 = vld [vmem:[%s5795_s5] ss:$8 sm:$0x3]  ;;  %v1122_v60 = vld [vmem:[#allocation2 + $0x18] sm:$0xff]  ;;  %v1229_v63 = vld [vmem:[#allocation2 + $0x1b0] sm:$0xfe]  ;;  %s5731_s12 = scalar_lea.hbm %s5799_s9, %s3847_s14 }
 0x307   : > { %v4692_v61 = vrot.slane %v1118_v58, %v4546_v46  ;;  %v3819_v62 = vld [vmem:[%s5795_s5 + $0x1] ss:$8 sm:$0x3]  ;;  %v4060_v2 = vld [vmem:[%s5797_s7 + $0x10] sm:$0xff]   ;;  %v4701_v8 = vrot.slane %v1118_v58, %v4541_v44  ;;  %v1231_v18 = vld [vmem:[#allocation2 + $0x168] sm:$0x1] }
 0x308   : > { %3855 = vmatpush3.bf16.msra.mxu0 %v4052_v50  ;;  %3941 = vmatpush3.bf16.msra.mxu1 %v4052_v50  ;;  %v4704_v19 = vrot.slane %v3819_v62, %v4541_v44  ;;  %v4707_v20 = vrot.slane %v3819_v62, %v4546_v46  ;;  %v3820_v21 = vld [vmem:[%s5795_s5 + $0x2] ss:$8 sm:$0x3]  ;;  %v1515_v25 = vld [vmem:[#allocation2 + $0x1b0] sm:$0xfc]  ;;  %s4129_s11 = scalar_lea.vmem %s5733_s28, 2048 }
 0x309   : > { %3856 = vmatprep.subr.bf16.mxu0 %v4053_v51  ;;  %3934 = vmatprep.subr.bf16.mxu1 %v4053_v51  ;;  %v4061_v22 = vld [vmem:[%s5797_s7 + $0x48] sm:$0xff]   ;;  %v1163_v23 = vmul.f32 %v4692_v61, %v1120_v59  ;;  %v1165_v24 = vmul.f32 %v4692_v61, %v1122_v60  ;;  %v4718_v27 = vrot.slane %v3820_v21, %v4541_v44  ;;  %v4752_v3 = vld [vmem:[#allocation2 + $0x110] sm:$0xff]  ;;  %v4063_v5 = vld [vmem:[%s5797_s7 + $0x40] sm:$0xff]   ;;  %p4130_p6 = scmp.ne.s32.totalorder %s5733_s28, %s4129_s11  ;;  %s4227_s24 = smov [#allocation3]  }
 0x30a   : > { %v1517_v26 = vld [vmem:[#allocation2 + $0x168] sm:$0x3]  ;;  %v1272_v28 = vmul.f32 %v4707_v20, %v1229_v63  ;;  %v1274_v29 = vmul.f32 %v4707_v20, %v1122_v60  ;;  %v1276_v30 = vmul.f32 %v4707_v20, %v1231_v18  ;;  %v3821_v31 = vld [vmem:[%s5795_s5 + $0x3] ss:$8 sm:$0x3]  ;;  %v4730_v33 = vrot.slane %v3820_v21, %v4546_v46  ;;  %s4133_s17 = sshll.u32 %s4227_s24, 4  ;;  %s4134_s17 = int_to_ptr.vmem [resolvable:$false] %s4133_s17 }
 0x30b   : > { %v3822_v32 = vld [vmem:[%s5795_s5 + $0x4] ss:$8 sm:$0x3]  ;;  %v4735_v35 = vrot.slane %v3821_v31, %v4541_v44  ;;  %v4738_v36 = vrot.slane %v3821_v31, %v4546_v46  ;;  %v1912_v10 = vld [vmem:[#allocation2 + $0x98] sm:$0x1]  ;;  %p4131_p7 = pnand %p4130_p6, %p4331_p3  ;;  %s4135_s18 = scalar_lea.vmem %s4134_s17, 4096 }
 0x30c   : > { %3857 = vmatpush3.bf16.msra.mxu0 %v4054_v52  ;;  %3942 = vmatpush3.bf16.msra.mxu1 %v4054_v52  ;;  %v4732_v34 = vld [vmem:[#allocation2 + $0x48] sm:$0xff]  ;;  %v4741_v37 = vrot.slane %v3822_v32, %v4541_v44  ;;  %v1371_v38 = vrot.slane %v1272_v28, 1  ;;  %v1372_v39 = vrot.slane %v1274_v29, 1  ;;  %v1376_v40 = vrot.slane %v1276_v30, 1  ;;  %v4064_v48 = vld [vmem:[%s5797_s7] sm:$0xff]   ;;  %p4136_p10 = scmp.lt.s32.totalorder %s5733_s28, %s4134_s17  ;;  %p4137_p11 = scmp.lt.s32.totalorder %s4135_s18, %s4129_s11 }
 0x30d   : > { %3858 = vmatprep.subr.bf16.mxu0 %v4055_v53  ;;  %3935 = vmatprep.subr.bf16.mxu1 %v4055_v53  ;;  %v4744_v41 = vrot.slane %v3822_v32, %v4546_v46  ;;  %v4062_v42 = vld [vmem:[%s5797_s7 + $0x8] sm:$0xff]   ;;  %v1558_v43 = vmul.f32 %v4730_v33, %v1515_v25  ;;  %v1560_v0 = vmul.f32 %v4730_v33, %v1122_v60  ;;  %v2197_v62 = vld [vmem:[#allocation2 + $0x98] sm:$0x3]  ;;  %p4132_p9 = pneg %p4131_p7 }
 0x30e   : > { %v1562_v1 = vmul.f32 %v4730_v33, %v1517_v26  ;;  %v1910_v4 = vld [vmem:[#allocation2 + $0x48] sm:$0xfe]  ;;  %v1373_v6 = vsel %vm1367_vm1, %v1371_v38, %v1372_v39  ;;  %v1377_v7 = vsel %vm1367_vm1, %v1372_v39, %v1376_v40  ;;  %v1844_v9 = vmul.f32 %v4738_v36, %v4732_v34  ;;  %v3826_v30 = vld [vmem:[%s5795_s5 + $0x10] ss:$8 sm:$0x3]  ;;  %p4138_p12 = por %p4137_p11, %p4136_p10 }
 0x30f   : > { %v3823_v11 = vld [vmem:[%s5795_s5 + $0x5] ss:$8 sm:$0x3]  ;;  %v1481_v12 = vadd.f32 %v1373_v6, %v1163_v23  ;;  %v1483_v13 = vadd.f32 %v1377_v7, %v1165_v24  ;;  %v1657_v14 = vrot.slane %v1558_v43, 2  ;;  %v1658_v15 = vrot.slane %v1560_v0, 2 }
 0x310   : > { %3859 = vmatpush3.bf16.msra.mxu0 %v4056_v54  ;;  %3943 = vmatpush3.bf16.msra.mxu1 %v4056_v54  ;;  %v1662_v16 = vrot.slane %v1562_v1, 2  ;;  %v1846_v17 = vmul.f32 %v4738_v36, %v4752_v3  ;;  %v1953_v45 = vmul.f32 %v4744_v41, %v1910_v4  ;;  %v1955_v49 = vmul.f32 %v4744_v41, %v4752_v3  ;;  %v3824_v47 = vld [vmem:[%s5795_s5 + $0x6] ss:$8 sm:$0x3]  ;;  %v2590_v40 = vld [vmem:[#allocation2 + $0x150] sm:$0xfe]  ;;  %p4139_p13 = pnand %p4138_p12, %p4132_p9 }
 0x311   : > { %3860 = vmatprep.subr.bf16.mxu0 %v4057_v55  ;;  %3936 = vmatprep.subr.bf16.mxu1 %v4057_v55  ;;  %v1659_v50 = vsel %vm1653_vm2, %v1657_v14, %v1658_v15  ;;  %v1957_v51 = vmul.f32 %v4744_v41, %v1912_v10  ;;  %v4778_v52 = vrot.slane %v3823_v11, %v4541_v44  ;;  %v3825_v53 = vld [vmem:[%s5795_s5 + $0x7] ss:$8 sm:$0x3]  ;;  %v3157_v43 = vld [vmem:[%s5796_s6] sm:$0x3] }
 0x312   : > { %v1663_v54 = vsel %vm1653_vm2, %v1658_v15, %v1662_v16  ;;  %v1767_v55 = vadd.f32 %v1659_v50, %v1481_v12  ;;  %v2195_v58 = vld [vmem:[#allocation2 + $0x48] sm:$0xfc]  ;;  %v4785_v63 = vrot.slane %v3823_v11, %v4546_v46  ;;  %v4790_v18 = vrot.slane %v3824_v47, %v4541_v44  ;;  %v4793_v23 = vld [vmem:[#allocation2 + $0x60] sm:$0xff]  ;;  %v2875_v6 = vld [vmem:[#allocation2 + $0x150] sm:$0xfc] }
 0x313   : > { %v1769_v59 = vadd.f32 %v1663_v54, %v1483_v13  ;;  %v2056_v60 = vrot.slane %v1957_v51, 1  ;;  %v4796_v24 = vrot.slane %v3824_v47, %v4546_v46  ;;  %v4799_v25 = vrot.slane %v3825_v53, %v4541_v44  ;;  %v2877_v15 = vld [vmem:[#allocation2 + $0x188] sm:$0x3]  ;;  %v1136_v54 = vld [vmem:[#allocation2 + $0x158] sm:$0xff] }
 0x314   : > { %3861 = vmatpush3.bf16.msra.mxu0 %v4058_v56  ;;  %3944 = vmatpush3.bf16.msra.mxu1 %v4058_v56  ;;  %v2051_v56 = vrot.slane %v1953_v45, 1  ;;  %v1876_v21 = vadd.f32 %v1844_v9, %v1767_v55  ;;  %v2238_v29 = vmul.f32 %v4785_v63, %v2195_v58  ;;  %v2240_v32 = vmul.f32 %v4785_v63, %v4752_v3  ;;  %v1245_v58 = vld [vmem:[#allocation2 + $0x158] sm:$0xfe] }
 0x315   : > { %3862 = vmatprep.subr.bf16.mxu0 %v4059_v57  ;;  %3937 = vmatprep.subr.bf16.mxu1 %v4059_v57  ;;  %v2052_v57 = vrot.slane %v1955_v49, 1  ;;  %v1878_v26 = vadd.f32 %v1846_v17, %v1769_v59  ;;  %v2242_v38 = vmul.f32 %v4785_v63, %v2197_v62  ;;  %v2526_v4 = vmul.f32 %v4796_v24, %v4793_v23 }
 0x316   : > { %v2336_v1 = vrot.slane %v2238_v29, 2  ;;  %v2337_v7 = vrot.slane %v2240_v32, 2  ;;  %v4820_v10 = vrot.slane %v3826_v30, %v4541_v44  ;;  %v4823_v11 = vrot.slane %v3826_v30, %v4546_v46 }
 0x317   : > { %v2057_v28 = vsel %vm1367_vm1, %v2052_v57, %v2056_v60  ;;  %v2341_v9 = vrot.slane %v2242_v38, 2  ;;  %v4830_v16 = vrot.slane %v3157_v43, %v4541_v44  ;;  %v1179_v32 = vmul.f32 %v4692_v61, %v1136_v54 }
 0x318   : > { %3863 = vmatpush3.bf16.msra.mxu0 %v4060_v2  ;;  %3945 = vmatpush3.bf16.msra.mxu1 %v4060_v2  ;;  %v4787_v2 = vld [vmem:[#allocation2 + $0x150] sm:$0xff]  ;;  %v2163_v0 = vadd.f32 %v2057_v28, %v1878_v26  ;;  %v2338_v17 = vsel %vm1653_vm2, %v2336_v1, %v2337_v7  ;;  %v2918_v49 = vmul.f32 %v4823_v11, %v2875_v6  ;;  %v1531_v28 = vld [vmem:[#allocation2 + $0x158] sm:$0xfc]  ;;  %v4851_v6 = vld [vmem:[#allocation2 + $0xa0] sm:$0xff] }
 0x319   : > { %3864 = vmatprep.subr.bf16.mxu0 %v4061_v22  ;;  %3938 = vmatprep.subr.bf16.mxu1 %v4061_v22  ;;  %v2053_v22 = vsel %vm1367_vm1, %v2051_v56, %v2052_v57  ;;  %v2524_v39 = vmul.f32 %v4796_v24, %v4787_v2  ;;  %v2342_v45 = vsel %vm1653_vm2, %v2337_v7, %v2341_v9  ;;  %v1247_v26 = vld [vmem:[#allocation2 + $0x170] sm:$0x1] }
 0x31a   : > { %v2161_v31 = vadd.f32 %v2053_v22, %v1876_v21  ;;  %v2920_v47 = vmul.f32 %v4823_v11, %v4793_v23  ;;  %v2448_v50 = vadd.f32 %v2342_v45, %v2163_v0  ;;  %v2922_v56 = vmul.f32 %v4823_v11, %v2877_v15  ;;  %v1138_v22 = vld [vmem:[#allocation2 + $0x1d8] sm:$0xff]  ;;  %v1533_v0 = vld [vmem:[#allocation2 + $0x170] sm:$0x3] }
 0x31b   : > { %v3016_v57 = vrot.slane %v2918_v49, 2  ;;  %v4840_v21 = vrot.slane %v3157_v43, %v4546_v46  ;;  %v1298_v43 = vmul.f32 %v4707_v20, %v1138_v22  ;;  %v1300_v1 = vmul.f32 %v4707_v20, %v1247_v26 }
 0x31c   : > { %3865 = vmatpush3.bf16.msra.mxu0 %v4062_v42  ;;  %3946 = vmatpush3.bf16.msra.mxu1 %v4062_v42  ;;  %v2592_v42 = vld [vmem:[#allocation2 + $0x188] sm:$0x1]  ;;  %v3017_v44 = vrot.slane %v2920_v47, 2  ;;  %v2558_v60 = vadd.f32 %v2526_v4, %v2448_v50  ;;  %v1582_v4 = vmul.f32 %v4730_v33, %v1531_v28  ;;  %v1586_v45 = vmul.f32 %v4730_v33, %v1533_v0 }
 0x31d   : > { %3866 = vmatprep.subr.bf16.mxu0 %v4063_v5  ;;  %3939 = vmatprep.subr.bf16.mxu1 %v4063_v5  ;;  %v4817_v5 = vrot.slane %v3825_v53, %v4546_v46  ;;  %v1412_v15 = vrot.slane %v1298_v43, 1 }
 0x31e   : > { %v3018_v30 = vsel %vm1653_vm2, %v3016_v57, %v3017_v44  ;;  %v1697_v49 = vrot.slane %v1582_v4, 2 }
 0x31f   : > { %v2633_v12 = vmul.f32 %v4817_v5, %v2590_v40  ;;  %v2635_v13 = vmul.f32 %v4817_v5, %v4793_v23  ;;  %v2637_v14 = vmul.f32 %v4817_v5, %v2592_v42  ;;  %v1296_v42 = vmul.f32 %v4707_v20, %v1245_v58  ;;  %v2211_v58 = vld [vmem:[#allocation2 + $0xa0] sm:$0xfc] }
 0x320   : > { %3867 = vmatpush3.bf16.msra.mxu0 %v4064_v48  ;;  %3947 = vmatpush3.bf16.msra.mxu1 %v4064_v48  ;;  %v2446_v48 = vadd.f32 %v2338_v17, %v2161_v31  ;;  %v3021_v31 = vrot.slane %v2922_v56, 2  ;;  %v1416_v17 = vrot.slane %v1300_v1, 1  ;;  %v1702_v56 = vrot.slane %v1586_v45, 2  ;;  %v2606_v45 = vld [vmem:[#allocation2 + $0xa8] sm:$0xfe] }
 0x321   : > { %v2731_v51 = vrot.slane %v2633_v12, 1  ;;  %v2732_v53 = vrot.slane %v2635_v13, 1  ;;  %v2736_v55 = vrot.slane %v2637_v14, 1  ;;  %v1411_v12 = vrot.slane %v1296_v42, 1  ;;  %v4854_v14 = vld [vmem:[#allocation2 + $0x1d0] sm:$0xff] }
 0x322   : > { %v2556_v59 = vadd.f32 %v2524_v39, %v2446_v48  ;;  %v1181_v39 = vmul.f32 %v4692_v61, %v1138_v22  ;;  %v3022_v46 = vsel %vm1653_vm2, %v3017_v44, %v3021_v31  ;;  %v1584_v13 = vmul.f32 %v4730_v33, %v1138_v22  ;;  %v1928_v44 = vld [vmem:[#allocation2 + $0xf8] sm:$0x1] }
 0x323   : > { %v2733_v62 = vsel %vm1367_vm1, %v2731_v51, %v2732_v53  ;;  %v2737_v29 = vsel %vm1367_vm1, %v2732_v53, %v2736_v55  ;;  %v1860_v51 = vmul.f32 %v4738_v36, %v4851_v6  ;;  %v1926_v53 = vld [vmem:[#allocation2 + $0xa0] sm:$0xfe]  ;;  %v1413_v54 = vsel %vm1367_vm1, %v1411_v12, %v1412_v15  ;;  %v2213_v42 = vld [vmem:[#allocation2 + $0xf8] sm:$0x3] }
 0x324   : > { %v2841_v38 = vadd.f32 %v2733_v62, %v2556_v59  ;;  %v2843_v40 = vadd.f32 %v2737_v29, %v2558_v60  ;;  %v1698_v50 = vrot.slane %v1584_v13, 2  ;;  %v1417_v55 = vsel %vm1367_vm1, %v1412_v15, %v1416_v17 }
 0x325   : > { %v1862_v57 = vmul.f32 %v4738_v36, %v4854_v14  ;;  %v1497_v26 = vadd.f32 %v1413_v54, %v1179_v32  ;;  %v1499_v28 = vadd.f32 %v1417_v55, %v1181_v39  ;;  %v1977_v31 = vmul.f32 %v4744_v41, %v1926_v53  ;;  %v4876_v32 = vld [vmem:[#allocation2 + $0xa8] sm:$0xff] }
 0x326   : > { %v3126_v7 = vadd.f32 %v3018_v30, %v2841_v38  ;;  %v3128_v9 = vadd.f32 %v3022_v46, %v2843_v40  ;;  %v1699_v29 = vsel %vm1653_vm2, %v1697_v49, %v1698_v50  ;;  %v1703_v30 = vsel %vm1653_vm2, %v1698_v50, %v1702_v56  ;;  %v2608_v49 = vld [vmem:[#allocation2] sm:$0x1]  ;;  %v2891_v54 = vld [vmem:[#allocation2 + $0xa8] sm:$0xfc] }
 0x327   : > { %v1979_v38 = vmul.f32 %v4744_v41, %v4854_v14  ;;  %v1981_v40 = vmul.f32 %v4744_v41, %v1928_v44  ;;  %v1783_v0 = vadd.f32 %v1699_v29, %v1497_v26  ;;  %v1785_v46 = vadd.f32 %v1703_v30, %v1499_v28  ;;  %v2893_v26 = vld [vmem:[#allocation2] sm:$0x3] }
 0x328   : > { %v3170_v47 = vadd.f32 %v4840_v21, %v3126_v7  ;;  %v3172_v48 = vadd.f32 %v4840_v21, %v3128_v9  ;;  %v2262_v43 = vmul.f32 %v4785_v63, %v2211_v58  ;;  %v2091_v39 = vrot.slane %v1977_v31, 1  ;;  %v4880_v9 = vld [vmem:[#allocation2 + $0x1a0] sm:$0xff] }
 0x329   : > { %v2092_v1 = vrot.slane %v1979_v38, 1  ;;  %v2096_v4 = vrot.slane %v1981_v40, 1  ;;  %v2264_v7 = vmul.f32 %v4785_v63, %v4854_v14  ;;  %v1892_v12 = vadd.f32 %v1860_v51, %v1783_v0  ;;  %v1119_v38 = vld [vmem:[#allocation2 + $0xb0] sm:$0xff] }
 0x32a   : > { %v4865_v59 = vmul.f32 0.5, %v3170_v47  ;;  %v4867_v60 = vmul.f32 0.5, %v3172_v48  ;;  %v3234_v62 = vmul.f32 0.70710677, %v3170_v47  ;;  %v3236_v22 = vmul.f32 0.70710677, %v3172_v48 }
 0x32b   : > { %v1894_v13 = vadd.f32 %v1862_v57, %v1785_v46  ;;  %v2266_v15 = vmul.f32 %v4785_v63, %v2213_v42  ;;  %v2376_v17 = vrot.slane %v2262_v43, 2  ;;  %v2093_v47 = vsel %vm1367_vm1, %v2091_v39, %v2092_v1  ;;  %v1121_v43 = vld [vmem:[#allocation2 + $0xd8] sm:$0xff] }
 0x32c   : > { %4065 = verf.f32 %v3234_v62  ;;  %v2097_v48 = vsel %vm1367_vm1, %v2092_v1, %v2096_v4  ;;  %v2377_v50 = vrot.slane %v2264_v7, 2  ;;  %v2540_v53 = vmul.f32 %v4796_v24, %v4876_v32 }
 0x32d   : > { %4067 = verf.f32 %v3236_v22  ;;  %v2177_v55 = vadd.f32 %v2093_v47, %v1892_v12  ;;  %v2179_v56 = vadd.f32 %v2097_v48, %v1894_v13  ;;  %v2381_v44 = vrot.slane %v2266_v15, 2  ;;  %v1228_v12 = vld [vmem:[#allocation2 + $0xb0] sm:$0xfe]  ;;  %v1230_v13 = vld [vmem:[#allocation2 + $0x50] sm:$0x1] }
 0x32e   : > { %v2542_v51 = vmul.f32 %v4796_v24, %v4880_v9  ;;  %v2378_v57 = vsel %vm1653_vm2, %v2376_v17, %v2377_v50  ;;  %v2657_v58 = vmul.f32 %v4817_v5, %v2606_v45  ;;  %v2659_v62 = vmul.f32 %v4817_v5, %v4880_v9  ;;  %v1514_v47 = vld [vmem:[#allocation2 + $0xb0] sm:$0xfc] }
 0x32f   : > { %v2661_v22 = vmul.f32 %v4817_v5, %v2608_v49  ;;  %v2382_v28 = vsel %vm1653_vm2, %v2377_v50, %v2381_v44  ;;  %v2462_v29 = vadd.f32 %v2378_v57, %v2177_v55  ;;  %v2942_v30 = vmul.f32 %v4823_v11, %v2891_v54  ;;  %v1516_v57 = vld [vmem:[#allocation2 + $0x50] sm:$0x3] }
 0x330   : > { %v2944_v31 = vmul.f32 %v4823_v11, %v4880_v9  ;;  %v2464_v40 = vadd.f32 %v2382_v28, %v2179_v56  ;;  %v2771_v42 = vrot.slane %v2657_v58, 1  ;;  %v2772_v0 = vrot.slane %v2659_v62, 1 }
 0x331   : > { %v2776_v46 = vrot.slane %v2661_v22, 1  ;;  %v2572_v39 = vadd.f32 %v2540_v53, %v2462_v29  ;;  %v2946_v1 = vmul.f32 %v4823_v11, %v2893_v26  ;;  %v3056_v4 = vrot.slane %v2942_v30, 2 }
 0x332   : > { %v3057_v7 = vrot.slane %v2944_v31, 2  ;;  %v2574_v15 = vadd.f32 %v2542_v51, %v2464_v40  ;;  %v2773_v17 = vsel %vm1367_vm1, %v2771_v42, %v2772_v0  ;;  %v1162_v49 = vmul.f32 %v4701_v8, %v1119_v38 }
 0x333   : > { %v2777_v45 = vsel %vm1367_vm1, %v2772_v0, %v2776_v46  ;;  %v2857_v48 = vadd.f32 %v2773_v17, %v2572_v39  ;;  %v3061_v54 = vrot.slane %v2946_v1, 2  ;;  %v1164_v53 = vmul.f32 %v4701_v8, %v1121_v43 }
 0x334   : > { %v3058_v50 = vsel %vm1653_vm2, %v3056_v4, %v3057_v7  ;;  %v2859_v55 = vadd.f32 %v2777_v45, %v2574_v15  ;;  %v1271_v56 = vmul.f32 %v4704_v19, %v1228_v12  ;;  %v1273_v44 = vmul.f32 %v4704_v19, %v1121_v43 }
 0x335   : > { %v1275_v51 = vmul.f32 %v4704_v19, %v1230_v13  ;;  %v3062_v62 = vsel %vm1653_vm2, %v3057_v7, %v3061_v54  ;;  %v3142_v22 = vadd.f32 %v3058_v50, %v2857_v48  ;;  %v1557_v26 = vmul.f32 %v4718_v27, %v1514_v47  ;;  %v4915_v13 = vld [vmem:[#allocation2 + $0x130] sm:$0xff]  ;;  %v4921_v47 = vld [vmem:[#allocation2 + $0x180] sm:$0xff] }
 0x336   : > { %v1559_v28 = vmul.f32 %v4718_v27, %v1121_v43  ;;  %v3144_v31 = vadd.f32 %v3062_v62, %v2859_v55  ;;  %v1368_v38 = vrot.slane %v1271_v56, 1  ;;  %v1369_v40 = vrot.slane %v1273_v44, 1  ;;  %v1909_v48 = vld [vmem:[#allocation2 + $0x130] sm:$0xfe]  ;;  %v1911_v56 = vld [vmem:[#allocation2 + $0x118] sm:$0x1] }
 0x337   : > { %v3186_v0 = vadd.f32 %v4840_v21, %v3142_v22  ;;  %v1374_v46 = vrot.slane %v1275_v51, 1  ;;  %v1561_v39 = vmul.f32 %v4718_v27, %v1516_v57  ;;  %v1654_v12 = vrot.slane %v1557_v26, 2  ;;  %v2196_v26 = vld [vmem:[#allocation2 + $0x118] sm:$0x3] }
 0x338   : > { %v3188_v4 = vadd.f32 %v4840_v21, %v3144_v31  ;;  %v1370_v7 = vsel %vm1367_vm1, %v1368_v38, %v1369_v40  ;;  %v1655_v51 = vrot.slane %v1559_v28, 2  ;;  %v1845_v62 = vmul.f32 %v4735_v35, %v4921_v47 }
 0x339   : > { %v4066_v58 = vpop.eup %4065  ;;  %v4918_v15 = vmul.f32 0.5, %v3186_v0  ;;  %v3250_v17 = vmul.f32 0.70710677, %v3186_v0  ;;  %v1375_v45 = vsel %vm1367_vm1, %v1369_v40, %v1374_v46  ;;  %v1480_v54 = vadd.f32 %v1370_v7, %v1162_v49  ;;  %v2589_v7 = vld [vmem:[#allocation2 + $0x120] sm:$0xfe] }
 0x33a   : > { %v4068_v29 = vpop.eup %4067  ;;  %v3298_v30 = vadd.f32 1.0, %v4066_v58  ;;  %v4923_v50 = vmul.f32 0.5, %v3188_v4  ;;  %v1482_v55 = vadd.f32 %v1375_v45, %v1164_v53  ;;  %v1660_v57 = vrot.slane %v1561_v39, 2  ;;  %v2194_v58 = vld [vmem:[#allocation2 + $0x130] sm:$0xfc] }
 0x33b   : > { %v3300_v42 = vadd.f32 1.0, %v4068_v29  ;;  %4069 = verf.f32 %v3250_v17  ;;  %v1952_v22 = vmul.f32 %v4741_v37, %v1909_v48  ;;  %v1656_v49 = vsel %vm1653_vm2, %v1654_v12, %v1655_v51  ;;  %v2591_v48 = vld [vmem:[#allocation2 + $0xe0] sm:$0x1] }
 0x33c   : > { %v3330_v1 = vmul.f32 %v3298_v30, %v4865_v59  ;;  %v3252_v59 = vmul.f32 0.70710677, %v3188_v4  ;;  %v1661_v53 = vsel %vm1653_vm2, %v1655_v51, %v1660_v57  ;;  %v1954_v28 = vmul.f32 %v4741_v37, %v4921_v47  ;;  %v4935_v30 = vld [vmem:[#allocation2 + $0x120] sm:$0xff]  ;;  %v4941_v4 = vld [vmem:[#allocation2 + $0x108] sm:$0xff] }
 0x33d   : > { %v3332_v43 = vmul.f32 %v3300_v42, %v4867_v60  ;;  %v1843_v60 = vmul.f32 %v4735_v35, %v4915_v13  ;;  %v1956_v29 = vmul.f32 %v4741_v37, %v1911_v56  ;;  %v1766_v31 = vadd.f32 %v1656_v49, %v1480_v54 }
 0x33e   : > { %4071 = verf.f32 %v3252_v59  ;;  %v1768_v38 = vadd.f32 %v1661_v53, %v1482_v55  ;;  %v2048_v40 = vrot.slane %v1952_v22, 1  ;;  %v2237_v42 = vmul.f32 %v4778_v52, %v2194_v58 }
 0x33f   : > { %v3362_v44 = vpack.c.bf16 %v3332_v43, %v3330_v1  ;;  %v2049_v0 = vrot.slane %v1954_v28, 1  ;;  %v2054_v46 = vrot.slane %v1956_v29, 1  ;;  %v2239_v39 = vmul.f32 %v4778_v52, %v4921_v47  ;;  %v1135_v28 = vld [vmem:[#allocation2 + $0xf0] sm:$0xff] }
 0x340   : > { %v2241_v1 = vmul.f32 %v4778_v52, %v2196_v26  ;;  %v1875_v12 = vadd.f32 %v1843_v60, %v1766_v31  ;;  %v1877_v43 = vadd.f32 %v1845_v62, %v1768_v38  ;;  %v2333_v17 = vrot.slane %v2237_v42, 2  ;;  %v2876_v62 = vld [vmem:[#allocation2 + $0xe0] sm:$0x3] }
 0x341   : > { %3544 = vmatprep.mubr.bf16.mxu0 %v3362_v44  ;;  %v2523_v45 = vmul.f32 %v4790_v18, %v4935_v30  ;;  %v2050_v59 = vsel %vm1367_vm1, %v2048_v40, %v2049_v0  ;;  %v2055_v54 = vsel %vm1367_vm1, %v2049_v0, %v2054_v46  ;;  %v2334_v55 = vrot.slane %v2239_v39, 2  ;;  %v2874_v44 = vld [vmem:[#allocation2 + $0x120] sm:$0xfc] }
 0x342   : > { %v2339_v56 = vrot.slane %v2241_v1, 2  ;;  %v2160_v51 = vadd.f32 %v2050_v59, %v1875_v12  ;;  %v2162_v57 = vadd.f32 %v2055_v54, %v1877_v43  ;;  %v2525_v58 = vmul.f32 %v4790_v18, %v4941_v4  ;;  %v1244_v1 = vld [vmem:[#allocation2 + $0xf0] sm:$0xfe] }
 0x343   : > { %v2632_v60 = vmul.f32 %v4799_v25, %v2589_v7  ;;  %v2335_v22 = vsel %vm1653_vm2, %v2333_v17, %v2334_v55  ;;  %v2634_v49 = vmul.f32 %v4799_v25, %v4941_v4  ;;  %v2636_v53 = vmul.f32 %v4799_v25, %v2591_v48  ;;  %v1137_v17 = vld [vmem:[#allocation2 + $0x128] sm:$0xff] }
 0x344   : > { %v2340_v26 = vsel %vm1653_vm2, %v2334_v55, %v2339_v56  ;;  %v2445_v29 = vadd.f32 %v2335_v22, %v2160_v51  ;;  %v2917_v40 = vmul.f32 %v4820_v10, %v2874_v44  ;;  %v2919_v46 = vmul.f32 %v4820_v10, %v4941_v4  ;;  %v1246_v44 = vld [vmem:[#allocation2 + $0x8] sm:$0x1] }
 0x345   : > { %v2447_v31 = vadd.f32 %v2340_v26, %v2162_v57  ;;  %v2728_v38 = vrot.slane %v2632_v60, 1  ;;  %v2729_v42 = vrot.slane %v2634_v49, 1  ;;  %v2734_v0 = vrot.slane %v2636_v53, 1 }
 0x346   : > { %v2921_v39 = vmul.f32 %v4820_v10, %v2876_v62  ;;  %v2555_v7 = vadd.f32 %v2523_v45, %v2445_v29  ;;  %v3013_v43 = vrot.slane %v2917_v40, 2  ;;  %v1178_v48 = vmul.f32 %v4701_v8, %v1135_v28  ;;  %v1530_v45 = vld [vmem:[#allocation2 + $0xf0] sm:$0xfc] }
 0x347   : > { %v2557_v12 = vadd.f32 %v2525_v58, %v2447_v31  ;;  %v2730_v59 = vsel %vm1367_vm1, %v2728_v38, %v2729_v42  ;;  %v2735_v54 = vsel %vm1367_vm1, %v2729_v42, %v2734_v0  ;;  %v3014_v55 = vrot.slane %v2919_v46, 2  ;;  %v1532_v42 = vld [vmem:[#allocation2 + $0x8] sm:$0x3] }
 0x348   : > { %v3019_v56 = vrot.slane %v2921_v39, 2  ;;  %v4070_v51 = vpop.eup %4069  ;;  %v2840_v57 = vadd.f32 %v2730_v59, %v2555_v7  ;;  %v1180_v22 = vmul.f32 %v4701_v8, %v1137_v17  ;;  %v1295_v62 = vmul.f32 %v4704_v19, %v1244_v1 }
 0x349   : > { %v2842_v60 = vadd.f32 %v2735_v54, %v2557_v12  ;;  %v3314_v26 = vadd.f32 1.0, %v4070_v51  ;;  %v3015_v49 = vsel %vm1653_vm2, %v3013_v43, %v3014_v55  ;;  %v1297_v28 = vmul.f32 %v4704_v19, %v1137_v17  ;;  %v4976_v51 = vld [vmem:[#allocation2 + $0xc0] sm:$0xff] }
 0x34a   : > { %v3020_v53 = vsel %vm1653_vm2, %v3014_v55, %v3019_v56  ;;  %v3125_v31 = vadd.f32 %v3015_v49, %v2840_v57  ;;  %v1299_v40 = vmul.f32 %v4704_v19, %v1246_v44  ;;  %v1408_v46 = vrot.slane %v1295_v62, 1 }
 0x34b   : > { %v4072_v58 = vpop.eup %4071  ;;  %v3127_v38 = vadd.f32 %v3020_v53, %v2842_v60  ;;  %v3346_v0 = vmul.f32 %v3314_v26, %v4918_v15  ;;  %v1409_v39 = vrot.slane %v1297_v28, 1  ;;  %v1581_v1 = vmul.f32 %v4718_v27, %v1530_v45  ;;  %v4978_v15 = vld [vmem:[#allocation2 + $0x148] sm:$0xff]  ;;  %v1925_v45 = vld [vmem:[#allocation2 + $0xc0] sm:$0xfe] }
 0x34c   : > { %v3316_v29 = vadd.f32 1.0, %v4072_v58  ;;  %v3169_v12 = vadd.f32 %v4830_v16, %v3125_v31  ;;  %v1414_v59 = vrot.slane %v1299_v40, 1  ;;  %v1583_v55 = vmul.f32 %v4718_v27, %v1137_v17  ;;  %v1927_v17 = vld [vmem:[#allocation2 + $0x100] sm:$0x1] }
 0x34d   : > { %v3171_v43 = vadd.f32 %v4830_v16, %v3127_v38  ;;  %v1410_v54 = vsel %vm1367_vm1, %v1408_v46, %v1409_v39  ;;  %v1585_v56 = vmul.f32 %v4718_v27, %v1532_v42  ;;  %v1694_v44 = vrot.slane %v1581_v1, 2  ;;  %v2210_v38 = vld [vmem:[#allocation2 + $0xc0] sm:$0xfc]  ;;  %v2212_v46 = vld [vmem:[#allocation2 + $0x100] sm:$0x3] }
 0x34e   : > { %v3348_v7 = vmul.f32 %v3316_v29, %v4923_v50  ;;  %v4980_v60 = vmul.f32 0.5, %v3169_v12  ;;  %v3233_v62 = vmul.f32 0.70710677, %v3169_v12  ;;  %v1415_v26 = vsel %vm1367_vm1, %v1409_v39, %v1414_v59 }
 0x34f   : > { %v4982_v50 = vmul.f32 0.5, %v3171_v43  ;;  %v3235_v58 = vmul.f32 0.70710677, %v3171_v43  ;;  %v1496_v49 = vadd.f32 %v1410_v54, %v1178_v48  ;;  %v1695_v53 = vrot.slane %v1583_v55, 2  ;;  %v5000_v55 = vld [vmem:[#allocation2 + $0x190] sm:$0xff] }
 0x350   : > { %v3370_v57 = vpack.c.bf16 %v3348_v7, %v3346_v0  ;;  %4073 = verf.f32 %v3233_v62  ;;  %v1498_v28 = vadd.f32 %v1415_v26, %v1180_v22  ;;  %v1700_v29 = vrot.slane %v1585_v56, 2  ;;  %v4995_v7 = vld [vmem:[#allocation2 + $0x40] sm:$0xff] }
 0x351   : > { %v1859_v31 = vmul.f32 %v4735_v35, %v4976_v51  ;;  %4075 = verf.f32 %v3235_v58  ;;  %v1696_v40 = vsel %vm1653_vm2, %v1694_v44, %v1695_v53  ;;  %v1861_v42 = vmul.f32 %v4735_v35, %v4978_v15 }
 0x352   : > { %3576 = vmatprep.mubr.bf16.mxu1 %v3370_v57  ;;  %v1976_v0 = vmul.f32 %v4741_v37, %v1925_v45  ;;  %v1701_v48 = vsel %vm1653_vm2, %v1695_v53, %v1700_v29  ;;  %v1782_v39 = vadd.f32 %v1696_v40, %v1496_v49  ;;  %v1978_v22 = vmul.f32 %v4741_v37, %v4978_v15  ;;  %v2605_v45 = vld [vmem:[#allocation2 + $0x40] sm:$0xfe] }
 0x353   : > { %v1980_v1 = vmul.f32 %v4741_v37, %v1927_v17  ;;  %v1784_v12 = vadd.f32 %v1701_v48, %v1498_v28  ;;  %v2261_v59 = vmul.f32 %v4778_v52, %v2210_v38  ;;  %v2263_v54 = vmul.f32 %v4778_v52, %v4978_v15  ;;  %v2607_v17 = vld [vmem:[#allocation2 + $0xb8] sm:$0x1]  ;;  %v2890_v28 = vld [vmem:[#allocation2 + $0x40] sm:$0xfc] }
 0x354   : > { %v2088_v43 = vrot.slane %v1976_v0, 1  ;;  %v1891_v56 = vadd.f32 %v1859_v31, %v1782_v39  ;;  %v2089_v44 = vrot.slane %v1978_v22, 1  ;;  %v2265_v62 = vmul.f32 %v4778_v52, %v2212_v46  ;;  %v2892_v39 = vld [vmem:[#allocation2 + $0xb8] sm:$0x3] }
 0x355   : > { %v2094_v57 = vrot.slane %v1980_v1, 1  ;;  %v1893_v58 = vadd.f32 %v1861_v42, %v1784_v12  ;;  %v2373_v26 = vrot.slane %v2261_v59, 2  ;;  %v2374_v49 = vrot.slane %v2263_v54, 2 }
 0x356   : > { %v2539_v53 = vmul.f32 %v4790_v18, %v4995_v7  ;;  %v2090_v29 = vsel %vm1367_vm1, %v2088_v43, %v2089_v44  ;;  %v2379_v40 = vrot.slane %v2265_v62, 2  ;;  %v2541_v31 = vmul.f32 %v4790_v18, %v5000_v55 }
 0x357   : > { %v2095_v38 = vsel %vm1367_vm1, %v2089_v44, %v2094_v57  ;;  %v2176_v0 = vadd.f32 %v2090_v29, %v1891_v56  ;;  %v2375_v46 = vsel %vm1653_vm2, %v2373_v26, %v2374_v49  ;;  %v2656_v42 = vmul.f32 %v4799_v25, %v2605_v45  ;;  %v1233_v26 = vld [vmem:[#allocation2 + $0x48] sm:$0xfe] }
 0x358   : > { %v2178_v48 = vadd.f32 %v2095_v38, %v1893_v58  ;;  %v2380_v22 = vsel %vm1653_vm2, %v2374_v49, %v2379_v40  ;;  %v2658_v1 = vmul.f32 %v4799_v25, %v5000_v55  ;;  %v2660_v12 = vmul.f32 %v4799_v25, %v2607_v17  ;;  %v1235_v40 = vld [vmem:[#allocation2 + $0x98] sm:$0x1] }
 0x359   : > { %v2941_v43 = vmul.f32 %v4820_v10, %v2890_v28  ;;  %v2461_v59 = vadd.f32 %v2375_v46, %v2176_v0  ;;  %v2768_v44 = vrot.slane %v2656_v42, 1  ;;  %v2943_v56 = vmul.f32 %v4820_v10, %v5000_v55 }
 0x35a   : > { %v2463_v54 = vadd.f32 %v2380_v22, %v2178_v48  ;;  %v2769_v57 = vrot.slane %v2658_v1, 1  ;;  %v2774_v62 = vrot.slane %v2660_v12, 1  ;;  %v2945_v45 = vmul.f32 %v4820_v10, %v2892_v39 }
 0x35b   : > { %v3053_v58 = vrot.slane %v2941_v43, 2  ;;  %v2571_v49 = vadd.f32 %v2539_v53, %v2461_v59  ;;  %v3054_v38 = vrot.slane %v2943_v56, 2  ;;  %v1167_v17 = vmul.f32 %v4732_v34, %v4692_v61 }
 0x35c   : > { %v2573_v29 = vadd.f32 %v2541_v31, %v2463_v54  ;;  %v2770_v28 = vsel %vm1367_vm1, %v2768_v44, %v2769_v57  ;;  %v2775_v0 = vsel %vm1367_vm1, %v2769_v57, %v2774_v62  ;;  %v3059_v48 = vrot.slane %v2945_v45, 2  ;;  %v1519_v31 = vld [vmem:[#allocation2 + $0x48] sm:$0xfc]  ;;  %v1521_v45 = vld [vmem:[#allocation2 + $0x98] sm:$0x3] }
 0x35d   : > { %v1169_v46 = vmul.f32 %v4752_v3, %v4692_v61  ;;  %v4074_v42 = vpop.eup %4073  ;;  %v2856_v22 = vadd.f32 %v2770_v28, %v2571_v49  ;;  %v3055_v1 = vsel %vm1653_vm2, %v3053_v58, %v3054_v38  ;;  %v1278_v53 = vmul.f32 %v4707_v20, %v1233_v26 }
 0x35e   : > { %v2858_v39 = vadd.f32 %v2775_v0, %v2573_v29  ;;  %v4076_v12 = vpop.eup %4075  ;;  %v3297_v43 = vadd.f32 1.0, %v4074_v42  ;;  %v3060_v34 = vsel %vm1653_vm2, %v3054_v38, %v3059_v48  ;;  %v1280_v59 = vmul.f32 %v4752_v3, %v4707_v20 }
 0x35f   : > { %v1282_v54 = vmul.f32 %v4707_v20, %v1235_v40  ;;  %v3299_v44 = vadd.f32 1.0, %v4076_v12  ;;  %v3141_v56 = vadd.f32 %v3055_v1, %v2856_v22  ;;  %v1381_v62 = vrot.slane %v1278_v53, 1  ;;  %v1916_v12 = vld [vmem:[#allocation2 + $0x188] sm:$0x1] }
 0x360   : > { %v3143_v57 = vadd.f32 %v3060_v34, %v2858_v39  ;;  %v3329_v49 = vmul.f32 %v3297_v43, %v4980_v60  ;;  %v1382_v58 = vrot.slane %v1280_v59, 1  ;;  %v1564_v26 = vmul.f32 %v4730_v33, %v1519_v31  ;;  %v1914_v39 = vld [vmem:[#allocation2 + $0x150] sm:$0xfe] }
 0x361   : > { %v1386_v29 = vrot.slane %v1282_v54, 1  ;;  %v3331_v28 = vmul.f32 %v3299_v44, %v4982_v50  ;;  %v3185_v38 = vadd.f32 %v4830_v16, %v3141_v56  ;;  %v1566_v40 = vmul.f32 %v4752_v3, %v4730_v33  ;;  %v2199_v3 = vld [vmem:[#allocation2 + $0x150] sm:$0xfc] }
 0x362   : > { %v3187_v0 = vadd.f32 %v4830_v16, %v3143_v57  ;;  %v1383_v48 = vsel %vm1367_vm1, %v1381_v62, %v1382_v58  ;;  %v1568_v22 = vmul.f32 %v4730_v33, %v1521_v45  ;;  %v1667_v60 = vrot.slane %v1564_v26, 2 }
 0x363   : > { %v1387_v42 = vsel %vm1367_vm1, %v1382_v58, %v1386_v29  ;;  %v3361_v1 = vpack.c.bf16 %v3331_v28, %v3329_v49  ;;  %v5041_v53 = vmul.f32 0.5, %v3185_v38  ;;  %v3249_v50 = vmul.f32 0.70710677, %v3185_v38 }
 0x364   : > { %v5043_v31 = vmul.f32 0.5, %v3187_v0  ;;  %v3251_v43 = vmul.f32 0.70710677, %v3187_v0  ;;  %v1485_v34 = vadd.f32 %v1383_v48, %v1167_v17  ;;  %v1487_v59 = vadd.f32 %v1387_v42, %v1169_v46  ;;  %v2201_v46 = vld [vmem:[#allocation2 + $0x188] sm:$0x3] }
 0x365   : > { %v1668_v54 = vrot.slane %v1566_v40, 2  ;;  %3545 = vmatmul.mubr.bf16.vlgmr.msra.gmra.mxu0 %v3361_v1  ;;  %4077 = verf.f32 %v3249_v50  ;;  %v1672_v44 = vrot.slane %v1568_v22, 2  ;;  %v1848_v56 = vmul.f32 %v4787_v2, %v4738_v36  ;;  %v5056_v2 = vld [vmem:[#allocation2 + $0x140] sm:$0xff]  ;;  %v5060_v48 = vld [vmem:[#allocation2 + $0x1a8] sm:$0xff] }
 0x366   : > { %v1850_v57 = vmul.f32 %v4793_v23, %v4738_v36  ;;  %4079 = verf.f32 %v3251_v43  ;;  %v1959_v45 = vmul.f32 %v4744_v41, %v1914_v39  ;;  %v1961_v17 = vmul.f32 %v4793_v23, %v4744_v41  ;;  %v2594_v1 = vld [vmem:[#allocation2 + $0x140] sm:$0xfe] }
 0x367   : > { %v1669_v62 = vsel %vm1653_vm2, %v1667_v60, %v1668_v54  ;;  %v1673_v49 = vsel %vm1653_vm2, %v1668_v54, %v1672_v44  ;;  %v1963_v29 = vmul.f32 %v4744_v41, %v1916_v12  ;;  %v2244_v26 = vmul.f32 %v4785_v63, %v2199_v3  ;;  %v2879_v54 = vld [vmem:[#allocation2 + $0x140] sm:$0xfc] }
 0x368   : > { %v1771_v58 = vadd.f32 %v1669_v62, %v1485_v34  ;;  %v1773_v28 = vadd.f32 %v1673_v49, %v1487_v59  ;;  %v2061_v38 = vrot.slane %v1959_v45, 1  ;;  %v2062_v0 = vrot.slane %v1961_v17, 1  ;;  %v2596_v59 = vld [vmem:[#allocation2 + $0x28] sm:$0x1] }
 0x369   : > { %v2246_v40 = vmul.f32 %v4793_v23, %v4785_v63  ;;  %v2066_v22 = vrot.slane %v1963_v29, 1  ;;  %v2248_v60 = vmul.f32 %v4785_v63, %v2201_v46  ;;  %v2346_v39 = vrot.slane %v2244_v26, 2  ;;  %v2881_v46 = vld [vmem:[#allocation2 + $0x28] sm:$0x3] }
 0x36a   : > { %v1880_v42 = vadd.f32 %v1848_v56, %v1771_v58  ;;  %v1882_v50 = vadd.f32 %v1850_v57, %v1773_v28  ;;  %v2063_v12 = vsel %vm1367_vm1, %v2061_v38, %v2062_v0  ;;  %v2528_v34 = vmul.f32 %v4796_v24, %v5056_v2 }
 0x36b   : > { %v2347_v43 = vrot.slane %v2246_v40, 2  ;;  %v2067_v3 = vsel %vm1367_vm1, %v2062_v0, %v2066_v22  ;;  %v2351_v44 = vrot.slane %v2248_v60, 2  ;;  %v2530_v56 = vmul.f32 %v4796_v24, %v5060_v48 }
 0x36c   : > { %v2165_v23 = vadd.f32 %v2063_v12, %v1880_v42  ;;  %v2167_v62 = vadd.f32 %v2067_v3, %v1882_v50  ;;  %v2639_v57 = vmul.f32 %v4817_v5, %v2594_v1  ;;  %v2641_v17 = vmul.f32 %v4817_v5, %v5060_v48  ;;  %v1249_v1 = vld [vmem:[#allocation2 + $0xa0] sm:$0xfe] }
 0x36d   : > { %v2348_v45 = vsel %vm1653_vm2, %v2346_v39, %v2347_v43  ;;  %v2352_v49 = vsel %vm1653_vm2, %v2347_v43, %v2351_v44  ;;  %v2643_v29 = vmul.f32 %v4817_v5, %v2596_v59  ;;  %v2924_v26 = vmul.f32 %v4823_v11, %v2879_v54  ;;  %v1251_v54 = vld [vmem:[#allocation2 + $0xf8] sm:$0x1] }
 0x36e   : > { %v2450_v58 = vadd.f32 %v2348_v45, %v2165_v23  ;;  %v2452_v28 = vadd.f32 %v2352_v49, %v2167_v62  ;;  %v2741_v38 = vrot.slane %v2639_v57, 1  ;;  %v2742_v0 = vrot.slane %v2641_v17, 1 }
 0x36f   : > { %v2926_v40 = vmul.f32 %v4823_v11, %v5060_v48  ;;  %v2746_v22 = vrot.slane %v2643_v29, 1  ;;  %v2928_v60 = vmul.f32 %v4823_v11, %v2881_v46  ;;  %v3026_v39 = vrot.slane %v2924_v26, 2  ;;  %v1535_v46 = vld [vmem:[#allocation2 + $0xa0] sm:$0xfc] }
 0x370   : > { %v2560_v42 = vadd.f32 %v2528_v34, %v2450_v58  ;;  %v2562_v50 = vadd.f32 %v2530_v56, %v2452_v28  ;;  %v2743_v12 = vsel %vm1367_vm1, %v2741_v38, %v2742_v0  ;;  %v1183_v59 = vmul.f32 %v4851_v6, %v4692_v61 }
 0x371   : > { %v3027_v43 = vrot.slane %v2926_v40, 2  ;;  %v2747_v3 = vsel %vm1367_vm1, %v2742_v0, %v2746_v22  ;;  %v3031_v44 = vrot.slane %v2928_v60, 2  ;;  %v1185_v34 = vmul.f32 %v4854_v14, %v4692_v61 }
 0x372   : > { %v2845_v23 = vadd.f32 %v2743_v12, %v2560_v42  ;;  %v4078_v62 = vpop.eup %4077  ;;  %v2847_v45 = vadd.f32 %v2747_v3, %v2562_v50  ;;  %v1302_v56 = vmul.f32 %v4707_v20, %v1249_v1  ;;  %v1304_v17 = vmul.f32 %v4854_v14, %v4707_v20 }
 0x373   : > { %v3028_v57 = vsel %vm1653_vm2, %v3026_v39, %v3027_v43  ;;  %v4080_v49 = vpop.eup %4079  ;;  %v3313_v6 = vadd.f32 1.0, %v4078_v62  ;;  %v3032_v58 = vsel %vm1653_vm2, %v3027_v43, %v3031_v44  ;;  %v1306_v26 = vmul.f32 %v4707_v20, %v1251_v54  ;;  %v1537_v43 = vld [vmem:[#allocation2 + $0xf8] sm:$0x3]  ;;  %v1930_v62 = vld [vmem:[#allocation2 + $0xa8] sm:$0xfe] }
 0x374   : > { %v3130_v29 = vadd.f32 %v3028_v57, %v2845_v23  ;;  %v3315_v28 = vadd.f32 1.0, %v4080_v49  ;;  %v3132_v38 = vadd.f32 %v3032_v58, %v2847_v45  ;;  %v1421_v0 = vrot.slane %v1302_v56, 1  ;;  %v2215_v58 = vld [vmem:[#allocation2 + $0xa8] sm:$0xfc] }
 0x375   : > { %v1422_v40 = vrot.slane %v1304_v17, 1  ;;  %v3345_v42 = vmul.f32 %v3313_v6, %v5041_v53  ;;  %v1426_v60 = vrot.slane %v1306_v26, 1  ;;  %v1588_v39 = vmul.f32 %v4730_v33, %v1535_v46  ;;  %v1932_v17 = vld [vmem:[#allocation2] sm:$0x1] }
 0x376   : > { %v3174_v22 = vadd.f32 %v4840_v21, %v3130_v29  ;;  %v3347_v1 = vmul.f32 %v3315_v28, %v5043_v31  ;;  %v3176_v50 = vadd.f32 %v4840_v21, %v3132_v38  ;;  %v1590_v54 = vmul.f32 %v4854_v14, %v4730_v33  ;;  %v2217_v26 = vld [vmem:[#allocation2] sm:$0x3] }
 0x377   : > { %v1423_v12 = vsel %vm1367_vm1, %v1421_v0, %v1422_v40  ;;  %v1427_v53 = vsel %vm1367_vm1, %v1422_v40, %v1426_v60  ;;  %v1592_v46 = vmul.f32 %v4730_v33, %v1537_v43  ;;  %v1707_v49 = vrot.slane %v1588_v39, 2  ;;  %v5117_v60 = vld [vmem:[#allocation2 + $0x20] sm:$0xff]  ;;  %v5121_v43 = vld [vmem:[#allocation2 + $0x58] sm:$0xff] }
 0x378   : > { %v5099_v3 = vmul.f32 0.5, %v3174_v22  ;;  %v3238_v23 = vmul.f32 0.70710677, %v3174_v22  ;;  %v1501_v44 = vadd.f32 %v1423_v12, %v1183_v59  ;;  %v3369_v45 = vpack.c.bf16 %v3347_v1, %v3345_v42 }
 0x379   : > { %v5102_v57 = vmul.f32 0.5, %v3176_v50  ;;  %v3240_v56 = vmul.f32 0.70710677, %v3176_v50  ;;  %v1503_v31 = vadd.f32 %v1427_v53, %v1185_v34  ;;  %v1708_v6 = vrot.slane %v1590_v54, 2 }
 0x37a   : > { %4081 = verf.f32 %v3238_v23  ;;  %3577 = vmatmul.mubr.bf16.vlgmr.msra.gmra.mxu1 %v3369_v45  ;;  %v1864_v14 = vmul.f32 %v4876_v32, %v4738_v36  ;;  %v1866_v59 = vmul.f32 %v4880_v9, %v4738_v36  ;;  %v1983_v29 = vmul.f32 %v4744_v41, %v1930_v62  ;;  %v2610_v62 = vld [vmem:[#allocation2 + $0x20] sm:$0xfe]  ;;  %v2612_v45 = vld [vmem:[#allocation2 + $0xd0] sm:$0x1] }
 0x37b   : > { %4083 = verf.f32 %v3240_v56  ;;  %v1709_v34 = vsel %vm1653_vm2, %v1707_v49, %v1708_v6  ;;  %v1712_v28 = vrot.slane %v1592_v46, 2  ;;  %v1985_v38 = vmul.f32 %v4880_v9, %v4744_v41  ;;  %v2895_v49 = vld [vmem:[#allocation2 + $0x20] sm:$0xfc] }
 0x37c   : > { %v1987_v0 = vmul.f32 %v4744_v41, %v1932_v17  ;;  %v1787_v40 = vadd.f32 %v1709_v34, %v1501_v44  ;;  %v2101_v42 = vrot.slane %v1983_v29, 1  ;;  %v2268_v22 = vmul.f32 %v4785_v63, %v2215_v58 }
 0x37d   : > { %v2270_v32 = vmul.f32 %v4880_v9, %v4785_v63  ;;  %v1713_v39 = vsel %vm1653_vm2, %v1708_v6, %v1712_v28  ;;  %v2102_v1 = vrot.slane %v1985_v38, 1  ;;  %v2272_v12 = vmul.f32 %v4785_v63, %v2217_v26 }
 0x37e   : > { %v2106_v50 = vrot.slane %v1987_v0, 1  ;;  %v1789_v54 = vadd.f32 %v1713_v39, %v1503_v31  ;;  %v1896_v23 = vadd.f32 %v1864_v14, %v1787_v40  ;;  %v2386_v53 = vrot.slane %v2268_v22, 2  ;;  %v2897_v14 = vld [vmem:[#allocation2 + $0xd0] sm:$0x3] }
 0x37f   : > { %v2387_v44 = vrot.slane %v2270_v32, 2  ;;  %v2103_v56 = vsel %vm1367_vm1, %v2101_v42, %v2102_v1  ;;  %v2391_v17 = vrot.slane %v2272_v12, 2  ;;  %v2544_v46 = vmul.f32 %v4796_v24, %v5117_v60 }
 0x380   : > { %v2107_v9 = vsel %vm1367_vm1, %v2102_v1, %v2106_v50  ;;  %v1898_v6 = vadd.f32 %v1866_v59, %v1789_v54  ;;  %v2181_v58 = vadd.f32 %v2103_v56, %v1896_v23  ;;  %v2546_v31 = vmul.f32 %v4796_v24, %v5121_v43 }
 0x381   : > { %v2388_v29 = vsel %vm1653_vm2, %v2386_v53, %v2387_v44  ;;  %v2392_v26 = vsel %vm1653_vm2, %v2387_v44, %v2391_v17  ;;  %v2663_v34 = vmul.f32 %v4817_v5, %v2610_v62  ;;  %v2665_v28 = vmul.f32 %v4817_v5, %v5121_v43  ;;  %v1232_v53 = vld [vmem:[#allocation2 + $0x130] sm:$0xfe] }
 0x382   : > { %v2667_v38 = vmul.f32 %v4817_v5, %v2612_v45  ;;  %v2183_v0 = vadd.f32 %v2107_v9, %v1898_v6  ;;  %v2466_v40 = vadd.f32 %v2388_v29, %v2181_v58  ;;  %v2948_v59 = vmul.f32 %v4823_v11, %v2895_v49  ;;  %v1234_v9 = vld [vmem:[#allocation2 + $0x118] sm:$0x1]  ;;  %v1518_v29 = vld [vmem:[#allocation2 + $0x130] sm:$0xfc] }
 0x383   : > { %v2950_v42 = vmul.f32 %v4823_v11, %v5121_v43  ;;  %v2781_v22 = vrot.slane %v2663_v34, 1  ;;  %v2782_v32 = vrot.slane %v2665_v28, 1  ;;  %v2952_v1 = vmul.f32 %v4823_v11, %v2897_v14 }
 0x384   : > { %v2786_v39 = vrot.slane %v2667_v38, 1  ;;  %v2468_v50 = vadd.f32 %v2392_v26, %v2183_v0  ;;  %v2576_v12 = vadd.f32 %v2544_v46, %v2466_v40  ;;  %v3066_v54 = vrot.slane %v2948_v59, 2  ;;  %v1520_v59 = vld [vmem:[#allocation2 + $0x118] sm:$0x3] }
 0x385   : > { %v3067_v23 = vrot.slane %v2950_v42, 2  ;;  %v2783_v44 = vsel %vm1367_vm1, %v2781_v22, %v2782_v32  ;;  %v3071_v45 = vrot.slane %v2952_v1, 2  ;;  %v1166_v56 = vmul.f32 %v4915_v13, %v4701_v8 }
 0x386   : > { %v2787_v62 = vsel %vm1367_vm1, %v2782_v32, %v2786_v39  ;;  %v2578_v49 = vadd.f32 %v2546_v31, %v2468_v50  ;;  %v2861_v6 = vadd.f32 %v2783_v44, %v2576_v12  ;;  %v1168_v46 = vmul.f32 %v4921_v47, %v4701_v8 }
 0x387   : > { %v4082_v17 = vpop.eup %4081  ;;  %v3068_v58 = vsel %vm1653_vm2, %v3066_v54, %v3067_v23  ;;  %v3072_v34 = vsel %vm1653_vm2, %v3067_v23, %v3071_v45  ;;  %v1277_v28 = vmul.f32 %v4704_v19, %v1232_v53  ;;  %v1279_v38 = vmul.f32 %v4921_v47, %v4704_v19 }
 0x388   : > { %v4084_v14 = vpop.eup %4083  ;;  %v3302_v26 = vadd.f32 1.0, %v4082_v17  ;;  %v2863_v0 = vadd.f32 %v2787_v62, %v2578_v49  ;;  %v3146_v40 = vadd.f32 %v3068_v58, %v2861_v6  ;;  %v1281_v31 = vmul.f32 %v4704_v19, %v1234_v9 }
 0x389   : > { %v3304_v13 = vadd.f32 1.0, %v4084_v14  ;;  %v1378_v22 = vrot.slane %v1277_v28, 1  ;;  %v1379_v32 = vrot.slane %v1279_v38, 1  ;;  %v1563_v39 = vmul.f32 %v4718_v27, %v1518_v29  ;;  %v1913_v29 = vld [vmem:[#allocation2 + $0x120] sm:$0xfe] }
 0x38a   : > { %v3334_v42 = vmul.f32 %v3302_v26, %v5099_v3  ;;  %v3148_v50 = vadd.f32 %v3072_v34, %v2863_v0  ;;  %v3190_v12 = vadd.f32 %v4840_v21, %v3146_v40  ;;  %v1384_v54 = vrot.slane %v1281_v31, 1  ;;  %v1915_v14 = vld [vmem:[#allocation2 + $0xe0] sm:$0x1]  ;;  %v2198_v28 = vld [vmem:[#allocation2 + $0x120] sm:$0xfc] }
 0x38b   : > { %v3336_v1 = vmul.f32 %v3304_v13, %v5102_v57  ;;  %v1380_v23 = vsel %vm1367_vm1, %v1378_v22, %v1379_v32  ;;  %v1565_v53 = vmul.f32 %v4921_v47, %v4718_v27  ;;  %v1567_v44 = vmul.f32 %v4718_v27, %v1520_v59  ;;  %v2200_v40 = vld [vmem:[#allocation2 + $0xe0] sm:$0x3] }
 0x38c   : > { %v1664_v62 = vrot.slane %v1563_v39, 2  ;;  %v3192_v3 = vadd.f32 %v4840_v21, %v3148_v50  ;;  %v5160_v9 = vmul.f32 0.5, %v3190_v12  ;;  %v3254_v17 = vmul.f32 0.70710677, %v3190_v12  ;;  %v2593_v50 = vld [vmem:[#allocation2 + $0x138] sm:$0xfe] }
 0x38d   : > { %v3364_v45 = vpack.c.bf16 %v3336_v1, %v3334_v42  ;;  %v1385_v57 = vsel %vm1367_vm1, %v1379_v32, %v1384_v54  ;;  %v1484_v49 = vadd.f32 %v1380_v23, %v1166_v56  ;;  %v1665_v6 = vrot.slane %v1565_v53, 2  ;;  %v5180_v1 = vld [vmem:[#allocation2 + $0x80] sm:$0xff] }
 0x38e   : > { %v1670_v58 = vrot.slane %v1567_v44, 2  ;;  %v5163_v26 = vmul.f32 0.5, %v3192_v3  ;;  %v3256_v47 = vmul.f32 0.70710677, %v3192_v3  ;;  %4085 = verf.f32 %v3254_v17  ;;  %v2595_v17 = vld [vmem:[#allocation2 + $0x1b8] sm:$0x1] }
 0x38f   : > { %3552 = vmatprep.mubr.bf16.mxu0 %v3364_v45  ;;  %v1486_v34 = vadd.f32 %v1385_v57, %v1168_v46  ;;  %v1666_v38 = vsel %vm1653_vm2, %v1664_v62, %v1665_v6  ;;  %v1847_v0 = vmul.f32 %v4935_v30, %v4735_v35  ;;  %v1849_v56 = vmul.f32 %v4941_v4, %v4735_v35  ;;  %v5178_v30 = vld [vmem:[#allocation2 + $0x138] sm:$0xff] }
 0x390   : > { %v1671_v13 = vsel %vm1653_vm2, %v1665_v6, %v1670_v58  ;;  %4087 = verf.f32 %v3256_v47  ;;  %v1770_v31 = vadd.f32 %v1666_v38, %v1484_v49  ;;  %v1958_v42 = vmul.f32 %v4741_v37, %v1913_v29  ;;  %v2878_v58 = vld [vmem:[#allocation2 + $0x138] sm:$0xfc] }
 0x391   : > { %v1772_v59 = vadd.f32 %v1671_v13, %v1486_v34  ;;  %v1960_v46 = vmul.f32 %v4941_v4, %v4741_v37  ;;  %v1962_v22 = vmul.f32 %v4741_v37, %v1915_v14  ;;  %v2243_v32 = vmul.f32 %v4778_v52, %v2198_v28  ;;  %v2880_v28 = vld [vmem:[#allocation2 + $0x1b8] sm:$0x3] }
 0x392   : > { %v2245_v39 = vmul.f32 %v4941_v4, %v4778_v52  ;;  %v1879_v12 = vadd.f32 %v1847_v0, %v1770_v31  ;;  %v2058_v23 = vrot.slane %v1958_v42, 1  ;;  %v2247_v53 = vmul.f32 %v4778_v52, %v2200_v40 }
 0x393   : > { %v1881_v54 = vadd.f32 %v1849_v56, %v1772_v59  ;;  %v2059_v44 = vrot.slane %v1960_v46, 1  ;;  %v2064_v62 = vrot.slane %v1962_v22, 1  ;;  %v2343_v45 = vrot.slane %v2243_v32, 2 }
 0x394   : > { %v2344_v3 = vrot.slane %v2245_v39, 2  ;;  %v2349_v57 = vrot.slane %v2247_v53, 2  ;;  %v2527_v49 = vmul.f32 %v4790_v18, %v5178_v30  ;;  %v2529_v4 = vmul.f32 %v4790_v18, %v5180_v1 }
 0x395   : > { %v2638_v6 = vmul.f32 %v4799_v25, %v2593_v50  ;;  %v2060_v29 = vsel %vm1367_vm1, %v2058_v23, %v2059_v44  ;;  %v2065_v14 = vsel %vm1367_vm1, %v2059_v44, %v2064_v62  ;;  %v2640_v34 = vmul.f32 %v4799_v25, %v5180_v1  ;;  %v1248_v50 = vld [vmem:[#allocation2 + $0xc0] sm:$0xfe] }
 0x396   : > { %v2345_v47 = vsel %vm1653_vm2, %v2343_v45, %v2344_v3  ;;  %v2164_v38 = vadd.f32 %v2060_v29, %v1879_v12  ;;  %v2166_v13 = vadd.f32 %v2065_v14, %v1881_v54  ;;  %v2350_v0 = vsel %vm1653_vm2, %v2344_v3, %v2349_v57  ;;  %v1534_v57 = vld [vmem:[#allocation2 + $0xc0] sm:$0xfc] }
 0x397   : > { %v2642_v56 = vmul.f32 %v4799_v25, %v2595_v17  ;;  %v2738_v40 = vrot.slane %v2638_v6, 1  ;;  %v2739_v31 = vrot.slane %v2640_v34, 1  ;;  %v2923_v59 = vmul.f32 %v4820_v10, %v2878_v58  ;;  %v1250_v17 = vld [vmem:[#allocation2 + $0x100] sm:$0x1] }
 0x398   : > { %v2925_v42 = vmul.f32 %v4820_v10, %v5180_v1  ;;  %v2449_v46 = vadd.f32 %v2345_v47, %v2164_v38  ;;  %v2451_v22 = vadd.f32 %v2350_v0, %v2166_v13  ;;  %v2927_v39 = vmul.f32 %v4820_v10, %v2880_v28  ;;  %v1536_v28 = vld [vmem:[#allocation2 + $0x100] sm:$0x3] }
 0x399   : > { %v2744_v32 = vrot.slane %v2642_v56, 1  ;;  %v2740_v12 = vsel %vm1367_vm1, %v2738_v40, %v2739_v31  ;;  %v3023_v54 = vrot.slane %v2923_v59, 2  ;;  %v1182_v53 = vmul.f32 %v4976_v51, %v4701_v8 }
 0x39a   : > { %v3024_v23 = vrot.slane %v2925_v42, 2  ;;  %v2559_v44 = vadd.f32 %v2527_v49, %v2449_v46  ;;  %v2561_v62 = vadd.f32 %v2529_v4, %v2451_v22  ;;  %v3029_v3 = vrot.slane %v2927_v39, 2 }
 0x39b   : > { %v2745_v45 = vsel %vm1367_vm1, %v2739_v31, %v2744_v32  ;;  %v4086_v6 = vpop.eup %4085  ;;  %v1184_v29 = vmul.f32 %v4978_v15, %v4701_v8  ;;  %v1301_v14 = vmul.f32 %v4704_v19, %v1248_v50  ;;  %v1303_v47 = vmul.f32 %v4978_v15, %v4704_v19 }
 0x39c   : > { %v3025_v58 = vsel %vm1653_vm2, %v3023_v54, %v3024_v23  ;;  %v3318_v34 = vadd.f32 1.0, %v4086_v6  ;;  %v2844_v51 = vadd.f32 %v2740_v12, %v2559_v44  ;;  %v2846_v49 = vadd.f32 %v2745_v45, %v2561_v62 }
 0x39d   : > { %v3030_v4 = vsel %vm1653_vm2, %v3024_v23, %v3029_v3  ;;  %v4088_v38 = vpop.eup %4087  ;;  %v1305_v13 = vmul.f32 %v4704_v19, %v1250_v17  ;;  %v1418_v0 = vrot.slane %v1301_v14, 1  ;;  %v1419_v56 = vrot.slane %v1303_v47, 1 }
 0x39e   : > { %v1587_v40 = vmul.f32 %v4718_v27, %v1534_v57  ;;  %v3320_v31 = vadd.f32 1.0, %v4088_v38  ;;  %v3350_v59 = vmul.f32 %v3318_v34, %v5160_v9  ;;  %v3129_v42 = vadd.f32 %v3025_v58, %v2844_v51  ;;  %v1929_v58 = vld [vmem:[#allocation2 + $0x40] sm:$0xfe]  ;;  %v1931_v51 = vld [vmem:[#allocation2 + $0xb8] sm:$0x1] }
 0x39f   : > { %v3131_v46 = vadd.f32 %v3030_v4, %v2846_v49  ;;  %v1420_v22 = vsel %vm1367_vm1, %v1418_v0, %v1419_v56  ;;  %v1424_v32 = vrot.slane %v1305_v13, 1  ;;  %v1589_v39 = vmul.f32 %v4978_v15, %v4718_v27  ;;  %v2216_v38 = vld [vmem:[#allocation2 + $0xb8] sm:$0x3] }
 0x3a0   : > { %v1591_v50 = vmul.f32 %v4718_v27, %v1536_v28  ;;  %v3352_v12 = vmul.f32 %v3320_v31, %v5163_v26  ;;  %v3173_v54 = vadd.f32 %v4830_v16, %v3129_v42  ;;  %v1500_v44 = vadd.f32 %v1420_v22, %v1182_v53  ;;  %v2214_v53 = vld [vmem:[#allocation2 + $0x40] sm:$0xfc]  ;;  %v5240_v42 = vld [vmem:[#allocation2 + $0x10] sm:$0xff] }
 0x3a1   : > { %v3175_v23 = vadd.f32 %v4830_v16, %v3131_v46  ;;  %v1425_v62 = vsel %vm1367_vm1, %v1419_v56, %v1424_v32  ;;  %v1704_v9 = vrot.slane %v1587_v40, 2  ;;  %v1705_v45 = vrot.slane %v1589_v39, 2  ;;  %v5234_v56 = vld [vmem:[#allocation2 + $0x38] sm:$0xff] }
 0x3a2   : > { %v1710_v3 = vrot.slane %v1591_v50, 2  ;;  %v3372_v17 = vpack.c.bf16 %v3352_v12, %v3350_v59  ;;  %v5221_v57 = vmul.f32 0.5, %v3173_v54  ;;  %v3237_v15 = vmul.f32 0.70710677, %v3173_v54  ;;  %v2609_v46 = vld [vmem:[#allocation2 + $0x38] sm:$0xfe] }
 0x3a3   : > { %v5223_v6 = vmul.f32 0.5, %v3175_v23  ;;  %v3239_v14 = vmul.f32 0.70710677, %v3175_v23  ;;  %v1502_v47 = vadd.f32 %v1425_v62, %v1184_v29  ;;  %v1706_v26 = vsel %vm1653_vm2, %v1704_v9, %v1705_v45  ;;  %v2611_v62 = vld [vmem:[#allocation2 + $0x88] sm:$0x1] }
 0x3a4   : > { %v1711_v34 = vsel %vm1653_vm2, %v1705_v45, %v1710_v3  ;;  %3584 = vmatprep.mubr.bf16.mxu1 %v3372_v17  ;;  %4089 = verf.f32 %v3237_v15  ;;  %v1786_v49 = vadd.f32 %v1706_v26, %v1500_v44  ;;  %v1863_v4 = vmul.f32 %v4995_v7, %v4735_v35  ;;  %v2894_v17 = vld [vmem:[#allocation2 + $0x38] sm:$0xfc]  ;;  %v2896_v26 = vld [vmem:[#allocation2 + $0x88] sm:$0x3] }
 0x3a5   : > { %v1865_v28 = vmul.f32 %v5000_v55, %v4735_v35  ;;  %4091 = verf.f32 %v3239_v14  ;;  %v1788_v13 = vadd.f32 %v1711_v34, %v1502_v47  ;;  %v1982_v29 = vmul.f32 %v4741_v37, %v1929_v58  ;;  %v1128_v34 = vld [vmem:[#allocation2 + $0x150] sm:$0xff] }
 0x3a6   : > { %v1984_v0 = vmul.f32 %v5000_v55, %v4741_v37  ;;  %v1895_v40 = vadd.f32 %v1863_v4, %v1786_v49  ;;  %v1986_v31 = vmul.f32 %v4741_v37, %v1931_v51  ;;  %v2267_v59 = vmul.f32 %v4778_v52, %v2214_v53 }
 0x3a7   : > { %v2269_v7 = vmul.f32 %v5000_v55, %v4778_v52  ;;  %v1897_v22 = vadd.f32 %v1865_v28, %v1788_v13  ;;  %v2098_v32 = vrot.slane %v1982_v29, 1  ;;  %v2271_v50 = vmul.f32 %v4778_v52, %v2216_v38 }
 0x3a8   : > { %v2099_v39 = vrot.slane %v1984_v0, 1  ;;  %v2104_v12 = vrot.slane %v1986_v31, 1  ;;  %v2383_v54 = vrot.slane %v2267_v59, 2  ;;  %v2543_v44 = vmul.f32 %v4790_v18, %v5234_v56  ;;  %v1130_v59 = vld [vmem:[#allocation2 + $0x60] sm:$0xff] }
 0x3a9   : > { %v2384_v23 = vrot.slane %v2269_v7, 2  ;;  %v2389_v45 = vrot.slane %v2271_v50, 2  ;;  %v2545_v55 = vmul.f32 %v4790_v18, %v5240_v42  ;;  %v2662_v3 = vmul.f32 %v4799_v25, %v2609_v46  ;;  %v1237_v46 = vld [vmem:[#allocation2 + $0x150] sm:$0xfe] }
 0x3aa   : > { %v2100_v9 = vsel %vm1367_vm1, %v2098_v32, %v2099_v39  ;;  %v2105_v15 = vsel %vm1367_vm1, %v2099_v39, %v2104_v12  ;;  %v2664_v47 = vmul.f32 %v4799_v25, %v5240_v42  ;;  %v2666_v49 = vmul.f32 %v4799_v25, %v2611_v62  ;;  %v1239_v12 = vld [vmem:[#allocation2 + $0x188] sm:$0x1] }
 0x3ab   : > { %v2180_v58 = vadd.f32 %v2100_v9, %v1895_v40  ;;  %v2385_v14 = vsel %vm1653_vm2, %v2383_v54, %v2384_v23  ;;  %v2182_v51 = vadd.f32 %v2105_v15, %v1897_v22  ;;  %v2390_v53 = vsel %vm1653_vm2, %v2384_v23, %v2389_v45  ;;  %v1523_v54 = vld [vmem:[#allocation2 + $0x150] sm:$0xfc] }
 0x3ac   : > { %v2778_v4 = vrot.slane %v2662_v3, 1  ;;  %v2779_v38 = vrot.slane %v2664_v47, 1  ;;  %v2947_v13 = vmul.f32 %v4820_v10, %v2894_v17  ;;  %v2949_v29 = vmul.f32 %v4820_v10, %v5240_v42 }
 0x3ad   : > { %v2465_v28 = vadd.f32 %v2385_v14, %v2180_v58  ;;  %v2467_v0 = vadd.f32 %v2390_v53, %v2182_v51  ;;  %v2784_v40 = vrot.slane %v2666_v49, 1  ;;  %v2951_v31 = vmul.f32 %v4820_v10, %v2896_v26 }
 0x3ae   : > { %v1171_v7 = vmul.f32 %v4692_v61, %v1128_v34  ;;  %v2780_v32 = vsel %vm1367_vm1, %v2778_v4, %v2779_v38  ;;  %v3063_v39 = vrot.slane %v2947_v13, 2  ;;  %v3064_v50 = vrot.slane %v2949_v29, 2  ;;  %v1525_v34 = vld [vmem:[#allocation2 + $0x188] sm:$0x3] }
 0x3af   : > { %v2575_v22 = vadd.f32 %v2543_v44, %v2465_v28  ;;  %v2577_v23 = vadd.f32 %v2545_v55, %v2467_v0  ;;  %v2785_v62 = vsel %vm1367_vm1, %v2779_v38, %v2784_v40  ;;  %v3069_v9 = vrot.slane %v2951_v31, 2 }
 0x3b0   : > { %v1173_v45 = vmul.f32 %v4692_v61, %v1130_v59  ;;  %v3065_v17 = vsel %vm1653_vm2, %v3063_v39, %v3064_v50  ;;  %v1284_v15 = vmul.f32 %v4707_v20, %v1237_v46  ;;  %v1286_v58 = vmul.f32 %v4707_v20, %v1130_v59 }
 0x3b1   : > { %v2860_v3 = vadd.f32 %v2780_v32, %v2575_v22  ;;  %v4090_v44 = vpop.eup %4089  ;;  %v2862_v14 = vadd.f32 %v2785_v62, %v2577_v23  ;;  %v3070_v47 = vsel %vm1653_vm2, %v3064_v50, %v3069_v9  ;;  %v1288_v26 = vmul.f32 %v4707_v20, %v1239_v12 }
 0x3b2   : > { %v1570_v55 = vmul.f32 %v4730_v33, %v1523_v54  ;;  %v4092_v51 = vpop.eup %4091  ;;  %v3301_v53 = vadd.f32 1.0, %v4090_v44  ;;  %v1391_v4 = vrot.slane %v1284_v15, 1  ;;  %v1392_v28 = vrot.slane %v1286_v58, 1  ;;  %v1918_v54 = vld [vmem:[#allocation2 + $0x140] sm:$0xfe] }
 0x3b3   : > { %v3145_v49 = vadd.f32 %v3065_v17, %v2860_v3  ;;  %v3303_v38 = vadd.f32 1.0, %v4092_v51  ;;  %v3147_v13 = vadd.f32 %v3070_v47, %v2862_v14  ;;  %v1396_v29 = vrot.slane %v1288_v26, 1  ;;  %v2203_v44 = vld [vmem:[#allocation2 + $0x140] sm:$0xfc] }
 0x3b4   : > { %v1572_v0 = vmul.f32 %v4730_v33, %v1130_v59  ;;  %v3333_v40 = vmul.f32 %v3301_v53, %v5221_v57  ;;  %v1393_v46 = vsel %vm1367_vm1, %v1391_v4, %v1392_v28  ;;  %v1574_v22 = vmul.f32 %v4730_v33, %v1525_v34  ;;  %v1920_v57 = vld [vmem:[#allocation2 + $0x28] sm:$0x1] }
 0x3b5   : > { %v3189_v31 = vadd.f32 %v4830_v16, %v3145_v49  ;;  %v3335_v32 = vmul.f32 %v3303_v38, %v5223_v6  ;;  %v3191_v39 = vadd.f32 %v4830_v16, %v3147_v13  ;;  %v1397_v50 = vsel %vm1367_vm1, %v1392_v28, %v1396_v29  ;;  %v2205_v34 = vld [vmem:[#allocation2 + $0x28] sm:$0x3]  ;;  %v5292_v49 = vld [vmem:[#allocation2 + $0x158] sm:$0xff] }
 0x3b6   : > { %v1489_v12 = vadd.f32 %v1393_v46, %v1171_v7  ;;  %v1491_v59 = vadd.f32 %v1397_v50, %v1173_v45  ;;  %v1677_v9 = vrot.slane %v1570_v55, 2  ;;  %v1678_v58 = vrot.slane %v1572_v0, 2  ;;  %v5296_v29 = vld [vmem:[#allocation2 + $0x1d8] sm:$0xff] }
 0x3b7   : > { %v5277_v23 = vmul.f32 0.5, %v3189_v31  ;;  %v3253_v62 = vmul.f32 0.70710677, %v3189_v31  ;;  %v3363_v3 = vpack.c.bf16 %v3335_v32, %v3333_v40  ;;  %v5279_v17 = vmul.f32 0.5, %v3191_v39 }
 0x3b8   : > { %v3255_v15 = vmul.f32 0.70710677, %v3191_v39  ;;  %v1682_v6 = vrot.slane %v1574_v22, 2  ;;  %v1852_v14 = vmul.f32 %v5056_v2, %v4738_v36  ;;  %v1854_v7 = vmul.f32 %v5060_v48, %v4738_v36  ;;  %v2598_v22 = vld [vmem:[#allocation2 + $0x158] sm:$0xfe] }
 0x3b9   : > { %4093 = verf.f32 %v3253_v62  ;;  %3553 = vmatmul.mubr.bf16.gmra.mxu0 %v3363_v3  ;;  %v1679_v45 = vsel %vm1653_vm2, %v1677_v9, %v1678_v58  ;;  %v1965_v47 = vmul.f32 %v4744_v41, %v1918_v54  ;;  %v1967_v26 = vmul.f32 %v5060_v48, %v4744_v41  ;;  %v2600_v54 = vld [vmem:[#allocation2 + $0x170] sm:$0x1]  ;;  %v2883_v62 = vld [vmem:[#allocation2 + $0x158] sm:$0xfc] }
 0x3ba   : > { %4095 = verf.f32 %v3255_v15  ;;  %v1683_v55 = vsel %vm1653_vm2, %v1678_v58, %v1682_v6  ;;  %v1775_v51 = vadd.f32 %v1679_v45, %v1489_v12  ;;  %v1969_v53 = vmul.f32 %v4744_v41, %v1920_v57  ;;  %v2885_v6 = vld [vmem:[#allocation2 + $0x170] sm:$0x3] }
 0x3bb   : > { %v2250_v2 = vmul.f32 %v4785_v63, %v2203_v44  ;;  %v1777_v4 = vadd.f32 %v1683_v55, %v1491_v59  ;;  %v2071_v28 = vrot.slane %v1965_v47, 1  ;;  %v2072_v38 = vrot.slane %v1967_v26, 1  ;;  %v1144_v26 = vld [vmem:[#allocation2 + $0xa8] sm:$0xff] }
 0x3bc   : > { %v2252_v13 = vmul.f32 %v5060_v48, %v4785_v63  ;;  %v1884_v0 = vadd.f32 %v1852_v14, %v1775_v51  ;;  %v2076_v40 = vrot.slane %v1969_v53, 1  ;;  %v2254_v31 = vmul.f32 %v4785_v63, %v2205_v34 }
 0x3bd   : > { %v2356_v46 = vrot.slane %v2250_v2, 2  ;;  %v1886_v32 = vadd.f32 %v1854_v7, %v1777_v4  ;;  %v2073_v39 = vsel %vm1367_vm1, %v2071_v28, %v2072_v38  ;;  %v2532_v12 = vmul.f32 %v4796_v24, %v5292_v49 }
 0x3be   : > { %v2357_v50 = vrot.slane %v2252_v13, 2  ;;  %v2077_v59 = vsel %vm1367_vm1, %v2072_v38, %v2076_v40  ;;  %v2169_v48 = vadd.f32 %v2073_v39, %v1884_v0  ;;  %v2361_v9 = vrot.slane %v2254_v31, 2  ;;  %v1146_v13 = vld [vmem:[#allocation2 + $0x1a0] sm:$0xff]  ;;  %v1253_v0 = vld [vmem:[#allocation2 + $0xa8] sm:$0xfe] }
 0x3bf   : > { %v2534_v57 = vmul.f32 %v4796_v24, %v5296_v29  ;;  %v2171_v3 = vadd.f32 %v2077_v59, %v1886_v32  ;;  %v2645_v58 = vmul.f32 %v4817_v5, %v2598_v22  ;;  %v2647_v44 = vmul.f32 %v4817_v5, %v5296_v29  ;;  %v1255_v32 = vld [vmem:[#allocation2] sm:$0x1] }
 0x3c0   : > { %v2358_v15 = vsel %vm1653_vm2, %v2356_v46, %v2357_v50  ;;  %v2362_v14 = vsel %vm1653_vm2, %v2357_v50, %v2361_v9  ;;  %v2649_v45 = vmul.f32 %v4817_v5, %v2600_v54  ;;  %v2930_v47 = vmul.f32 %v4823_v11, %v2883_v62 }
 0x3c1   : > { %v2454_v7 = vadd.f32 %v2358_v15, %v2169_v48  ;;  %v2456_v34 = vadd.f32 %v2362_v14, %v2171_v3  ;;  %v2751_v55 = vrot.slane %v2645_v58, 1  ;;  %v2752_v51 = vrot.slane %v2647_v44, 1  ;;  %v1539_v3 = vld [vmem:[#allocation2 + $0xa8] sm:$0xfc] }
 0x3c2   : > { %v2932_v53 = vmul.f32 %v4823_v11, %v5296_v29  ;;  %v2756_v4 = vrot.slane %v2649_v45, 1  ;;  %v2934_v28 = vmul.f32 %v4823_v11, %v2885_v6  ;;  %v3036_v38 = vrot.slane %v2930_v47, 2 }
 0x3c3   : > { %v2564_v2 = vadd.f32 %v2532_v12, %v2454_v7  ;;  %v2566_v40 = vadd.f32 %v2534_v57, %v2456_v34  ;;  %v2753_v31 = vsel %vm1367_vm1, %v2751_v55, %v2752_v51  ;;  %v1187_v22 = vmul.f32 %v4692_v61, %v1144_v26 }
 0x3c4   : > { %v3037_v46 = vrot.slane %v2932_v53, 2  ;;  %v2757_v39 = vsel %vm1367_vm1, %v2752_v51, %v2756_v4  ;;  %v3041_v54 = vrot.slane %v2934_v28, 2  ;;  %v1189_v62 = vmul.f32 %v4692_v61, %v1146_v13 }
 0x3c5   : > { %v2849_v50 = vadd.f32 %v2753_v31, %v2564_v2  ;;  %v2851_v59 = vadd.f32 %v2757_v39, %v2566_v40  ;;  %v1308_v9 = vmul.f32 %v4707_v20, %v1253_v0  ;;  %v1310_v57 = vmul.f32 %v4707_v20, %v1146_v13 }
 0x3c6   : > { %v4094_v12 = vpop.eup %4093  ;;  %v3038_v48 = vsel %vm1653_vm2, %v3036_v38, %v3037_v46  ;;  %v3042_v44 = vsel %vm1653_vm2, %v3037_v46, %v3041_v54  ;;  %v1312_v14 = vmul.f32 %v4707_v20, %v1255_v32  ;;  %v1594_v53 = vmul.f32 %v4730_v33, %v1539_v3  ;;  %v1541_v38 = vld [vmem:[#allocation2] sm:$0x3] }
 0x3c7   : > { %v4096_v15 = vpop.eup %4095  ;;  %v3317_v58 = vadd.f32 1.0, %v4094_v12  ;;  %v3134_v6 = vadd.f32 %v3038_v48, %v2849_v50  ;;  %v3136_v45 = vadd.f32 %v3042_v44, %v2851_v59  ;;  %v1431_v47 = vrot.slane %v1308_v9, 1  ;;  %v1934_v32 = vld [vmem:[#allocation2 + $0x20] sm:$0xfe] }
 0x3c8   : > { %v3319_v7 = vadd.f32 1.0, %v4096_v15  ;;  %v1432_v26 = vrot.slane %v1310_v57, 1  ;;  %v1436_v51 = vrot.slane %v1312_v14, 1  ;;  %v1596_v0 = vmul.f32 %v4730_v33, %v1146_v13  ;;  %v2219_v57 = vld [vmem:[#allocation2 + $0x20] sm:$0xfc] }
 0x3c9   : > { %v3349_v34 = vmul.f32 %v3317_v58, %v5277_v23  ;;  %v3178_v55 = vadd.f32 %v4840_v21, %v3134_v6  ;;  %v3180_v4 = vadd.f32 %v4840_v21, %v3136_v45  ;;  %v1598_v59 = vmul.f32 %v4730_v33, %v1541_v38  ;;  %v2221_v15 = vld [vmem:[#allocation2 + $0xd0] sm:$0x3] }
 0x3ca   : > { %v3351_v2 = vmul.f32 %v3319_v7, %v5279_v17  ;;  %v1433_v28 = vsel %vm1367_vm1, %v1431_v47, %v1432_v26  ;;  %v1437_v46 = vsel %vm1367_vm1, %v1432_v26, %v1436_v51  ;;  %v1936_v17 = vld [vmem:[#allocation2 + $0xd0] sm:$0x1]  ;;  %v1717_v48 = vrot.slane %v1594_v53, 2  ;;  %v5349_v47 = vld [vmem:[#allocation2 + $0xc8] sm:$0xff] }
 0x3cb   : > { %v5331_v40 = vmul.f32 0.5, %v3178_v55  ;;  %v3242_v31 = vmul.f32 0.70710677, %v3178_v55  ;;  %v1505_v23 = vadd.f32 %v1433_v28, %v1187_v22  ;;  %v5334_v50 = vmul.f32 0.5, %v3180_v4  ;;  %v5353_v53 = vld [vmem:[#allocation2 + $0xe8] sm:$0xff] }
 0x3cc   : > { %v3371_v39 = vpack.c.bf16 %v3351_v2, %v3349_v34  ;;  %v3244_v54 = vmul.f32 0.70710677, %v3180_v4  ;;  %v1507_v12 = vadd.f32 %v1437_v46, %v1189_v62  ;;  %v1718_v9 = vrot.slane %v1596_v0, 2  ;;  %v2614_v0 = vld [vmem:[#allocation2 + $0xc8] sm:$0xfe] }
 0x3cd   : > { %4097 = verf.f32 %v3242_v31  ;;  %v1868_v13 = vmul.f32 %v5117_v60, %v4738_v36  ;;  %v1870_v22 = vmul.f32 %v5121_v43, %v4738_v36  ;;  %v1989_v3 = vmul.f32 %v4744_v41, %v1934_v32  ;;  %v2616_v31 = vld [vmem:[#allocation2 + $0x70] sm:$0x1] }
 0x3ce   : > { %3585 = vmatmul.mubr.bf16.gmra.mxu1 %v3371_v39  ;;  %4099 = verf.f32 %v3244_v54  ;;  %v1719_v62 = vsel %vm1653_vm2, %v1717_v48, %v1718_v9  ;;  %v1722_v58 = vrot.slane %v1598_v59, 2  ;;  %v1991_v44 = vmul.f32 %v5121_v43, %v4744_v41  ;;  %v2899_v39 = vld [vmem:[#allocation2 + $0xc8] sm:$0xfc]  ;;  %v2901_v48 = vld [vmem:[#allocation2 + $0x70] sm:$0x3] }
 0x3cf   : > { %v1993_v6 = vmul.f32 %v4744_v41, %v1936_v17  ;;  %v1791_v14 = vadd.f32 %v1719_v62, %v1505_v23  ;;  %v2111_v7 = vrot.slane %v1989_v3, 1  ;;  %v2274_v45 = vmul.f32 %v4785_v63, %v2219_v57 }
 0x3d0   : > { %v2276_v60 = vmul.f32 %v5121_v43, %v4785_v63  ;;  %v1723_v26 = vsel %vm1653_vm2, %v1718_v9, %v1722_v58  ;;  %v2112_v34 = vrot.slane %v1991_v44, 1  ;;  %v2278_v51 = vmul.f32 %v4785_v63, %v2221_v15  ;;  %v1127_v44 = vld [vmem:[#allocation2 + $0x120] sm:$0xff] }
 0x3d1   : > { %v2116_v55 = vrot.slane %v1993_v6, 1  ;;  %v1793_v2 = vadd.f32 %v1723_v26, %v1507_v12  ;;  %v1900_v4 = vadd.f32 %v1868_v13, %v1791_v14  ;;  %v2396_v28 = vrot.slane %v2274_v45, 2 }
 0x3d2   : > { %v2397_v38 = vrot.slane %v2276_v60, 2  ;;  %v2113_v46 = vsel %vm1367_vm1, %v2111_v7, %v2112_v34  ;;  %v2401_v23 = vrot.slane %v2278_v51, 2  ;;  %v2548_v32 = vmul.f32 %v4796_v24, %v5349_v47  ;;  %v1129_v51 = vld [vmem:[#allocation2 + $0x108] sm:$0xff] }
 0x3d3   : > { %v2117_v43 = vsel %vm1367_vm1, %v2112_v34, %v2116_v55  ;;  %v1902_v54 = vadd.f32 %v1870_v22, %v1793_v2  ;;  %v2185_v17 = vadd.f32 %v2113_v46, %v1900_v4  ;;  %v2550_v12 = vmul.f32 %v4796_v24, %v5353_v53  ;;  %v1236_v2 = vld [vmem:[#allocation2 + $0x120] sm:$0xfe] }
 0x3d4   : > { %v2398_v59 = vsel %vm1653_vm2, %v2396_v28, %v2397_v38  ;;  %v2402_v9 = vsel %vm1653_vm2, %v2397_v38, %v2401_v23  ;;  %v2669_v57 = vmul.f32 %v4817_v5, %v2614_v0  ;;  %v2671_v13 = vmul.f32 %v4817_v5, %v5353_v53 }
 0x3d5   : > { %v2673_v3 = vmul.f32 %v4817_v5, %v2616_v31  ;;  %v2187_v15 = vadd.f32 %v2117_v43, %v1902_v54  ;;  %v2470_v62 = vadd.f32 %v2398_v59, %v2185_v17  ;;  %v2954_v22 = vmul.f32 %v4823_v11, %v2899_v39  ;;  %v1238_v31 = vld [vmem:[#allocation2 + $0xe0] sm:$0x1] }
 0x3d6   : > { %v2956_v58 = vmul.f32 %v4823_v11, %v5353_v53  ;;  %v2791_v6 = vrot.slane %v2669_v57, 1  ;;  %v2792_v14 = vrot.slane %v2671_v13, 1  ;;  %v2958_v45 = vmul.f32 %v4823_v11, %v2901_v48 }
 0x3d7   : > { %v2796_v7 = vrot.slane %v2673_v3, 1  ;;  %v2472_v60 = vadd.f32 %v2402_v9, %v2187_v15  ;;  %v2580_v26 = vadd.f32 %v2548_v32, %v2470_v62  ;;  %v3076_v34 = vrot.slane %v2954_v22, 2  ;;  %v1522_v32 = vld [vmem:[#allocation2 + $0x120] sm:$0xfc] }
 0x3d8   : > { %v3077_v55 = vrot.slane %v2956_v58, 2  ;;  %v2793_v4 = vsel %vm1367_vm1, %v2791_v6, %v2792_v14  ;;  %v3081_v38 = vrot.slane %v2958_v45, 2  ;;  %v1170_v0 = vmul.f32 %v4701_v8, %v1127_v44 }
 0x3d9   : > { %v2797_v28 = vsel %vm1367_vm1, %v2792_v14, %v2796_v7  ;;  %v2582_v43 = vadd.f32 %v2550_v12, %v2472_v60  ;;  %v2865_v23 = vadd.f32 %v2793_v4, %v2580_v26  ;;  %v1172_v54 = vmul.f32 %v4701_v8, %v1129_v51  ;;  %v1524_v12 = vld [vmem:[#allocation2 + $0xe0] sm:$0x3] }
 0x3da   : > { %v4098_v46 = vpop.eup %4097  ;;  %v3078_v39 = vsel %vm1653_vm2, %v3076_v34, %v3077_v55  ;;  %v3082_v48 = vsel %vm1653_vm2, %v3077_v55, %v3081_v38  ;;  %v1283_v9 = vmul.f32 %v4704_v19, %v1236_v2  ;;  %v1285_v57 = vmul.f32 %v4704_v19, %v1129_v51 }
 0x3db   : > { %v4100_v17 = vpop.eup %4099  ;;  %v3306_v59 = vadd.f32 1.0, %v4098_v46  ;;  %v2867_v3 = vadd.f32 %v2797_v28, %v2582_v43  ;;  %v3150_v15 = vadd.f32 %v3078_v39, %v2865_v23  ;;  %v1287_v62 = vmul.f32 %v4704_v19, %v1238_v31  ;;  %v1917_v23 = vld [vmem:[#allocation2 + $0x138] sm:$0xfe]  ;;  %v1919_v39 = vld [vmem:[#allocation2 + $0x1b8] sm:$0x1] }
 0x3dc   : > { %v3308_v13 = vadd.f32 1.0, %v4100_v17  ;;  %v1388_v58 = vrot.slane %v1283_v9, 1  ;;  %v1389_v44 = vrot.slane %v1285_v57, 1  ;;  %v1569_v6 = vmul.f32 %v4718_v27, %v1522_v32 }
 0x3dd   : > { %v3338_v22 = vmul.f32 %v3306_v59, %v5331_v40  ;;  %v3152_v7 = vadd.f32 %v3082_v48, %v2867_v3  ;;  %v3194_v45 = vadd.f32 %v4840_v21, %v3150_v15  ;;  %v1394_v60 = vrot.slane %v1287_v62, 1  ;;  %v2202_v59 = vld [vmem:[#allocation2 + $0x138] sm:$0xfc] }
 0x3de   : > { %v3340_v14 = vmul.f32 %v3308_v13, %v5334_v50  ;;  %v1390_v26 = vsel %vm1367_vm1, %v1388_v58, %v1389_v44  ;;  %v1571_v34 = vmul.f32 %v4718_v27, %v1129_v51  ;;  %v1573_v55 = vmul.f32 %v4718_v27, %v1524_v12  ;;  %v2204_v13 = vld [vmem:[#allocation2 + $0x1b8] sm:$0x3] }
 0x3df   : > { %v1674_v2 = vrot.slane %v1569_v6, 2  ;;  %v3196_v40 = vadd.f32 %v4840_v21, %v3152_v7  ;;  %v5388_v28 = vmul.f32 0.5, %v3194_v45  ;;  %v3258_v38 = vmul.f32 0.70710677, %v3194_v45  ;;  %v2597_v6 = vld [vmem:[#allocation2 + $0xf0] sm:$0xfe] }
 0x3e0   : > { %v3366_v4 = vpack.c.bf16 %v3340_v14, %v3338_v22  ;;  %v1395_v31 = vsel %vm1367_vm1, %v1389_v44, %v1394_v60  ;;  %v1488_v50 = vadd.f32 %v1390_v26, %v1170_v0  ;;  %v1675_v46 = vrot.slane %v1571_v34, 2  ;;  %v5408_v44 = vld [vmem:[#allocation2 + $0x128] sm:$0xff] }
 0x3e1   : > { %v1680_v43 = vrot.slane %v1573_v55, 2  ;;  %v5391_v32 = vmul.f32 0.5, %v3196_v40  ;;  %v3260_v51 = vmul.f32 0.70710677, %v3196_v40  ;;  %4101 = verf.f32 %v3258_v38 }
 0x3e2   : > { %3560 = vmatprep.mubr.bf16.mxu0 %v3366_v4  ;;  %v1490_v17 = vadd.f32 %v1395_v31, %v1172_v54  ;;  %v1676_v48 = vsel %vm1653_vm2, %v1674_v2, %v1675_v46  ;;  %v1851_v57 = vmul.f32 %v5178_v30, %v4735_v35  ;;  %v1853_v0 = vmul.f32 %v5180_v1, %v4735_v35  ;;  %v5406_v30 = vld [vmem:[#allocation2 + $0xf0] sm:$0xff]  ;;  %v2599_v4 = vld [vmem:[#allocation2 + $0x8] sm:$0x1] }
 0x3e3   : > { %v1681_v9 = vsel %vm1653_vm2, %v1675_v46, %v1680_v43  ;;  %4103 = verf.f32 %v3260_v51  ;;  %v1774_v3 = vadd.f32 %v1676_v48, %v1488_v50  ;;  %v1964_v62 = vmul.f32 %v4741_v37, %v1917_v23  ;;  %v2882_v50 = vld [vmem:[#allocation2 + $0xf0] sm:$0xfc]  ;;  %v2884_v51 = vld [vmem:[#allocation2 + $0x8] sm:$0x3] }
 0x3e4   : > { %v1776_v15 = vadd.f32 %v1681_v9, %v1490_v17  ;;  %v1966_v54 = vmul.f32 %v5180_v1, %v4741_v37  ;;  %v1968_v12 = vmul.f32 %v4741_v37, %v1919_v39  ;;  %v2249_v22 = vmul.f32 %v4778_v52, %v2202_v59 }
 0x3e5   : > { %v2251_v58 = vmul.f32 %v5180_v1, %v4778_v52  ;;  %v1883_v14 = vadd.f32 %v1851_v57, %v1774_v3  ;;  %v2068_v45 = vrot.slane %v1964_v62, 1  ;;  %v2253_v60 = vmul.f32 %v4778_v52, %v2204_v13  ;;  %v1143_v57 = vld [vmem:[#allocation2 + $0x40] sm:$0xff] }
 0x3e6   : > { %v1885_v7 = vadd.f32 %v1853_v0, %v1776_v15  ;;  %v2069_v26 = vrot.slane %v1966_v54, 1  ;;  %v2074_v34 = vrot.slane %v1968_v12, 1  ;;  %v2353_v55 = vrot.slane %v2249_v22, 2 }
 0x3e7   : > { %v2354_v2 = vrot.slane %v2251_v58, 2  ;;  %v2359_v40 = vrot.slane %v2253_v60, 2  ;;  %v2531_v38 = vmul.f32 %v4790_v18, %v5406_v30  ;;  %v2533_v1 = vmul.f32 %v4790_v18, %v5408_v44  ;;  %v1145_v58 = vld [vmem:[#allocation2 + $0x190] sm:$0xff] }
 0x3e8   : > { %v2644_v31 = vmul.f32 %v4799_v25, %v2597_v6  ;;  %v2070_v46 = vsel %vm1367_vm1, %v2068_v45, %v2069_v26  ;;  %v2075_v43 = vsel %vm1367_vm1, %v2069_v26, %v2074_v34  ;;  %v2646_v39 = vmul.f32 %v4799_v25, %v5408_v44  ;;  %v1252_v6 = vld [vmem:[#allocation2 + $0x40] sm:$0xfe] }
 0x3e9   : > { %v2355_v23 = vsel %vm1653_vm2, %v2353_v55, %v2354_v2  ;;  %v2168_v17 = vadd.f32 %v2070_v46, %v1883_v14  ;;  %v2170_v59 = vadd.f32 %v2075_v43, %v1885_v7  ;;  %v2360_v48 = vsel %vm1653_vm2, %v2354_v2, %v2359_v40  ;;  %v1538_v40 = vld [vmem:[#allocation2 + $0x40] sm:$0xfc] }
 0x3ea   : > { %v2648_v9 = vmul.f32 %v4799_v25, %v2599_v4  ;;  %v2748_v0 = vrot.slane %v2644_v31, 1  ;;  %v2749_v13 = vrot.slane %v2646_v39, 1  ;;  %v2929_v3 = vmul.f32 %v4820_v10, %v2882_v50  ;;  %v1254_v4 = vld [vmem:[#allocation2 + $0xb8] sm:$0x1] }
 0x3eb   : > { %v2931_v15 = vmul.f32 %v4820_v10, %v5408_v44  ;;  %v2453_v62 = vadd.f32 %v2355_v23, %v2168_v17  ;;  %v2455_v54 = vadd.f32 %v2360_v48, %v2170_v59  ;;  %v2933_v22 = vmul.f32 %v4820_v10, %v2884_v51 }
 0x3ec   : > { %v2754_v12 = vrot.slane %v2648_v9, 1  ;;  %v2750_v14 = vsel %vm1367_vm1, %v2748_v0, %v2749_v13  ;;  %v3033_v7 = vrot.slane %v2929_v3, 2  ;;  %v1186_v60 = vmul.f32 %v4701_v8, %v1143_v57 }
 0x3ed   : > { %v3034_v45 = vrot.slane %v2931_v15, 2  ;;  %v2563_v26 = vadd.f32 %v2531_v38, %v2453_v62  ;;  %v2565_v34 = vadd.f32 %v2533_v1, %v2455_v54  ;;  %v3039_v2 = vrot.slane %v2933_v22, 2  ;;  %v1540_v1 = vld [vmem:[#allocation2 + $0xb8] sm:$0x3] }
 0x3ee   : > { %v2755_v55 = vsel %vm1367_vm1, %v2749_v13, %v2754_v12  ;;  %v4102_v31 = vpop.eup %4101  ;;  %v1188_v46 = vmul.f32 %v4701_v8, %v1145_v58  ;;  %v1307_v43 = vmul.f32 %v4704_v19, %v1252_v6  ;;  %v1309_v23 = vmul.f32 %v4704_v19, %v1145_v58 }
 0x3ef   : > { %v3035_v50 = vsel %vm1653_vm2, %v3033_v7, %v3034_v45  ;;  %v3322_v39 = vadd.f32 1.0, %v4102_v31  ;;  %v2848_v51 = vadd.f32 %v2750_v14, %v2563_v26  ;;  %v2850_v17 = vadd.f32 %v2755_v55, %v2565_v34 }
 0x3f0   : > { %v3040_v38 = vsel %vm1653_vm2, %v3034_v45, %v3039_v2  ;;  %v4104_v59 = vpop.eup %4103  ;;  %v1311_v48 = vmul.f32 %v4704_v19, %v1254_v4  ;;  %v1428_v9 = vrot.slane %v1307_v43, 1  ;;  %v1429_v57 = vrot.slane %v1309_v23, 1 }
 0x3f1   : > { %v1593_v0 = vmul.f32 %v4718_v27, %v1538_v40  ;;  %v3324_v13 = vadd.f32 1.0, %v4104_v59  ;;  %v3354_v3 = vmul.f32 %v3322_v39, %v5388_v28  ;;  %v3133_v15 = vadd.f32 %v3035_v50, %v2848_v51  ;;  %v1933_v50 = vld [vmem:[#allocation2 + $0x38] sm:$0xfe]  ;;  %v1935_v51 = vld [vmem:[#allocation2 + $0x88] sm:$0x1] }
 0x3f2   : > { %v3135_v62 = vadd.f32 %v3040_v38, %v2850_v17  ;;  %v1430_v54 = vsel %vm1367_vm1, %v1428_v9, %v1429_v57  ;;  %v1434_v12 = vrot.slane %v1311_v48, 1  ;;  %v1595_v22 = vmul.f32 %v4718_v27, %v1145_v58  ;;  %v2220_v59 = vld [vmem:[#allocation2 + $0x88] sm:$0x3] }
 0x3f3   : > { %v1597_v6 = vmul.f32 %v4718_v27, %v1540_v1  ;;  %v3356_v14 = vmul.f32 %v3324_v13, %v5391_v32  ;;  %v3177_v7 = vadd.f32 %v4830_v16, %v3133_v15  ;;  %v1504_v26 = vadd.f32 %v1430_v54, %v1186_v60  ;;  %v2218_v60 = vld [vmem:[#allocation2 + $0x38] sm:$0xfc] }
 0x3f4   : > { %v3179_v45 = vadd.f32 %v4830_v16, %v3135_v62  ;;  %v1435_v34 = vsel %vm1367_vm1, %v1429_v57, %v1434_v12  ;;  %v1714_v55 = vrot.slane %v1593_v0, 2  ;;  %v1715_v28 = vrot.slane %v1595_v22, 2  ;;  %v5458_v57 = vld [vmem:[#allocation2 + $0x68] sm:$0xff]  ;;  %v5464_v15 = vld [vmem:[#allocation2 + $0x198] sm:$0xff] }
 0x3f5   : > { %v1720_v2 = vrot.slane %v1597_v6, 2  ;;  %v3374_v4 = vpack.c.bf16 %v3356_v14, %v3354_v3  ;;  %v5445_v40 = vmul.f32 0.5, %v3177_v7  ;;  %v3241_v58 = vmul.f32 0.70710677, %v3177_v7  ;;  %v2613_v62 = vld [vmem:[#allocation2 + $0x68] sm:$0xfe] }
 0x3f6   : > { %v5447_v31 = vmul.f32 0.5, %v3179_v45  ;;  %v3243_v43 = vmul.f32 0.70710677, %v3179_v45  ;;  %v1506_v23 = vadd.f32 %v1435_v34, %v1188_v46  ;;  %v1716_v32 = vsel %vm1653_vm2, %v1714_v55, %v1715_v28  ;;  %v2615_v34 = vld [vmem:[#allocation2 + $0x178] sm:$0x1] }
 0x3f7   : > { %v1721_v39 = vsel %vm1653_vm2, %v1715_v28, %v1720_v2  ;;  %3592 = vmatprep.mubr.bf16.mxu1 %v3374_v4  ;;  %4105 = verf.f32 %v3241_v58  ;;  %v1790_v17 = vadd.f32 %v1716_v32, %v1504_v26  ;;  %v1867_v38 = vmul.f32 %v5234_v56, %v4735_v35  ;;  %v2898_v4 = vld [vmem:[#allocation2 + $0x68] sm:$0xfc]  ;;  %v2900_v32 = vld [vmem:[#allocation2 + $0x178] sm:$0x3] }
 0x3f8   : > { %v1869_v1 = vmul.f32 %v5240_v42, %v4735_v35  ;;  %4107 = verf.f32 %v3243_v43  ;;  %v1792_v48 = vadd.f32 %v1721_v39, %v1506_v23  ;;  %v1988_v46 = vmul.f32 %v4741_v37, %v1933_v50  ;;  %v1132_v39 = vld [vmem:[#allocation2 + $0x140] sm:$0xff] }
 0x3f9   : > { %v1990_v9 = vmul.f32 %v5240_v42, %v4741_v37  ;;  %v1899_v0 = vadd.f32 %v1867_v38, %v1790_v17  ;;  %v1992_v13 = vmul.f32 %v4741_v37, %v1935_v51  ;;  %v2273_v3 = vmul.f32 %v4778_v52, %v2218_v60 }
 0x3fa   : > { %v2275_v56 = vmul.f32 %v5240_v42, %v4778_v52  ;;  %v1901_v54 = vadd.f32 %v1869_v1, %v1792_v48  ;;  %v2108_v12 = vrot.slane %v1988_v46, 1  ;;  %v2277_v6 = vmul.f32 %v4778_v52, %v2220_v59 }
 0x3fb   : > { %v2109_v22 = vrot.slane %v1990_v9, 1  ;;  %v2114_v14 = vrot.slane %v1992_v13, 1  ;;  %v2393_v7 = vrot.slane %v2273_v3, 2  ;;  %v2547_v26 = vmul.f32 %v4790_v18, %v5458_v57  ;;  %v1134_v3 = vld [vmem:[#allocation2 + $0x1a8] sm:$0xff] }
 0x3fc   : > { %v2394_v45 = vrot.slane %v2275_v56, 2  ;;  %v2399_v28 = vrot.slane %v2277_v6, 2  ;;  %v2549_v42 = vmul.f32 %v4790_v18, %v5464_v15  ;;  %v2668_v2 = vmul.f32 %v4799_v25, %v2613_v62  ;;  %v1241_v62 = vld [vmem:[#allocation2 + $0x140] sm:$0xfe] }
 0x3fd   : > { %v2110_v55 = vsel %vm1367_vm1, %v2108_v12, %v2109_v22  ;;  %v2115_v58 = vsel %vm1367_vm1, %v2109_v22, %v2114_v14  ;;  %v2670_v23 = vmul.f32 %v4799_v25, %v5464_v15  ;;  %v2672_v17 = vmul.f32 %v4799_v25, %v2615_v34  ;;  %v1243_v14 = vld [vmem:[#allocation2 + $0x28] sm:$0x1] }
 0x3fe   : > { %v2184_v50 = vadd.f32 %v2110_v55, %v1899_v0  ;;  %v2395_v43 = vsel %vm1653_vm2, %v2393_v7, %v2394_v45  ;;  %v2186_v51 = vadd.f32 %v2115_v58, %v1901_v54  ;;  %v2400_v60 = vsel %vm1653_vm2, %v2394_v45, %v2399_v28  ;;  %v1527_v7 = vld [vmem:[#allocation2 + $0x140] sm:$0xfc] }
 0x3ff   : > { %v2788_v38 = vrot.slane %v2668_v2, 1  ;;  %v2789_v59 = vrot.slane %v2670_v23, 1  ;;  %v2953_v48 = vmul.f32 %v4820_v10, %v2898_v4  ;;  %v2955_v46 = vmul.f32 %v4820_v10, %v5464_v15 }
 0x400   : > { %v2469_v1 = vadd.f32 %v2395_v43, %v2184_v50  ;;  %v2471_v9 = vadd.f32 %v2400_v60, %v2186_v51  ;;  %v2794_v0 = vrot.slane %v2672_v17, 1  ;;  %v2957_v13 = vmul.f32 %v4820_v10, %v2900_v32 }
 0x401   : > { %v1175_v56 = vmul.f32 %v4692_v61, %v1132_v39  ;;  %v2790_v12 = vsel %vm1367_vm1, %v2788_v38, %v2789_v59  ;;  %v3073_v22 = vrot.slane %v2953_v48, 2  ;;  %v3074_v6 = vrot.slane %v2955_v46, 2  ;;  %v1529_v39 = vld [vmem:[#allocation2 + $0x28] sm:$0x3] }
 0x402   : > { %v2579_v54 = vadd.f32 %v2547_v26, %v2469_v1  ;;  %v2581_v45 = vadd.f32 %v2549_v42, %v2471_v9  ;;  %v2795_v34 = vsel %vm1367_vm1, %v2789_v59, %v2794_v0  ;;  %v3079_v55 = vrot.slane %v2957_v13, 2 }
 0x403   : > { %v1177_v28 = vmul.f32 %v4692_v61, %v1134_v3  ;;  %v3075_v4 = vsel %vm1653_vm2, %v3073_v22, %v3074_v6  ;;  %v1290_v58 = vmul.f32 %v4707_v20, %v1241_v62  ;;  %v1292_v50 = vmul.f32 %v4707_v20, %v1134_v3 }
 0x404   : > { %v2864_v2 = vadd.f32 %v2790_v12, %v2579_v54  ;;  %v4106_v26 = vpop.eup %4105  ;;  %v2866_v43 = vadd.f32 %v2795_v34, %v2581_v45  ;;  %v3080_v23 = vsel %vm1653_vm2, %v3074_v6, %v3079_v55  ;;  %v1294_v32 = vmul.f32 %v4707_v20, %v1243_v14 }
 0x405   : > { %v1576_v42 = vmul.f32 %v4730_v33, %v1527_v7  ;;  %v4108_v51 = vpop.eup %4107  ;;  %v3305_v60 = vadd.f32 1.0, %v4106_v26  ;;  %v1401_v38 = vrot.slane %v1290_v58, 1  ;;  %v1402_v1 = vrot.slane %v1292_v50, 1  ;;  %v1922_v7 = vld [vmem:[#allocation2 + $0x158] sm:$0xfe] }
 0x406   : > { %v3149_v17 = vadd.f32 %v3075_v4, %v2864_v2  ;;  %v3307_v59 = vadd.f32 1.0, %v4108_v51  ;;  %v3151_v48 = vadd.f32 %v3080_v23, %v2866_v43  ;;  %v1406_v46 = vrot.slane %v1294_v32, 1  ;;  %v2207_v26 = vld [vmem:[#allocation2 + $0x158] sm:$0xfc] }
 0x407   : > { %v1578_v9 = vmul.f32 %v4730_v33, %v1134_v3  ;;  %v3337_v0 = vmul.f32 %v3305_v60, %v5445_v40  ;;  %v1403_v62 = vsel %vm1367_vm1, %v1401_v38, %v1402_v1  ;;  %v1580_v54 = vmul.f32 %v4730_v33, %v1529_v39  ;;  %v1924_v40 = vld [vmem:[#allocation2 + $0x170] sm:$0x1] }
 0x408   : > { %v3193_v13 = vadd.f32 %v4830_v16, %v3149_v17  ;;  %v3339_v12 = vmul.f32 %v3307_v59, %v5447_v31  ;;  %v3195_v22 = vadd.f32 %v4830_v16, %v3151_v48  ;;  %v1407_v6 = vsel %vm1367_vm1, %v1402_v1, %v1406_v46  ;;  %v2209_v39 = vld [vmem:[#allocation2 + $0x170] sm:$0x3]  ;;  %v2493_v17 = vld [vmem:[#allocation2 + $0xa0] sm:$0xff] }
 0x409   : > { %v1493_v14 = vadd.f32 %v1403_v62, %v1175_v56  ;;  %v1495_v3 = vadd.f32 %v1407_v6, %v1177_v28  ;;  %v1687_v55 = vrot.slane %v1576_v42, 2  ;;  %v1688_v50 = vrot.slane %v1578_v9, 2  ;;  %v2495_v46 = vld [vmem:[#allocation2 + $0x1d0] sm:$0xff] }
 0x40a   : > { %v5501_v45 = vmul.f32 0.5, %v3193_v13  ;;  %v3257_v34 = vmul.f32 0.70710677, %v3193_v13  ;;  %v3365_v2 = vpack.c.bf16 %v3339_v12, %v3337_v0  ;;  %v5503_v4 = vmul.f32 0.5, %v3195_v22 }
 0x40b   : > { %v3259_v58 = vmul.f32 0.70710677, %v3195_v22  ;;  %v1692_v31 = vrot.slane %v1580_v54, 2  ;;  %v1856_v43 = vmul.f32 %v5292_v49, %v4738_v36  ;;  %v1858_v56 = vmul.f32 %v5296_v29, %v4738_v36  ;;  %v2602_v54 = vld [vmem:[#allocation2 + $0xa0] sm:$0xfe] }
 0x40c   : > { %4109 = verf.f32 %v3257_v34  ;;  %3561 = vmatmul.mubr.bf16.gmra.mxu0 %v3365_v2  ;;  %v1689_v28 = vsel %vm1653_vm2, %v1687_v55, %v1688_v50  ;;  %v1971_v23 = vmul.f32 %v4744_v41, %v1922_v7  ;;  %v1973_v32 = vmul.f32 %v5296_v29, %v4744_v41  ;;  %v2604_v7 = vld [vmem:[#allocation2 + $0xf8] sm:$0x1]  ;;  %v2887_v34 = vld [vmem:[#allocation2 + $0xa0] sm:$0xfc] }
 0x40d   : > { %4111 = verf.f32 %v3259_v58  ;;  %v1693_v42 = vsel %vm1653_vm2, %v1688_v50, %v1692_v31  ;;  %v1779_v51 = vadd.f32 %v1689_v28, %v1493_v14  ;;  %v1975_v60 = vmul.f32 %v4744_v41, %v1924_v40  ;;  %v2889_v31 = vld [vmem:[#allocation2 + $0xf8] sm:$0x3] }
 0x40e   : > { %v2256_v49 = vmul.f32 %v4785_v63, %v2207_v26  ;;  %v1781_v38 = vadd.f32 %v1693_v42, %v1495_v3  ;;  %v2081_v1 = vrot.slane %v1971_v23, 1  ;;  %v2082_v59 = vrot.slane %v1973_v32, 1  ;;  %v1148_v32 = vld [vmem:[#allocation2 + $0x20] sm:$0xff] }
 0x40f   : > { %v2258_v48 = vmul.f32 %v5296_v29, %v4785_v63  ;;  %v1888_v9 = vadd.f32 %v1856_v43, %v1779_v51  ;;  %v2086_v0 = vrot.slane %v1975_v60, 1  ;;  %v2260_v13 = vmul.f32 %v4785_v63, %v2209_v39 }
 0x410   : > { %v2366_v62 = vrot.slane %v2256_v49, 2  ;;  %v1890_v12 = vadd.f32 %v1858_v56, %v1781_v38  ;;  %v2083_v22 = vsel %vm1367_vm1, %v2081_v1, %v2082_v59  ;;  %v2536_v14 = vmul.f32 %v4796_v24, %v2493_v17 }
 0x411   : > { %v2367_v6 = vrot.slane %v2258_v48, 2  ;;  %v2087_v3 = vsel %vm1367_vm1, %v2082_v59, %v2086_v0  ;;  %v2173_v55 = vadd.f32 %v2083_v22, %v1888_v9  ;;  %v2371_v40 = vrot.slane %v2260_v13, 2  ;;  %v1150_v59 = vld [vmem:[#allocation2 + $0x58] sm:$0xff]  ;;  %v1257_v48 = vld [vmem:[#allocation2 + $0x20] sm:$0xfe] }
 0x412   : > { %v2538_v29 = vmul.f32 %v4796_v24, %v2495_v46  ;;  %v2175_v2 = vadd.f32 %v2087_v3, %v1890_v12  ;;  %v2651_v50 = vmul.f32 %v4817_v5, %v2602_v54  ;;  %v2653_v26 = vmul.f32 %v4817_v5, %v2495_v46  ;;  %v1259_v54 = vld [vmem:[#allocation2 + $0xd0] sm:$0x1] }
 0x413   : > { %v2368_v58 = vsel %vm1653_vm2, %v2366_v62, %v2367_v6  ;;  %v2372_v43 = vsel %vm1653_vm2, %v2367_v6, %v2371_v40  ;;  %v2655_v28 = vmul.f32 %v4817_v5, %v2604_v7  ;;  %v2936_v23 = vmul.f32 %v4823_v11, %v2887_v34  ;;  %v1543_v40 = vld [vmem:[#allocation2 + $0x20] sm:$0xfc] }
 0x414   : > { %v2458_v56 = vadd.f32 %v2368_v58, %v2173_v55  ;;  %v2460_v39 = vadd.f32 %v2372_v43, %v2175_v2  ;;  %v2761_v42 = vrot.slane %v2651_v50, 1  ;;  %v2762_v51 = vrot.slane %v2653_v26, 1 }
 0x415   : > { %v2938_v60 = vmul.f32 %v4823_v11, %v2495_v46  ;;  %v2766_v17 = vrot.slane %v2655_v28, 1  ;;  %v2940_v38 = vmul.f32 %v4823_v11, %v2889_v31  ;;  %v3046_v1 = vrot.slane %v2936_v23, 2 }
 0x416   : > { %v2568_v49 = vadd.f32 %v2536_v14, %v2458_v56  ;;  %v2570_v9 = vadd.f32 %v2538_v29, %v2460_v39  ;;  %v2763_v0 = vsel %vm1367_vm1, %v2761_v42, %v2762_v51  ;;  %v1191_v62 = vmul.f32 %v4692_v61, %v1148_v32 }
 0x417   : > { %v3047_v13 = vrot.slane %v2938_v60, 2  ;;  %v2767_v12 = vsel %vm1367_vm1, %v2762_v51, %v2766_v17  ;;  %v3051_v6 = vrot.slane %v2940_v38, 2  ;;  %v1193_v46 = vmul.f32 %v4692_v61, %v1150_v59 }
 0x418   : > { %v2853_v22 = vadd.f32 %v2763_v0, %v2568_v49  ;;  %v2855_v7 = vadd.f32 %v2767_v12, %v2570_v9  ;;  %v1314_v3 = vmul.f32 %v4707_v20, %v1257_v48  ;;  %v1316_v55 = vmul.f32 %v4707_v20, %v1150_v59  ;;  %v1545_v49 = vld [vmem:[#allocation2 + $0xd0] sm:$0x3]  ;;  %v1938_v48 = vld [vmem:[#allocation2 + $0xc8] sm:$0xfe] }
 0x419   : > { %v4110_v14 = vpop.eup %4109  ;;  %v3048_v34 = vsel %vm1653_vm2, %v3046_v1, %v3047_v13  ;;  %v3052_v58 = vsel %vm1653_vm2, %v3047_v13, %v3051_v6  ;;  %v1318_v26 = vmul.f32 %v4707_v20, %v1259_v54  ;;  %v1600_v39 = vmul.f32 %v4730_v33, %v1543_v40 }
 0x41a   : > { %v4112_v29 = vpop.eup %4111  ;;  %v3321_v2 = vadd.f32 1.0, %v4110_v14  ;;  %v3138_v50 = vadd.f32 %v3048_v34, %v2853_v22  ;;  %v3140_v43 = vadd.f32 %v3052_v58, %v2855_v7  ;;  %v1441_v56 = vrot.slane %v1314_v3, 1  ;;  %v2223_v14 = vld [vmem:[#allocation2 + $0xc8] sm:$0xfc]  ;;  %v2225_v34 = vld [vmem:[#allocation2 + $0x70] sm:$0x3] }
 0x41b   : > { %v3323_v31 = vadd.f32 1.0, %v4112_v29  ;;  %v1442_v61 = vrot.slane %v1316_v55, 1  ;;  %v1446_v32 = vrot.slane %v1318_v26, 1  ;;  %v1602_v20 = vmul.f32 %v4730_v33, %v1150_v59  ;;  %v2509_v58 = vld [vmem:[#allocation2 + $0x90] sm:$0xff] }
 0x41c   : > { %v3353_v28 = vmul.f32 %v3321_v2, %v5501_v45  ;;  %v3182_v23 = vadd.f32 %v4840_v21, %v3138_v50  ;;  %v3184_v51 = vadd.f32 %v4840_v21, %v3140_v43  ;;  %v1604_v12 = vmul.f32 %v4730_v33, %v1545_v49  ;;  %v2511_v43 = vld [vmem:[#allocation2 + $0x30] sm:$0xff] }
 0x41d   : > { %v3355_v42 = vmul.f32 %v3323_v31, %v5503_v4  ;;  %v1443_v60 = vsel %vm1367_vm1, %v1441_v56, %v1442_v61  ;;  %v1447_v1 = vsel %vm1367_vm1, %v1442_v61, %v1446_v32  ;;  %v1940_v4 = vld [vmem:[#allocation2 + $0x70] sm:$0x1]  ;;  %v1727_v22 = vrot.slane %v1600_v39, 2  ;;  %v2620_v32 = vld [vmem:[#allocation2 + $0x1c0] sm:$0x1] }
 0x41e   : > { %v5547_v17 = vmul.f32 0.5, %v3182_v23  ;;  %v3246_v38 = vmul.f32 0.70710677, %v3182_v23  ;;  %v1509_v45 = vadd.f32 %v1443_v60, %v1191_v62  ;;  %v5550_v0 = vmul.f32 0.5, %v3184_v51  ;;  %v2903_v60 = vld [vmem:[#allocation2 + $0x90] sm:$0xfc] }
 0x41f   : > { %v3373_v9 = vpack.c.bf16 %v3355_v42, %v3353_v28  ;;  %v3248_v13 = vmul.f32 0.70710677, %v3184_v51  ;;  %v1511_v54 = vadd.f32 %v1447_v1, %v1193_v46  ;;  %v1728_v6 = vrot.slane %v1602_v20, 2  ;;  %v2905_v1 = vld [vmem:[#allocation2 + $0x1c0] sm:$0x3] }
 0x420   : > { %4113 = verf.f32 %v3246_v38  ;;  %v1872_v59 = vmul.f32 %v5349_v47, %v4738_v36  ;;  %v1874_v62 = vmul.f32 %v5353_v53, %v4738_v36  ;;  %v1995_v7 = vmul.f32 %v4744_v41, %v1938_v48 }
 0x421   : > { %3593 = vmatmul.mubr.bf16.gmra.mxu1 %v3373_v9  ;;  %4115 = verf.f32 %v3248_v13  ;;  %v1729_v46 = vsel %vm1653_vm2, %v1727_v22, %v1728_v6  ;;  %v1732_v3 = vrot.slane %v1604_v12, 2  ;;  %v1997_v33 = vmul.f32 %v5353_v53, %v4744_v41 }
 0x422   : > { %v1999_v55 = vmul.f32 %v4744_v41, %v1940_v4  ;;  %v1795_v40 = vadd.f32 %v1729_v46, %v1509_v45  ;;  %v2121_v29 = vrot.slane %v1995_v7, 1  ;;  %v2280_v2 = vmul.f32 %v4785_v63, %v2223_v14  ;;  %v2618_v41 = vld [vmem:[#allocation2 + $0x90] sm:$0xfe] }
 0x423   : > { %v2282_v47 = vmul.f32 %v5353_v53, %v4785_v63  ;;  %v1733_v36 = vsel %vm1653_vm2, %v1728_v6, %v1732_v3  ;;  %v2122_v50 = vrot.slane %v1997_v33, 1  ;;  %v2284_v31 = vmul.f32 %v4785_v63, %v2225_v34  ;;  %v1131_v6 = vld [vmem:[#allocation2 + $0x138] sm:$0xff]  ;;  %v1133_v33 = vld [vmem:[#allocation2 + $0x80] sm:$0xff] }
 0x424   : > { %v2126_v26 = vrot.slane %v1999_v55, 1  ;;  %v1797_v56 = vadd.f32 %v1733_v36, %v1511_v54  ;;  %v1904_v61 = vadd.f32 %v1872_v59, %v1795_v40  ;;  %v2406_v28 = vrot.slane %v2280_v2, 2  ;;  %v1240_v55 = vld [vmem:[#allocation2 + $0x138] sm:$0xfe] }
 0x425   : > { %v2407_v23 = vrot.slane %v2282_v47, 2  ;;  %v2123_v39 = vsel %vm1367_vm1, %v2121_v29, %v2122_v50  ;;  %v2411_v51 = vrot.slane %v2284_v31, 2  ;;  %v2552_v53 = vmul.f32 %v4796_v24, %v2509_v58  ;;  %v1242_v47 = vld [vmem:[#allocation2 + $0x1b8] sm:$0x1]  ;;  %v1526_v31 = vld [vmem:[#allocation2 + $0x138] sm:$0xfc] }
 0x426   : > { %v2127_v42 = vsel %vm1367_vm1, %v2122_v50, %v2126_v26  ;;  %v1906_v49 = vadd.f32 %v1874_v62, %v1797_v56  ;;  %v2189_v20 = vadd.f32 %v2123_v39, %v1904_v61  ;;  %v2554_v63 = vmul.f32 %v4796_v24, %v2511_v43 }
 0x427   : > { %v2408_v38 = vsel %vm1653_vm2, %v2406_v28, %v2407_v23  ;;  %v2412_v45 = vsel %vm1653_vm2, %v2407_v23, %v2411_v51  ;;  %v2675_v48 = vmul.f32 %v4817_v5, %v2618_v41  ;;  %v2677_v9 = vmul.f32 %v4817_v5, %v2511_v43  ;;  %v1528_v51 = vld [vmem:[#allocation2 + $0x1b8] sm:$0x3] }
 0x428   : > { %v2679_v13 = vmul.f32 %v4817_v5, %v2620_v32  ;;  %v2191_v54 = vadd.f32 %v2127_v42, %v1906_v49  ;;  %v2474_v4 = vadd.f32 %v2408_v38, %v2189_v20  ;;  %v2960_v12 = vmul.f32 %v4823_v11, %v2903_v60 }
 0x429   : > { %v2962_v22 = vmul.f32 %v4823_v11, %v2511_v43  ;;  %v2801_v14 = vrot.slane %v2675_v48, 1  ;;  %v2802_v59 = vrot.slane %v2677_v9, 1  ;;  %v2964_v24 = vmul.f32 %v4823_v11, %v2905_v1 }
 0x42a   : > { %v2806_v62 = vrot.slane %v2679_v13, 1  ;;  %v2476_v7 = vadd.f32 %v2412_v45, %v2191_v54  ;;  %v2584_v34 = vadd.f32 %v2552_v53, %v2474_v4  ;;  %v3086_v46 = vrot.slane %v2960_v12, 2 }
 0x42b   : > { %v3087_v3 = vrot.slane %v2962_v22, 2  ;;  %v2803_v5 = vsel %vm1367_vm1, %v2801_v14, %v2802_v59  ;;  %v3091_v29 = vrot.slane %v2964_v24, 2  ;;  %v1174_v2 = vmul.f32 %v4701_v8, %v1131_v6  ;;  %v1923_v24 = vld [vmem:[#allocation2 + $0x8] sm:$0x1] }
 0x42c   : > { %v2807_v40 = vsel %vm1367_vm1, %v2802_v59, %v2806_v62  ;;  %v2586_v36 = vadd.f32 %v2554_v63, %v2476_v7  ;;  %v2869_v50 = vadd.f32 %v2803_v5, %v2584_v34  ;;  %v1176_v11 = vmul.f32 %v4701_v8, %v1133_v33  ;;  %v1921_v62 = vld [vmem:[#allocation2 + $0xf0] sm:$0xfe] }
 0x42d   : > { %v4114_v58 = vpop.eup %4113  ;;  %v3088_v26 = vsel %vm1653_vm2, %v3086_v46, %v3087_v3  ;;  %v3092_v61 = vsel %vm1653_vm2, %v3087_v3, %v3091_v29  ;;  %v1289_v28 = vmul.f32 %v4704_v19, %v1240_v55  ;;  %v1291_v23 = vmul.f32 %v4704_v19, %v1133_v33  ;;  %v2206_v3 = vld [vmem:[#allocation2 + $0xf0] sm:$0xfc] }
 0x42e   : > { %v4116_v43 = vpop.eup %4115  ;;  %v3310_v56 = vadd.f32 1.0, %v4114_v58  ;;  %v2871_v32 = vadd.f32 %v2807_v40, %v2586_v36  ;;  %v3154_v39 = vadd.f32 %v3088_v26, %v2869_v50  ;;  %v1293_v42 = vmul.f32 %v4704_v19, %v1242_v47  ;;  %v2208_v40 = vld [vmem:[#allocation2 + $0x8] sm:$0x3] }
 0x42f   : > { %v3312_v41 = vadd.f32 1.0, %v4116_v43  ;;  %v1398_v60 = vrot.slane %v1289_v28, 1  ;;  %v1399_v49 = vrot.slane %v1291_v23, 1  ;;  %v1575_v20 = vmul.f32 %v4718_v27, %v1526_v31  ;;  %v2601_v31 = vld [vmem:[#allocation2 + $0xc0] sm:$0xfe] }
 0x430   : > { %v3342_v53 = vmul.f32 %v3310_v56, %v5547_v17  ;;  %v3156_v63 = vadd.f32 %v3092_v61, %v2871_v32  ;;  %v3198_v1 = vadd.f32 %v4840_v21, %v3154_v39  ;;  %v1404_v45 = vrot.slane %v1293_v42, 1  ;;  %v2603_v42 = vld [vmem:[#allocation2 + $0x100] sm:$0x1] }
 0x431   : > { %v3344_v38 = vmul.f32 %v3312_v41, %v5550_v0  ;;  %v1400_v48 = vsel %vm1367_vm1, %v1398_v60, %v1399_v49  ;;  %v1577_v9 = vmul.f32 %v4718_v27, %v1133_v33  ;;  %v1579_v13 = vmul.f32 %v4718_v27, %v1528_v51 }
 0x432   : > { %v1684_v54 = vrot.slane %v1575_v20, 2  ;;  %v3200_v17 = vadd.f32 %v4840_v21, %v3156_v63  ;;  %v5596_v12 = vmul.f32 0.5, %v3198_v1  ;;  %v3262_v22 = vmul.f32 0.70710677, %v3198_v1 }
 0x433   : > { %v3368_v4 = vpack.c.bf16 %v3344_v38, %v3342_v53  ;;  %v1405_v6 = vsel %vm1367_vm1, %v1399_v49, %v1404_v45  ;;  %v1492_v0 = vadd.f32 %v1400_v48, %v1174_v2  ;;  %v1685_v14 = vrot.slane %v1577_v9, 2  ;;  %v2886_v49 = vld [vmem:[#allocation2 + $0xc0] sm:$0xfc]  ;;  %v2888_v45 = vld [vmem:[#allocation2 + $0x100] sm:$0x3] }
 0x434   : > { %v1690_v59 = vrot.slane %v1579_v13, 2  ;;  %v5599_v7 = vmul.f32 0.5, %v3200_v17  ;;  %v3264_v34 = vmul.f32 0.70710677, %v3200_v17  ;;  %4117 = verf.f32 %v3262_v22 }
 0x435   : > { %3568 = vmatprep.mubr.bf16.mxu0 %v3368_v4  ;;  %v1494_v46 = vadd.f32 %v1405_v6, %v1176_v11  ;;  %v1686_v33 = vsel %vm1653_vm2, %v1684_v54, %v1685_v14  ;;  %v1855_v55 = vmul.f32 %v5406_v30, %v4735_v35  ;;  %v1857_v5 = vmul.f32 %v5408_v44, %v4735_v35  ;;  %v2492_v30 = vld [vmem:[#allocation2 + $0xc0] sm:$0xff]  ;;  %v2494_v11 = vld [vmem:[#allocation2 + $0x148] sm:$0xff]  ;;  %v1147_v4 = vld [vmem:[#allocation2 + $0x38] sm:$0xff] }
 0x436   : > { %v1691_v21 = vsel %vm1653_vm2, %v1685_v14, %v1690_v59  ;;  %4119 = verf.f32 %v3264_v34  ;;  %v1778_v29 = vadd.f32 %v1686_v33, %v1492_v0  ;;  %v1970_v47 = vmul.f32 %v4741_v37, %v1921_v62  ;;  %v1149_v34 = vld [vmem:[#allocation2 + $0x10] sm:$0xff] }
 0x437   : > { %v1780_v2 = vadd.f32 %v1691_v21, %v1494_v46  ;;  %v1972_v58 = vmul.f32 %v5408_v44, %v4741_v37  ;;  %v1974_v36 = vmul.f32 %v4741_v37, %v1923_v24  ;;  %v2255_v50 = vmul.f32 %v4778_v52, %v2206_v3  ;;  %v1256_v46 = vld [vmem:[#allocation2 + $0x38] sm:$0xfe] }
 0x438   : > { %v2257_v26 = vmul.f32 %v5408_v44, %v4778_v52  ;;  %v1887_v43 = vadd.f32 %v1855_v55, %v1778_v29  ;;  %v2078_v61 = vrot.slane %v1970_v47, 1  ;;  %v2259_v28 = vmul.f32 %v4778_v52, %v2208_v40  ;;  %v1258_v47 = vld [vmem:[#allocation2 + $0x88] sm:$0x1] }
 0x439   : > { %v1889_v56 = vadd.f32 %v1857_v5, %v1780_v2  ;;  %v2079_v23 = vrot.slane %v1972_v58, 1  ;;  %v2084_v41 = vrot.slane %v1974_v36, 1  ;;  %v2363_v32 = vrot.slane %v2255_v50, 2  ;;  %v1542_v58 = vld [vmem:[#allocation2 + $0x38] sm:$0xfc] }
 0x43a   : > { %v2364_v39 = vrot.slane %v2257_v26, 2  ;;  %v2369_v51 = vrot.slane %v2259_v28, 2  ;;  %v2535_v53 = vmul.f32 %v4790_v18, %v2492_v30  ;;  %v2537_v60 = vmul.f32 %v4790_v18, %v2494_v11  ;;  %v1544_v28 = vld [vmem:[#allocation2 + $0x88] sm:$0x3] }
 0x43b   : > { %v2650_v44 = vmul.f32 %v4799_v25, %v2601_v31  ;;  %v2080_v20 = vsel %vm1367_vm1, %v2078_v61, %v2079_v23  ;;  %v2085_v38 = vsel %vm1367_vm1, %v2079_v23, %v2084_v41  ;;  %v2652_v1 = vmul.f32 %v4799_v25, %v2494_v11 }
 0x43c   : > { %v2365_v63 = vsel %vm1653_vm2, %v2363_v32, %v2364_v39  ;;  %v2172_v48 = vadd.f32 %v2080_v20, %v1887_v43  ;;  %v2174_v9 = vadd.f32 %v2085_v38, %v1889_v56  ;;  %v2370_v13 = vsel %vm1653_vm2, %v2364_v39, %v2369_v51 }
 0x43d   : > { %v2654_v54 = vmul.f32 %v4799_v25, %v2603_v42  ;;  %v2758_v17 = vrot.slane %v2650_v44, 1  ;;  %v2759_v22 = vrot.slane %v2652_v1, 1  ;;  %v2935_v6 = vmul.f32 %v4820_v10, %v2886_v49 }
 0x43e   : > { %v2937_v0 = vmul.f32 %v4820_v10, %v2494_v11  ;;  %v2457_v14 = vadd.f32 %v2365_v63, %v2172_v48  ;;  %v2459_v59 = vadd.f32 %v2370_v13, %v2174_v9  ;;  %v2939_v24 = vmul.f32 %v4820_v10, %v2888_v45 }
 0x43f   : > { %v2764_v62 = vrot.slane %v2654_v54, 1  ;;  %v2760_v3 = vsel %vm1367_vm1, %v2758_v17, %v2759_v22  ;;  %v3043_v33 = vrot.slane %v2935_v6, 2  ;;  %v1190_v55 = vmul.f32 %v4701_v8, %v1147_v4  ;;  %v5647_v54 = vpop.f32.mrf.mxu0  ;;  %v5651_v6 = vpop.f32.mrf.mxu1 }
 0x440   : > { %v3044_v21 = vrot.slane %v2937_v0, 2  ;;  %v2567_v5 = vadd.f32 %v2535_v53, %v2457_v14  ;;  %v2569_v40 = vadd.f32 %v2537_v60, %v2459_v59  ;;  %v3049_v2 = vrot.slane %v2939_v24, 2  ;;  %v2222_v24 = vld [vmem:[#allocation2 + $0x68] sm:$0xfc] }
 0x441   : > { %v2765_v29 = vsel %vm1367_vm1, %v2759_v22, %v2764_v62  ;;  %v4118_v36 = vpop.eup %4117  ;;  %v1192_v26 = vmul.f32 %v4701_v8, %v1149_v34  ;;  %v1313_v30 = vmul.f32 %v4704_v19, %v1256_v46  ;;  %v1315_v11 = vmul.f32 %v4704_v19, %v1149_v34  ;;  %v1939_v62 = vld [vmem:[#allocation2 + $0x178] sm:$0x1] }
 0x442   : > { %v3045_v50 = vsel %vm1653_vm2, %v3043_v33, %v3044_v21  ;;  %v3326_v31 = vadd.f32 1.0, %v4118_v36  ;;  %v2852_v43 = vadd.f32 %v2760_v3, %v2567_v5  ;;  %v2854_v56 = vadd.f32 %v2765_v29, %v2569_v40  ;;  %v2224_v33 = vld [vmem:[#allocation2 + $0x178] sm:$0x3]  ;;  %v2508_v40 = vld [vmem:[#allocation2 + $0x1c8] sm:$0xff]  ;;  %v3869_v29 = vpop.f32.mrf.mxu0  ;;  %v2510_v36 = vld [vmem:[#allocation2 + $0x160] sm:$0xff] }
 0x443   : > { %v3050_v61 = vsel %vm1653_vm2, %v3044_v21, %v3049_v2  ;;  %v4120_v23 = vpop.eup %4119  ;;  %v1317_v41 = vmul.f32 %v4704_v19, %v1258_v47  ;;  %v1438_v32 = vrot.slane %v1313_v30, 1  ;;  %v1439_v39 = vrot.slane %v1315_v11, 1 }
 0x444   : > { %v1599_v42 = vmul.f32 %v4718_v27, %v1542_v58  ;;  %v3328_v51 = vadd.f32 1.0, %v4120_v23  ;;  %v3358_v8 = vmul.f32 %v3326_v31, %v5596_v12  ;;  %v3137_v53 = vadd.f32 %v3045_v50, %v2852_v43  ;;  %v3893_v50 = vpop.f32.mrf.mxu1  ;;  %v2619_v23 = vld [vmem:[#allocation2 + $0x78] sm:$0x1] }
 0x445   : > { %v3139_v60 = vadd.f32 %v3050_v61, %v2854_v56  ;;  %v1440_v44 = vsel %vm1367_vm1, %v1438_v32, %v1439_v39  ;;  %v1444_v49 = vrot.slane %v1317_v41, 1  ;;  %v1601_v20 = vmul.f32 %v4718_v27, %v1149_v34 }
 0x446   : > { %v1603_v38 = vmul.f32 %v4718_v27, %v1544_v28  ;;  %v3360_v63 = vmul.f32 %v3328_v51, %v5599_v7  ;;  %v3181_v19 = vadd.f32 %v4830_v16, %v3137_v53  ;;  %v1508_v45 = vadd.f32 %v1440_v44, %v1190_v55  ;;  %v1937_v27 = vld [vmem:[#allocation2 + $0x68] sm:$0xfe]  ;;  %v3895_v44 = vpop.f32.mrf.mxu1 }
 0x447   : > { %v5644_v1 = vadd.f32 %v4830_v16, %v3139_v60  ;;  %v1445_v48 = vsel %vm1367_vm1, %v1439_v39, %v1444_v49  ;;  %v1724_v12 = vrot.slane %v1599_v42, 2  ;;  %v1725_v9 = vrot.slane %v1601_v20, 2  ;;  %v2902_v39 = vld [vmem:[#allocation2 + $0x1c8] sm:$0xfc]  ;;  %v3871_v42 = vpop.f32.mrf.mxu0  ;;  %v2904_v60 = vld [vmem:[#allocation2 + $0x78] sm:$0x3] }
 0x448   : > { %v1730_v13 = vrot.slane %v1603_v38, 2  ;;  %v3376_v4 = vpack.c.bf16 %v3360_v63, %v3358_v8  ;;  %v5649_v17 = vmul.f32 0.5, %v3181_v19  ;;  %v3245_v22 = vmul.f32 0.70710677, %v3181_v19 }
 0x449   : > { %v3247_v7 = vmul.f32 0.70710677, %v5644_v1  ;;  %v1510_v0 = vadd.f32 %v1445_v48, %v1192_v26  ;;  %v1726_v14 = vsel %vm1653_vm2, %v1724_v12, %v1725_v9  ;;  %v1871_v46 = vmul.f32 %v5458_v57, %v4735_v35  ;;  %v5682_v12 = vld [vmem:[%s5798_s8] ss:$0 sm:$0xff] }
 0x44a   : > { %v1731_v59 = vsel %vm1653_vm2, %v1725_v9, %v1730_v13  ;;  %3600 = vmatprep.mubr.bf16.mxu1 %v3376_v4  ;;  %4121 = verf.f32 %v3245_v22  ;;  %v1794_v34 = vadd.f32 %v1726_v14, %v1508_v45  ;;  %v1873_v3 = vmul.f32 %v5464_v15, %v4735_v35  ;;  %v2617_v35 = vld [vmem:[#allocation2 + $0x1c8] sm:$0xfe] }
 0x44b   : > { %4123 = verf.f32 %v3247_v7  ;;  %v1796_v21 = vadd.f32 %v1731_v59, %v1510_v0  ;;  %v1994_v55 = vmul.f32 %v4741_v37, %v1937_v27  ;;  %v1996_v5 = vmul.f32 %v5464_v15, %v4741_v37  ;;  %v3872_v27 = vpop.f32.mrf.mxu0  ;;  %v3896_v59 = vpop.f32.mrf.mxu1 }
 0x44c   : > { %v1903_v2 = vadd.f32 %v1871_v46, %v1794_v34  ;;  %v1998_v47 = vmul.f32 %v4741_v37, %v1939_v62  ;;  %v2279_v58 = vmul.f32 %v4778_v52, %v2222_v24  ;;  %v2281_v57 = vmul.f32 %v5464_v15, %v4778_v52 }
 0x44d   : > { %v1905_v26 = vadd.f32 %v1873_v3, %v1796_v21  ;;  %v2118_v30 = vrot.slane %v1994_v55, 1  ;;  %v2119_v11 = vrot.slane %v1996_v5, 1  ;;  %v2283_v31 = vmul.f32 %v4778_v52, %v2224_v33 }
 0x44e   : > { %v2124_v43 = vrot.slane %v1998_v47, 1  ;;  %v2403_v56 = vrot.slane %v2279_v58, 2  ;;  %v2404_v61 = vrot.slane %v2281_v57, 2  ;;  %v2551_v28 = vmul.f32 %v4790_v18, %v2508_v40 }
 0x44f   : > { %v2120_v37 = vsel %vm1367_vm1, %v2118_v30, %v2119_v11  ;;  %v2409_v41 = vrot.slane %v2283_v31, 2  ;;  %v2553_v32 = vmul.f32 %v4790_v18, %v2510_v36  ;;  %v2674_v15 = vmul.f32 %v4799_v25, %v2617_v35 }
 0x450   : > { %v2125_v51 = vsel %vm1367_vm1, %v2119_v11, %v2124_v43  ;;  %v2188_v8 = vadd.f32 %v2120_v37, %v1903_v2  ;;  %v2405_v52 = vsel %vm1653_vm2, %v2403_v56, %v2404_v61  ;;  %v2676_v53 = vmul.f32 %v4799_v25, %v2510_v36 }
 0x451   : > { %v2190_v49 = vadd.f32 %v2125_v51, %v1905_v26  ;;  %v2410_v20 = vsel %vm1653_vm2, %v2404_v61, %v2409_v41  ;;  %v2678_v38 = vmul.f32 %v4799_v25, %v2619_v23  ;;  %v2798_v63 = vrot.slane %v2674_v15, 1 }
 0x452   : > { %v2473_v18 = vadd.f32 %v2405_v52, %v2188_v8  ;;  %v2799_v19 = vrot.slane %v2676_v53, 1  ;;  %v2959_v45 = vmul.f32 %v4820_v10, %v2902_v39  ;;  %v2961_v48 = vmul.f32 %v4820_v10, %v2510_v36 }
 0x453   : > { %v2475_v9 = vadd.f32 %v2410_v20, %v2190_v49  ;;  %v2804_v13 = vrot.slane %v2678_v38, 1  ;;  %v2963_v4 = vmul.f32 %v4820_v10, %v2904_v60  ;;  %v3870_v22 = vadd.f32 %v3869_v29, %v5647_v54 }
 0x454   : > { %v2583_v25 = vadd.f32 %v2551_v28, %v2473_v18  ;;  %v2800_v7 = vsel %vm1367_vm1, %v2798_v63, %v2799_v19  ;;  %v3083_v0 = vrot.slane %v2959_v45, 2  ;;  %v3084_v14 = vrot.slane %v2961_v48, 2 }
 0x455   : > { %v2585_v62 = vadd.f32 %v2553_v32, %v2475_v9  ;;  %v2805_v24 = vsel %vm1367_vm1, %v2799_v19, %v2804_v13  ;;  %v3089_v34 = vrot.slane %v2963_v4, 2  ;;  %v3547_v46 = vadd.f32 %v3870_v22, %v5682_v12 }
 0x456   : > { %v2868_v3 = vadd.f32 %v2800_v7, %v2583_v25  ;;  %v3085_v33 = vsel %vm1653_vm2, %v3083_v0, %v3084_v14  ;;  %v3894_v10 = vadd.f32 %v3893_v50, %v5651_v6  ;;  %v3873_v54 = vadd.f32 %v3872_v27, %v3871_v42 }
 0x457   : > { %v4122_v21 = vpop.eup %4121  ;;  %v3215_v55 = vmul.f32 0.5, %v5644_v1  ;;  %v2870_v5 = vadd.f32 %v2805_v24, %v2585_v62  ;;  %v3090_v40 = vsel %vm1653_vm2, %v3084_v14, %v3089_v34  ;;  %3609 = vst [vmem:[%s4603_s27] sm:$0xff] %v3547_v46  ;;  %v3897_v29 = vadd.f32 %v3896_v59, %v3895_v44 }
 0x458   : > { %v4124_v2 = vpop.eup %4123  ;;  %v3309_v47 = vadd.f32 1.0, %v4122_v21  ;;  %v3153_v58 = vadd.f32 %v3085_v33, %v2868_v3  ;;  %v3579_v57 = vadd.f32 %v3894_v10, %v5682_v12  ;;  %v3550_v36 = vadd.f32 %v3873_v54, %v5682_v12 }
 0x459   : > { %v3311_v6 = vadd.f32 1.0, %v4124_v2  ;;  %v3155_v35 = vadd.f32 %v3090_v40, %v2870_v5  ;;  %v3582_v50 = vadd.f32 %v3897_v29, %v5682_v12 }
 0x45a   : > { %v3341_v1 = vmul.f32 %v3309_v47, %v5649_v17  ;;  %v3197_v26 = vadd.f32 %v4830_v16, %v3153_v58  ;;  %3617 = vst [vmem:[%s4603_s27 + $0x40] sm:$0xff] %v3579_v57  ;;  %3610 = vst [vmem:[%s4603_s27 + $0x8] sm:$0xff] %v3550_v36 }
 0x45b   : > { %v3343_v30 = vmul.f32 %v3311_v6, %v3215_v55  ;;  %v3199_v11 = vadd.f32 %v4830_v16, %v3155_v35  ;;  %3618 = vst [vmem:[%s4603_s27 + $0x48] sm:$0xff] %v3582_v50 }
 0x45c   : > { %v3261_v31 = vmul.f32 0.70710677, %v3197_v26  ;;  %v3229_v61 = vmul.f32 0.5, %v3197_v26 }
 0x45d   : > { %v3367_v43 = vpack.c.bf16 %v3343_v30, %v3341_v1  ;;  %v3263_v56 = vmul.f32 0.70710677, %v3199_v11  ;;  %v3231_v23 = vmul.f32 0.5, %v3199_v11 }
 0x45e   : > { %4125 = verf.f32 %v3261_v31 }
 0x45f   : > { %3569 = vmatmul.mubr.bf16.gmra.mxu0 %v3367_v43  ;;  %4127 = verf.f32 %v3263_v56 }
 0x46b   : > { %v4126_v28 = vpop.eup %4125 }
 0x46c   : > { %v4128_v37 = vpop.eup %4127  ;;  %v3325_v17 = vadd.f32 1.0, %v4126_v28 }
 0x46d   : > { %v3327_v41 = vadd.f32 1.0, %v4128_v37 }
 0x46e   : > { %v3357_v32 = vmul.f32 %v3325_v17, %v3229_v61 }
 0x46f   : > { %v3359_v15 = vmul.f32 %v3327_v41, %v3231_v23 }
 0x471   : > { %v3375_v39 = vpack.c.bf16 %v3359_v15, %v3357_v32 }
 0x473   : > { %3601 = vmatmul.mubr.bf16.gmra.mxu1 %v3375_v39 }
 0x479   : > { %v3874_v16 = vpop.f32.mrf.mxu0 }
 0x47b   : > { %v3875_v42 = vpop.f32.mrf.mxu0 }
 0x47c   : > { %v3876_v51 = vadd.f32 %v3875_v42, %v3874_v16 }
 0x47d   : > { %v3877_v8 = vpop.f32.mrf.mxu0 }
 0x47e   : > { %v3555_v52 = vadd.f32 %v3876_v51, %v5682_v12 }
 0x47f   : > { %v3878_v53 = vpop.f32.mrf.mxu0 }
 0x480   : > { %3611 = vst [vmem:[%s4603_s27 + $0x10] sm:$0xff] %v3555_v52  ;;  %v3879_v60 = vadd.f32 %v3878_v53, %v3877_v8 }
 0x482   : > { %v3558_v44 = vadd.f32 %v3879_v60, %v5682_v12 }
 0x484   : > { %3612 = vst [vmem:[%s4603_s27 + $0x18] sm:$0xff] %v3558_v44 }
 0x48e   : > { %v3898_v49 = vpop.f32.mrf.mxu1 }
 0x490   : > { %v3899_v20 = vpop.f32.mrf.mxu1 }
 0x491   : > { %v3900_v38 = vadd.f32 %v3899_v20, %v3898_v49 }
 0x492   : > { %v3901_v63 = vpop.f32.mrf.mxu1 }
 0x493   : > { %v3587_v18 = vadd.f32 %v3900_v38, %v5682_v12 }
 0x494   : > { %v3902_v19 = vpop.f32.mrf.mxu1 }
 0x495   : > { %3619 = vst [vmem:[%s4603_s27 + $0x50] sm:$0xff] %v3587_v18  ;;  %v3903_v45 = vadd.f32 %v3902_v19, %v3901_v63 }
 0x497   : > { %v3590_v48 = vadd.f32 %v3903_v45, %v5682_v12 }
 0x499   : > { %3620 = vst [vmem:[%s4603_s27 + $0x58] sm:$0xff] %v3590_v48 }
 0x4cc   : > { %v3880_v9 = vpop.f32.mrf.mxu0 }
 0x4ce   : > { %v3881_v13 = vpop.f32.mrf.mxu0 }
 0x4cf   : > { %v3882_v4 = vadd.f32 %v3881_v13, %v3880_v9 }
 0x4d0   : > { %v3883_v22 = vpop.f32.mrf.mxu0 }
 0x4d1   : > { %v3563_v27 = vadd.f32 %v3882_v4, %v5682_v12 }
 0x4d2   : > { %v3884_v25 = vpop.f32.mrf.mxu0 }
 0x4d3   : > { %3613 = vst [vmem:[%s4603_s27 + $0x20] sm:$0xff] %v3563_v27  ;;  %v3885_v7 = vadd.f32 %v3884_v25, %v3883_v22 }
 0x4d5   : > { %v3566_v0 = vadd.f32 %v3885_v7, %v5682_v12 }
 0x4d7   : > { %3614 = vst [vmem:[%s4603_s27 + $0x28] sm:$0xff] %v3566_v0 }
 0x4e1   : > { %v3904_v14 = vpop.f32.mrf.mxu1 }
 0x4e3   : > { %v3905_v59 = vpop.f32.mrf.mxu1 }
 0x4e4   : > { %v3906_v62 = vadd.f32 %v3905_v59, %v3904_v14 }
 0x4e5   : > { %v3907_v24 = vpop.f32.mrf.mxu1 }
 0x4e6   : > { %v3595_v34 = vadd.f32 %v3906_v62, %v5682_v12 }
 0x4e7   : > { %v3908_v46 = vpop.f32.mrf.mxu1 }
 0x4e8   : > { %3621 = vst [vmem:[%s4603_s27 + $0x60] sm:$0xff] %v3595_v34  ;;  %v3909_v3 = vadd.f32 %v3908_v46, %v3907_v24 }
 0x4ea   : > { %v3598_v33 = vadd.f32 %v3909_v3, %v5682_v12 }
 0x4ec   : > { %3622 = vst [vmem:[%s4603_s27 + $0x68] sm:$0xff] %v3598_v33 }
 0x51f   : > { %v3886_v10 = vpop.f32.mrf.mxu0 }
 0x521   : > { %v3887_v54 = vpop.f32.mrf.mxu0 }
 0x522   : > { %v3888_v21 = vadd.f32 %v3887_v54, %v3886_v10 }
 0x523   : > { %v3889_v55 = vpop.f32.mrf.mxu0 }
 0x524   : > { %v3571_v5 = vadd.f32 %v3888_v21, %v5682_v12 }
 0x525   : > { %v3890_v40 = vpop.f32.mrf.mxu0 }
 0x526   : > { %3615 = vst [vmem:[%s4603_s27 + $0x30] sm:$0xff] %v3571_v5  ;;  %v3891_v29 = vadd.f32 %v3890_v40, %v3889_v55 }
 0x528   : > { %v3574_v2 = vadd.f32 %v3891_v29, %v5682_v12 }
 0x52a   : > { %3616 = vst [vmem:[%s4603_s27 + $0x38] sm:$0xff] %v3574_v2 }
 0x533   : > { %v3910_v47 = vpop.f32.mrf.mxu1 }
 0x535   : > { %v3911_v58 = vpop.f32.mrf.mxu1 }
 0x536   : > { %v3912_v57 = vadd.f32 %v3911_v58, %v3910_v47 }
 0x537   : > { %v3913_v36 = vpop.f32.mrf.mxu1 }
 0x538   : > { %v3603_v6 = vadd.f32 %v3912_v57, %v5682_v12 }
 0x539   : > { %v3914_v35 = vpop.f32.mrf.mxu1 }
 0x53a   : > { %3623 = vst [vmem:[%s4603_s27 + $0x70] sm:$0xff] %v3603_v6  ;;  %v3915_v50 = vadd.f32 %v3914_v35, %v3913_v36 }
 0x53c   : > { %v3606_v1 = vadd.f32 %v3915_v50, %v5682_v12 }
 0x53e   : > { %3624 = vst [vmem:[%s4603_s27 + $0x78] sm:$0xff] %v3606_v1 }
 0x53f   : > { %4142 = shalt.err (!%p4139_p13)
}
 0x540   : > { %s4143_s27 = scalar_lea.hbm %s5731_s12, 2048  ;;  %s4147_s26 = scalar_lea.hbm %s5799_s9, 8192 }
 0x541   : > { %p4144_p0 = scmp.ne.s32.totalorder %s5731_s12, %s4143_s27  ;;  %p4148_p4 = scmp.lt.s32.totalorder %s5731_s12, %s5799_s9 }
 0x542   : > { %p4149_p5 = scmp.lt.s32.totalorder %s4147_s26, %s4143_s27 }
 0x543   : > { %p4145_p1 = pnand %p4144_p0, %p4331_p3 }
 0x544   : > { %p4150_p6 = por %p4149_p5, %p4148_p4 }
 0x545   : > { %p4146_p2 = pneg %p4145_p1 }
 0x547   : > { %p4151_p7 = pnand %p4150_p6, %p4146_p2 }
 0x549   : > { %4154 = shalt.err (!%p4151_p7)
}
 0x54a   : > { %s4228_s19 = smov 128   ;;  %s4229_s25 = smov 8  }
 0x54b   : > { %3948 = dma.vmem_to_hbm [thread:$0]  (%p4331_p3), %s5733_s28, 2048, %s5731_s12, %s5739_s20, %s4228_s19, %s4228_s19, %s4229_s25  }
 0x54c PF: > { %p3954_p9 = scmp.ge.s32.totalorder %s4221_s16, 2  ;;  %s3656_s13 = sand.u32 1, %s4193_s30  }
 0x54d   : > { %s3657_s11 = scalar_lea.sflag [#allocation4], %s3656_s13 }
 0x54e   : > { %p3951_p10 = pnand %p3954_p9, %p4340_p8 }
 0x550   : > { %p3952_p11 = pneg %p3951_p10 }
 0x552   : > { %4188 = dma.done.wait (%p3952_p11), %s3657_s11, 2048  }
 0x553   : > { %4190 = vsyncadd (%p3952_p11), %s3657_s11, 4294965248  ;;  %s22_s16 = sadd.s32 1, %s4221_s16   ;;  %s5818_s24 = sld [smem:[#allocation6_spill]] }
 0x554   : > { %p19_p12 = scmp.ge.s32.totalorder %s22_s16, 6   ;;  %s5819_s11 = sld [smem:[#allocation11_spill]] }
 0x555   : > { %s5820_s12 = sld [smem:[#allocation7_spill]]  ;;  %s5824_s30 = smov %s4197_s10 }
 0x556   : > { %s5821_s13 = sld [smem:[#allocation8_spill]]  ;;  %21 = sbr.rel (!%p19_p12) target bundleno = 5 (0x5), region = 116 }
 0x557   : > { %s5822_s14 = sld [smem:[#allocation9_spill]] }
 0x558   : > { %s5823_s15 = sld [smem:[#allocation10_spill]] }
 0x559   : > { %s5825_s10 = smov %s5818_s24 }
 0x55b   :  { %3662 = vsyncpa [#allocation4], 1 }
 0x55c   :  { %3664 = vsyncpa [#allocation4 + $0x1], 1 }

</bundles_post_ra>
